<compile_context>
chip_gen: v5e
topology: v5e:2x2
jax: 0.10.0
libtpu: 0.0.40
codegen_flags: <defaults>
</compile_context>

<pallas_src>
import math
import functools

import numpy as np
import jax
import jax.numpy as jnp
from jax.experimental import pallas as pl
from jax.experimental.pallas import tpu as pltpu

# ----------------------------- config ---------------------------------------
VOCAB = 64
HIDDEN = 32
INTER = 64
N_LAYERS = 2
N_HEADS = 4
HEAD_DIM = HIDDEN // N_HEADS
MAX_POS = 16
LN_EPS = 1e-12
LANES = 128


# ----------------------- packed parameter slab layout ------------------------
def _build_layout():
    """Pack every parameter (incl. embedding tables) into one (R, 128) f32 slab.

    Weight matrices go into 8-row-aligned stripes, lane-packed first-fit so several
    narrow matrices share one stripe.  1-row vectors (biases, LN gammas/betas, the
    type-0 embedding row) are stacked on consecutive rows at the tail (no 8-row
    padding each).  Layout entries are (row, col, n_rows, n_cols).
    """
    layout = {}
    stripes = []          # each: [row_start, height, next_free_col]
    next_row = 0

    def add_mat(name, rows, cols):
        nonlocal next_row
        for s in stripes:
            if rows <= s[1] and s[2] + cols <= LANES:
                layout[name] = (s[0], s[2], rows, cols)
                s[2] += cols
                return
        height = -(-rows // 8) * 8
        layout[name] = (next_row, 0, rows, cols)
        stripes.append([next_row, height, cols])
        next_row += height

    # embedding tables + weight matrices (biggest first for tight lane packing)
    add_mat("word", VOCAB, HIDDEN)                 # 64 x 32
    for l in range(N_LAYERS):
        add_mat(f"w2{l}", INTER, HIDDEN)           # 64 x 32  (share word's stripe)
    add_mat("pos", MAX_POS, HIDDEN)                # 16 x 32
    for l in range(N_LAYERS):
        add_mat(f"wqkv{l}", HIDDEN, 3 * HIDDEN)    # 32 x 96
        add_mat(f"wo{l}", HIDDEN, HIDDEN)          # 32 x 32
        add_mat(f"wi{l}", HIDDEN, INTER)           # 32 x 64
    add_mat("wp", HIDDEN, HIDDEN)                  # 32 x 32

    # 1-row vectors: consecutive rows, one per parameter
    vec_specs = [("type0", HIDDEN), ("ln_e_g", HIDDEN), ("ln_e_b", HIDDEN),
                 ("bp", HIDDEN)]
    for l in range(N_LAYERS):
        vec_specs += [(f"bqkv{l}", 3 * HIDDEN), (f"bo{l}", HIDDEN),
                      (f"ln1_g{l}", HIDDEN), (f"ln1_b{l}", HIDDEN),
                      (f"bi{l}", INTER), (f"b2{l}", HIDDEN),
                      (f"ln2_g{l}", HIDDEN), (f"ln2_b{l}", HIDDEN)]
    for name, cols in vec_specs:
        layout[name] = (next_row, 0, 1, cols)
        next_row += 1

    total = -(-next_row // 8) * 8
    return layout, total


PARAM_LAYOUT, PARAM_ROWS = _build_layout()


def pack_params(params):
    """Host-side (numpy) packing of all parameters into one (PARAM_ROWS, 128) slab.
    Call ONCE per parameter set and pass the result to base_bert_forward."""
    slab = np.zeros((PARAM_ROWS, LANES), np.float32)

    def put(name, arr):
        arr = np.asarray(arr, np.float32)
        if arr.ndim == 1:
            arr = arr[None, :]
        r, c, rows, cols = PARAM_LAYOUT[name]
        assert arr.shape == (rows, cols), (name, arr.shape, (rows, cols))
        slab[r:r + rows, c:c + cols] = arr

    put("word", params["word"])
    put("pos", params["pos"])
    put("type0", params["type"][0])
    put("ln_e_g", params["ln_e_g"])
    put("ln_e_b", params["ln_e_b"])
    put("wp", params["wp"])
    put("bp", params["bp"])
    for l in range(N_LAYERS):
        put(f"wqkv{l}", np.concatenate([np.asarray(params["wq"][l]),
                                        np.asarray(params["wk"][l]),
                                        np.asarray(params["wv"][l])], axis=1))
        put(f"bqkv{l}", np.concatenate([np.asarray(params["bq"][l]),
                                        np.asarray(params["bk"][l]),
                                        np.asarray(params["bv"][l])], axis=0))
        put(f"wo{l}", params["wo"][l])
        put(f"bo{l}", params["bo"][l])
        put(f"ln1_g{l}", params["ln1_g"][l])
        put(f"ln1_b{l}", params["ln1_b"][l])
        put(f"wi{l}", params["wi"][l])
        put(f"bi{l}", params["bi"][l])
        put(f"w2{l}", params["w2"][l])
        put(f"b2{l}", params["b2"][l])
        put(f"ln2_g{l}", params["ln2_g"][l])
        put(f"ln2_b{l}", params["ln2_b"][l])
    return jnp.asarray(slab)


# ------------------------------ fused kernel ----------------------------------
def fused_kernel(tok_ref, p_ref, out_ref, *, pool):
    """One grid step: embed + encode 2*bs sentences (bs batch rows, both sentences
    of each pair) and write the [u, v, |u-v|, u*v] segments at lane offset 0."""
    bs, n_sent, _, S = tok_ref.shape          # (bs, 2 sentences, 2 fields, S)
    nb = bs * n_sent
    H = HIDDEN

    def param(name, rows=None):               # static slab slice
        r, c, nr, nc = PARAM_LAYOUT[name]
        if rows is not None:
            nr = rows
        return p_ref[r:r + nr, c:c + nc]

    def layer_norm(h, g, b):
        mu = jnp.mean(h, axis=-1, keepdims=True)
        var = jnp.mean(jnp.square(h - mu), axis=-1, keepdims=True)
        return (h - mu) * jax.lax.rsqrt(var + LN_EPS) * g + b

    # ---- embeddings + mask bias, built in-kernel ----
    tok = tok_ref[...]                                           # (bs, 2, 2, S) int32
    ids = tok[:, :, 0, :].reshape(nb, S)                         # (nb, S)
    mask = tok[:, :, 1, :].reshape(nb, S).astype(jnp.float32)    # (nb, S)

    # word lookup as an exact one-hot matmul on the MXU
    vocab_iota = jax.lax.broadcasted_iota(jnp.int32, (1, 1, VOCAB), 2)
    onehot = (ids[:, :, None] == vocab_iota).astype(jnp.float32)        # (nb,S,V)
    we = jnp.einsum("nsv,vh->nsh", onehot, param("word"),
                    preferred_element_type=jnp.float32)                 # (nb,S,H)
    emb = we + param("pos", rows=S)[None, :, :] + param("type0")[None, :, :]
    att_bias = ((1.0 - mask) * -10000.0)[:, None, :]                    # (nb,1,S)

    # stack all sentences on the sublane axis for the dense matmuls
    x = layer_norm(emb.reshape(nb * S, H), param("ln_e_g"), param("ln_e_b"))

    # per-head lane masks (avoids per-head slicing/concat; 4x redundant contraction
    # over H is fine at H=32 -- see scaling caveat at top of file)
    lane = jax.lax.broadcasted_iota(jnp.int32, (1, 1, H), 2)
    head_masks = [
        ((lane >= h * HEAD_DIM) & (lane < (h + 1) * HEAD_DIM)).astype(jnp.float32)
        for h in range(N_HEADS)
    ]
    scale = 1.0 / math.sqrt(HEAD_DIM)

    for l in range(N_LAYERS):
        # fused QKV projection: one (nb*S, H) x (H, 3H) matmul
        qkv = jnp.dot(x, param(f"wqkv{l}"),
                      preferred_element_type=jnp.float32) + param(f"bqkv{l}")
        q = qkv[:, 0:H].reshape(nb, S, H)
        k = qkv[:, H:2 * H].reshape(nb, S, H)
        v = qkv[:, 2 * H:3 * H].reshape(nb, S, H)

        ctx = jnp.zeros((nb, S, H), jnp.float32)
        for m in head_masks:
            # (q*m) @ k^T == q_h @ k_h^T (out-of-head lanes contribute exact zeros)
            s = jnp.einsum("bqd,bkd->bqk", q * m, k,
                           preferred_element_type=jnp.float32) * scale
            s = s + att_bias
            s = s - jnp.max(s, axis=-1, keepdims=True)
            p = jnp.exp(s)
            # approx=False keeps the rtol=2e-4 comparison tight (see review note)
            p = p * pl.reciprocal(jnp.sum(p, axis=-1, keepdims=True), approx=False)
            ctx = ctx + jnp.einsum("bqk,bkd->bqd", p, v * m,
                                   preferred_element_type=jnp.float32)

        attn = jnp.dot(ctx.reshape(nb * S, H), param(f"wo{l}"),
                       preferred_element_type=jnp.float32) + param(f"bo{l}")
        x = layer_norm(x + attn, param(f"ln1_g{l}"), param(f"ln1_b{l}"))

        ff = jax.nn.gelu(jnp.dot(x, param(f"wi{l}"),
                                 preferred_element_type=jnp.float32) + param(f"bi{l}"))
        ff = jnp.dot(ff, param(f"w2{l}"),
                     preferred_element_type=jnp.float32) + param(f"b2{l}")
        x = layer_norm(x + ff, param(f"ln2_g{l}"), param(f"ln2_b{l}"))

    # ---- pair combine, written as 4 lane-offset-0 segments ----
    if pool is None:
        cls = x.reshape(nb, S, H)[:, 0, :]                      # (nb, H) single select
        pooled = jnp.tanh(jnp.dot(cls, param("wp"),
                                  preferred_element_type=jnp.float32) + param("bp"))
        uv = pooled.reshape(bs, n_sent, H)
    else:
        x3 = x.reshape(nb, S, H)
        red = jnp.mean(x3, axis=-1) if pool == "mean" else jnp.max(x3, axis=-1)
        uv = red.reshape(bs, n_sent, S)

    u_e = uv[:, 0, :]                                           # (bs, d)
    v_e = uv[:, 1, :]
    out_ref[:, 0:1, :, :] = u_e[None, None, :, :]
    out_ref[:, 1:2, :, :] = v_e[None, None, :, :]
    out_ref[:, 2:3, :, :] = jnp.abs(u_e - v_e)[None, None, :, :]
    out_ref[:, 3:4, :, :] = (u_e * v_e)[None, None, :, :]


# ------------------------------ wrapper ---------------------------------------
def _default_n_split(batch):
    """Only v7x-class chips have 2 TensorCores per chip; on 1-TC chips a grid split
    just adds serial per-step overhead, so default to a single grid step there."""
    try:
        kind = jax.devices()[0].device_kind.lower()
        ncores = 2 if "v7" in kind else 1
    except Exception:  # pragma: no cover - defensive
        ncores = 1
    return 2 if (ncores == 2 and batch >= 2 and batch % 2 == 0) else 1


@functools.partial(jax.jit, static_argnames=("pool", "n_split"))
def _bert_pair_forward(slab, ids1, mask1, ids2, mask2, *, pool, n_split):
    B, S = ids1.shape
    bs = B // n_split
    d = HIDDEN if pool is None else S          # torch pools over dim=2 (hidden)

    # tiny glue: pack ids+mask of both sentences into one int32 input
    tok = jnp.stack([jnp.stack([ids1, ids2], axis=1),
                     jnp.stack([mask1, mask2], axis=1)], axis=2).astype(jnp.int32)
    # tok: (B, 2 sentences, 2 fields[ids,mask], S)

    out = pl.pallas_call(
        functools.partial(fused_kernel, pool=pool),
        grid=(n_split,),
        in_specs=[
            pl.BlockSpec((bs, 2, 2, S), lambda j: (j, 0, 0, 0)),
            pl.BlockSpec((PARAM_ROWS, LANES), lambda j: (0, 0)),
        ],
        out_specs=pl.BlockSpec((1, 4, bs, d), lambda j: (j, 0, 0, 0)),
        out_shape=jax.ShapeDtypeStruct((n_split, 4, bs, d), jnp.float32),
        compiler_params=pltpu.CompilerParams(
            dimension_semantics=("parallel",) if n_split > 1 else ("arbitrary",)),
    )(tok, slab)

    # (n_split, 4, bs, d) -> (B, 4*d): segment concat done as cheap XLA relayout here
    return jnp.transpose(out, (0, 2, 1, 3)).reshape(B, 4 * d)


def base_bert_forward(slab, sentence1, sentence2, pool=None, n_split=None):
    """Pallas implementation of BaseBert.forward(sentence1, sentence2).
    `slab` is the cached result of pack_params(params)."""
    assert pool in ("mean", "max", None), "Pooling method not valid!"
    ids1, mask1 = sentence1
    ids2, mask2 = sentence2
    B = ids1.shape[0]
    if n_split is None:
        n_split = _default_n_split(B)
    assert B % n_split == 0
    return _bert_pair_forward(slab, ids1, mask1, ids2, mask2,
                              pool=pool, n_split=n_split)


# --------------------------- pure-JAX reference -------------------------------
def embed(params, ids):
    S = ids.shape[1]
    we = params["word"][ids]                      # (B, S, H)
    pe = params["pos"][:S][None, :, :]            # (1, S, H)
    te = params["type"][0][None, None, :]         # (1, 1, H)  token_type_ids == 0
    return we + pe + te


def _ref_layer_norm(x, g, b):
    mu = jnp.mean(x, axis=-1, keepdims=True)
    var = jnp.mean((x - mu) ** 2, axis=-1, keepdims=True)
    return (x - mu) * jax.lax.rsqrt(var + LN_EPS) * g + b


def reference_forward(params, sentence1, sentence2, pool=None):
    """Independent straightforward per-sentence / per-head implementation."""
    def encode(ids, mask):
        e = embed(params, ids)                                   # (B,S,H)
        bias = (1.0 - mask.astype(jnp.float32)) * -10000.0       # (B,S)
        hs, ps = [], []
        for i in range(ids.shape[0]):
            x = _ref_layer_norm(e[i], params["ln_e_g"], params["ln_e_b"])
            for l in range(N_LAYERS):
                q = x @ params["wq"][l] + params["bq"][l]
                k = x @ params["wk"][l] + params["bk"][l]
                v = x @ params["wv"][l] + params["bv"][l]
                heads = []
                for h in range(N_HEADS):
                    sl = slice(h * HEAD_DIM, (h + 1) * HEAD_DIM)
                    s = (q[:, sl] @ k[:, sl].T) / math.sqrt(HEAD_DIM)
                    s = s + bias[i][None, :]
                    heads.append(jax.nn.softmax(s, axis=-1) @ v[:, sl])
                ctx = jnp.concatenate(heads, axis=-1)
                x = _ref_layer_norm(x + ctx @ params["wo"][l] + params["bo"][l],
                                    params["ln1_g"][l], params["ln1_b"][l])
                ff = jax.nn.gelu(x @ params["wi"][l] + params["bi"][l])
                ff = ff @ params["w2"][l] + params["b2"][l]
                x = _ref_layer_norm(x + ff, params["ln2_g"][l], params["ln2_b"][l])
            hs.append(x)
            ps.append(jnp.tanh(x[0] @ params["wp"] + params["bp"]))
        return jnp.stack(hs), jnp.stack(ps)

    h1, p1 = encode(*sentence1)
    h2, p2 = encode(*sentence2)
    if pool == "mean":
        u, v = h1.mean(axis=2), h2.mean(axis=2)
    elif pool == "max":
        u, v = h1.max(axis=2), h2.max(axis=2)
    else:
        u, v = p1, p2
    return jnp.concatenate([u, v, jnp.abs(u - v), u * v], axis=1)


# ------------------------------ params init -----------------------------------
def init_params(key):
    std = 0.02
    names = ["word", "pos", "type", "wq", "wk", "wv", "wo", "wi", "w2", "wp"]
    keys = dict(zip(names, jax.random.split(key, len(names))))
    f32 = jnp.float32
    L, H, I = N_LAYERS, HIDDEN, INTER
    return {
        "word": std * jax.random.normal(keys["word"], (VOCAB, H), f32),
        "pos": std * jax.random.normal(keys["pos"], (MAX_POS, H), f32),
        "type": std * jax.random.normal(keys["type"], (2, H), f32),
        "ln_e_g": jnp.ones((H,), f32), "ln_e_b": jnp.zeros((H,), f32),
        "wq": std * jax.random.normal(keys["wq"], (L, H, H), f32), "bq": jnp.zeros((L, H), f32),
        "wk": std * jax.random.normal(keys["wk"], (L, H, H), f32), "bk": jnp.zeros((L, H), f32),
        "wv": std * jax.random.normal(keys["wv"], (L, H, H), f32), "bv": jnp.zeros((L, H), f32),
        "wo": std * jax.random.normal(keys["wo"], (L, H, H), f32), "bo": jnp.zeros((L, H), f32),
        "ln1_g": jnp.ones((L, H), f32), "ln1_b": jnp.zeros((L, H), f32),
        "wi": std * jax.random.normal(keys["wi"], (L, H, I), f32), "bi": jnp.zeros((L, I), f32),
        "w2": std * jax.random.normal(keys["w2"], (L, I, H), f32), "b2": jnp.zeros((L, H), f32),
        "ln2_g": jnp.ones((L, H), f32), "ln2_b": jnp.zeros((L, H), f32),
        "wp": std * jax.random.normal(keys["wp"], (H, H), f32), "bp": jnp.zeros((H,), f32),
    }


# --------------------------------- main ----------------------------------------
if __name__ == "__main__":
    B, S = 2, 8
    key = jax.random.PRNGKey(0)
    k_p, k_i1, k_i2 = jax.random.split(key, 3)
    params = init_params(k_p)

    ids1 = jax.random.randint(k_i1, (B, S), 0, VOCAB, dtype=jnp.int32)
    ids2 = jax.random.randint(k_i2, (B, S), 0, VOCAB, dtype=jnp.int32)
    mask1 = jnp.ones((B, S), jnp.int32).at[0, 6:].set(0)   # some padding
    mask2 = jnp.ones((B, S), jnp.int32).at[1, 5:].set(0)

    # pack the parameter slab ONCE (host-side numpy; no per-forward XLA glue)
    slab = pack_params(params)

    for pool in (None, "mean", "max"):
        out = base_bert_forward(slab, (ids1, mask1), (ids2, mask2), pool=pool)
        out = jax.block_until_ready(out)
        ref = reference_forward(params, (ids1, mask1), (ids2, mask2), pool=pool)
        np.testing.assert_allclose(np.asarray(out), np.asarray(ref),
                                   rtol=2e-4, atol=1e-4)
    print("KERNEL_OK")
</pallas_src>

<mosaic_0001>
module attributes {stable_mosaic.version = 11 : i64} {
  func.func @fused_kernel(%arg0: i32, %arg1: memref<2x2x2x8xi32, #tpu.memory_space<vmem>>, %arg2: memref<216x128xf32, #tpu.memory_space<vmem>>, %arg3: memref<1x4x2x32xf32, #tpu.memory_space<vmem>>) attributes {dimension_semantics = [#tpu.dimension_semantics<arbitrary>], iteration_bounds = array<i64: 1>, scalar_prefetch = 0 : i64, scratch_operands = 0 : i64, tpu.core_type = #tpu.core_type<tc>, window_params = [{transform_indices = @transform_0, window_bounds = array<i64: 2, 2, 2, 8>}, {pipeline_mode = #tpu.pipeline_mode<synchronous>, transform_indices = @transform_1, window_bounds = array<i64: 216, 128>}, {transform_indices = @transform_2, window_bounds = array<i64: 1, 4, 2, 32>}]} {
    %c0 = arith.constant 0 : index
    %c0_0 = arith.constant 0 : index
    %c0_1 = arith.constant 0 : index
    %c0_2 = arith.constant 0 : index
    %0 = vector.load %arg1[%c0, %c0_0, %c0_1, %c0_2] : memref<2x2x2x8xi32, #tpu.memory_space<vmem>>, vector<2x2x2x8xi32>
    %1 = vector.extract_strided_slice %0 {offsets = [0, 0, 0, 0], sizes = [2, 2, 1, 8], strides = [1, 1, 1, 1]} : vector<2x2x2x8xi32> to vector<2x2x1x8xi32>
    %2 = vector.shape_cast %1 : vector<2x2x1x8xi32> to vector<2x2x8xi32>
    %3 = vector.shape_cast %2 : vector<2x2x8xi32> to vector<4x8xi32>
    %4 = vector.extract_strided_slice %0 {offsets = [0, 0, 1, 0], sizes = [2, 2, 1, 8], strides = [1, 1, 1, 1]} : vector<2x2x2x8xi32> to vector<2x2x1x8xi32>
    %5 = vector.shape_cast %4 : vector<2x2x1x8xi32> to vector<2x2x8xi32>
    %6 = vector.shape_cast %5 : vector<2x2x8xi32> to vector<4x8xi32>
    %7 = arith.sitofp %6 : vector<4x8xi32> to vector<4x8xf32>
    %8 = tpu.iota {dimensions = array<i32: 2>} : vector<1x1x64xi32>
    %9 = vector.shape_cast %3 : vector<4x8xi32> to vector<4x8x1xi32>
    %10 = vector.broadcast %9 : vector<4x8x1xi32> to vector<4x8x64xi32>
    %11 = vector.broadcast %8 : vector<1x1x64xi32> to vector<4x8x64xi32>
    %12 = arith.cmpi eq, %10, %11 : vector<4x8x64xi32>
    %13 = arith.extui %12 : vector<4x8x64xi1> to vector<4x8x64xi32>
    %14 = arith.sitofp %13 : vector<4x8x64xi32> to vector<4x8x64xf32>
    %c0_3 = arith.constant 0 : index
    %c0_4 = arith.constant 0 : index
    %15 = vector.load %arg2[%c0_3, %c0_4] : memref<216x128xf32, #tpu.memory_space<vmem>>, vector<64x32xf32>
    "tpu.trace_start"() <{level = 10 : i32, message = "nsv,vh->nsh"}> : () -> ()
    %cst = arith.constant dense<0.000000e+00> : vector<4x8x32xf32>
    %16 = tpu.matmul %14, %15, %cst {dimension_numbers = #tpu.dot_dimension_numbers<[2], [0], [0, 1], [1], [0, 0, 0, 1, 1, 1], [], []>} : vector<4x8x64xf32>, vector<64x32xf32>, vector<4x8x32xf32> -> vector<4x8x32xf32>
    "tpu.trace_stop"() : () -> ()
    %c0_5 = arith.constant 0 : index
    %c96 = arith.constant 96 : index
    %17 = vector.load %arg2[%c0_5, %c96] : memref<216x128xf32, #tpu.memory_space<vmem>>, vector<8x32xf32>
    %18 = vector.shape_cast %17 : vector<8x32xf32> to vector<1x8x32xf32>
    %19 = vector.broadcast %18 : vector<1x8x32xf32> to vector<4x8x32xf32>
    %20 = arith.addf %16, %19 : vector<4x8x32xf32>
    %c192 = arith.constant 192 : index
    %c0_6 = arith.constant 0 : index
    %21 = vector.load %arg2[%c192, %c0_6] : memref<216x128xf32, #tpu.memory_space<vmem>>, vector<1x32xf32>
    %22 = vector.shape_cast %21 : vector<1x32xf32> to vector<1x1x32xf32>
    %23 = vector.broadcast %22 : vector<1x1x32xf32> to vector<4x8x32xf32>
    %24 = arith.addf %20, %23 : vector<4x8x32xf32>
    %cst_7 = arith.constant 1.000000e+00 : f32
    %25 = vector.broadcast %cst_7 : f32 to vector<4x8xf32>
    %26 = arith.subf %25, %7 : vector<4x8xf32>
    %cst_8 = arith.constant -1.000000e+04 : f32
    %27 = vector.broadcast %cst_8 : f32 to vector<4x8xf32>
    %28 = arith.mulf %26, %27 : vector<4x8xf32>
    %29 = vector.shape_cast %28 : vector<4x8xf32> to vector<4x1x8xf32>
    %30 = vector.shape_cast %24 : vector<4x8x32xf32> to vector<32x32xf32>
    %c193 = arith.constant 193 : index
    %c0_9 = arith.constant 0 : index
    %31 = vector.load %arg2[%c193, %c0_9] : memref<216x128xf32, #tpu.memory_space<vmem>>, vector<1x32xf32>
    %c194 = arith.constant 194 : index
    %c0_10 = arith.constant 0 : index
    %32 = vector.load %arg2[%c194, %c0_10] : memref<216x128xf32, #tpu.memory_space<vmem>>, vector<1x32xf32>
    %cst_11 = arith.constant dense<0.000000e+00> : vector<32xf32>
    %33 = vector.multi_reduction <add>, %30, %cst_11 [1] : vector<32x32xf32> to vector<32xf32>
    %34 = vector.shape_cast %33 : vector<32xf32> to vector<32x1xf32>
    %cst_12 = arith.constant 3.200000e+01 : f32
    %35 = vector.broadcast %cst_12 : f32 to vector<32x1xf32>
    %36 = arith.divf %34, %35 : vector<32x1xf32>
    %37 = vector.broadcast %36 : vector<32x1xf32> to vector<32x32xf32>
    %38 = arith.subf %30, %37 : vector<32x32xf32>
    %39 = arith.mulf %38, %38 : vector<32x32xf32>
    %cst_13 = arith.constant dense<0.000000e+00> : vector<32xf32>
    %40 = vector.multi_reduction <add>, %39, %cst_13 [1] : vector<32x32xf32> to vector<32xf32>
    %41 = vector.shape_cast %40 : vector<32xf32> to vector<32x1xf32>
    %cst_14 = arith.constant 3.200000e+01 : f32
    %42 = vector.broadcast %cst_14 : f32 to vector<32x1xf32>
    %43 = arith.divf %41, %42 : vector<32x1xf32>
    %44 = vector.broadcast %36 : vector<32x1xf32> to vector<32x32xf32>
    %45 = arith.subf %30, %44 : vector<32x32xf32>
    %cst_15 = arith.constant 9.99999996E-13 : f32
    %46 = vector.broadcast %cst_15 : f32 to vector<32x1xf32>
    %47 = arith.addf %43, %46 : vector<32x1xf32>
    %48 = math.rsqrt %47 : vector<32x1xf32>
    %49 = vector.broadcast %48 : vector<32x1xf32> to vector<32x32xf32>
    %50 = arith.mulf %45, %49 : vector<32x32xf32>
    %51 = vector.broadcast %31 : vector<1x32xf32> to vector<32x32xf32>
    %52 = arith.mulf %50, %51 : vector<32x32xf32>
    %53 = vector.broadcast %32 : vector<1x32xf32> to vector<32x32xf32>
    %54 = arith.addf %52, %53 : vector<32x32xf32>
    %55 = tpu.iota {dimensions = array<i32: 2>} : vector<1x1x32xi32>
    %c0_i32 = arith.constant 0 : i32
    %56 = vector.broadcast %c0_i32 : i32 to vector<1x1x32xi32>
    %57 = arith.cmpi sge, %55, %56 : vector<1x1x32xi32>
    %c8_i32 = arith.constant 8 : i32
    %58 = vector.broadcast %c8_i32 : i32 to vector<1x1x32xi32>
    %59 = arith.cmpi slt, %55, %58 : vector<1x1x32xi32>
    %60 = arith.andi %57, %59 : vector<1x1x32xi1>
    %61 = arith.extui %60 : vector<1x1x32xi1> to vector<1x1x32xi32>
    %62 = arith.sitofp %61 : vector<1x1x32xi32> to vector<1x1x32xf32>
    %c8_i32_16 = arith.constant 8 : i32
    %63 = vector.broadcast %c8_i32_16 : i32 to vector<1x1x32xi32>
    %64 = arith.cmpi sge, %55, %63 : vector<1x1x32xi32>
    %c16_i32 = arith.constant 16 : i32
    %65 = vector.broadcast %c16_i32 : i32 to vector<1x1x32xi32>
    %66 = arith.cmpi slt, %55, %65 : vector<1x1x32xi32>
    %67 = arith.andi %64, %66 : vector<1x1x32xi1>
    %68 = arith.extui %67 : vector<1x1x32xi1> to vector<1x1x32xi32>
    %69 = arith.sitofp %68 : vector<1x1x32xi32> to vector<1x1x32xf32>
    %c16_i32_17 = arith.constant 16 : i32
    %70 = vector.broadcast %c16_i32_17 : i32 to vector<1x1x32xi32>
    %71 = arith.cmpi sge, %55, %70 : vector<1x1x32xi32>
    %c24_i32 = arith.constant 24 : i32
    %72 = vector.broadcast %c24_i32 : i32 to vector<1x1x32xi32>
    %73 = arith.cmpi slt, %55, %72 : vector<1x1x32xi32>
    %74 = arith.andi %71, %73 : vector<1x1x32xi1>
    %75 = arith.extui %74 : vector<1x1x32xi1> to vector<1x1x32xi32>
    %76 = arith.sitofp %75 : vector<1x1x32xi32> to vector<1x1x32xf32>
    %c24_i32_18 = arith.constant 24 : i32
    %77 = vector.broadcast %c24_i32_18 : i32 to vector<1x1x32xi32>
    %78 = arith.cmpi sge, %55, %77 : vector<1x1x32xi32>
    %c32_i32 = arith.constant 32 : i32
    %79 = vector.broadcast %c32_i32 : i32 to vector<1x1x32xi32>
    %80 = arith.cmpi slt, %55, %79 : vector<1x1x32xi32>
    %81 = arith.andi %78, %80 : vector<1x1x32xi1>
    %82 = arith.extui %81 : vector<1x1x32xi1> to vector<1x1x32xi32>
    %83 = arith.sitofp %82 : vector<1x1x32xi32> to vector<1x1x32xf32>
    %c64 = arith.constant 64 : index
    %c0_19 = arith.constant 0 : index
    %84 = vector.load %arg2[%c64, %c0_19] : memref<216x128xf32, #tpu.memory_space<vmem>>, vector<32x96xf32>
    %cst_20 = arith.constant dense<0.000000e+00> : vector<32x96xf32>
    %85 = tpu.matmul %54, %84, %cst_20 {dimension_numbers = #tpu.dot_dimension_numbers<[1], [0], [0], [1], [0, 0, 1, 1], [], []>} : vector<32x32xf32>, vector<32x96xf32>, vector<32x96xf32> -> vector<32x96xf32>
    %c196 = arith.constant 196 : index
    %c0_21 = arith.constant 0 : index
    %86 = vector.load %arg2[%c196, %c0_21] : memref<216x128xf32, #tpu.memory_space<vmem>>, vector<1x96xf32>
    %87 = vector.broadcast %86 : vector<1x96xf32> to vector<32x96xf32>
    %88 = arith.addf %85, %87 : vector<32x96xf32>
    %89 = vector.extract_strided_slice %88 {offsets = [0, 0], sizes = [32, 32], strides = [1, 1]} : vector<32x96xf32> to vector<32x32xf32>
    %90 = vector.shape_cast %89 : vector<32x32xf32> to vector<4x8x32xf32>
    %91 = vector.extract_strided_slice %88 {offsets = [0, 32], sizes = [32, 32], strides = [1, 1]} : vector<32x96xf32> to vector<32x32xf32>
    %92 = vector.shape_cast %91 : vector<32x32xf32> to vector<4x8x32xf32>
    %93 = vector.extract_strided_slice %88 {offsets = [0, 64], sizes = [32, 32], strides = [1, 1]} : vector<32x96xf32> to vector<32x32xf32>
    %94 = vector.shape_cast %93 : vector<32x32xf32> to vector<4x8x32xf32>
    %cst_22 = arith.constant 0.000000e+00 : f32
    %95 = vector.broadcast %cst_22 : f32 to vector<4x8x32xf32>
    %96 = vector.broadcast %62 : vector<1x1x32xf32> to vector<4x8x32xf32>
    %97 = arith.mulf %90, %96 : vector<4x8x32xf32>
    "tpu.trace_start"() <{level = 10 : i32, message = "bqd,bkd->bqk"}> : () -> ()
    %cst_23 = arith.constant dense<0.000000e+00> : vector<4x8x8xf32>
    %98 = tpu.matmul %97, %92, %cst_23 {dimension_numbers = #tpu.dot_dimension_numbers<[2], [2], [1], [1], [0, 0, 0, 1, 1, 1], [0], [0]>} : vector<4x8x32xf32>, vector<4x8x32xf32>, vector<4x8x8xf32> -> vector<4x8x8xf32>
    "tpu.trace_stop"() : () -> ()
    %cst_24 = arith.constant 0.353553385 : f32
    %99 = vector.broadcast %cst_24 : f32 to vector<4x8x8xf32>
    %100 = arith.mulf %98, %99 : vector<4x8x8xf32>
    %101 = vector.broadcast %29 : vector<4x1x8xf32> to vector<4x8x8xf32>
    %102 = arith.addf %100, %101 : vector<4x8x8xf32>
    %cst_25 = arith.constant dense<0xFF800000> : vector<4x8xf32>
    %103 = vector.multi_reduction <maximumf>, %102, %cst_25 [2] : vector<4x8x8xf32> to vector<4x8xf32>
    %104 = vector.shape_cast %103 : vector<4x8xf32> to vector<4x8x1xf32>
    %105 = vector.broadcast %104 : vector<4x8x1xf32> to vector<4x8x8xf32>
    %106 = arith.subf %102, %105 : vector<4x8x8xf32>
    %107 = math.exp %106 : vector<4x8x8xf32>
    %cst_26 = arith.constant dense<0.000000e+00> : vector<4x8xf32>
    %108 = vector.multi_reduction <add>, %107, %cst_26 [2] : vector<4x8x8xf32> to vector<4x8xf32>
    %109 = vector.shape_cast %108 : vector<4x8xf32> to vector<4x8x1xf32>
    %110 = tpu.reciprocal %109 : vector<4x8x1xf32> -> vector<4x8x1xf32>
    %111 = vector.broadcast %110 : vector<4x8x1xf32> to vector<4x8x8xf32>
    %112 = arith.mulf %107, %111 : vector<4x8x8xf32>
    %113 = vector.broadcast %62 : vector<1x1x32xf32> to vector<4x8x32xf32>
    %114 = arith.mulf %94, %113 : vector<4x8x32xf32>
    "tpu.trace_start"() <{level = 10 : i32, message = "bqk,bkd->bqd"}> : () -> ()
    %cst_27 = arith.constant dense<0.000000e+00> : vector<4x8x32xf32>
    %115 = tpu.matmul %112, %114, %cst_27 {dimension_numbers = #tpu.dot_dimension_numbers<[2], [1], [1], [2], [0, 0, 0, 1, 1, 2], [0], [0]>} : vector<4x8x8xf32>, vector<4x8x32xf32>, vector<4x8x32xf32> -> vector<4x8x32xf32>
    "tpu.trace_stop"() : () -> ()
    %116 = arith.addf %95, %115 : vector<4x8x32xf32>
    %117 = vector.broadcast %69 : vector<1x1x32xf32> to vector<4x8x32xf32>
    %118 = arith.mulf %90, %117 : vector<4x8x32xf32>
    "tpu.trace_start"() <{level = 10 : i32, message = "bqd,bkd->bqk"}> : () -> ()
    %cst_28 = arith.constant dense<0.000000e+00> : vector<4x8x8xf32>
    %119 = tpu.matmul %118, %92, %cst_28 {dimension_numbers = #tpu.dot_dimension_numbers<[2], [2], [1], [1], [0, 0, 0, 1, 1, 1], [0], [0]>} : vector<4x8x32xf32>, vector<4x8x32xf32>, vector<4x8x8xf32> -> vector<4x8x8xf32>
    "tpu.trace_stop"() : () -> ()
    %cst_29 = arith.constant 0.353553385 : f32
    %120 = vector.broadcast %cst_29 : f32 to vector<4x8x8xf32>
    %121 = arith.mulf %119, %120 : vector<4x8x8xf32>
    %122 = vector.broadcast %29 : vector<4x1x8xf32> to vector<4x8x8xf32>
    %123 = arith.addf %121, %122 : vector<4x8x8xf32>
    %cst_30 = arith.constant dense<0xFF800000> : vector<4x8xf32>
    %124 = vector.multi_reduction <maximumf>, %123, %cst_30 [2] : vector<4x8x8xf32> to vector<4x8xf32>
    %125 = vector.shape_cast %124 : vector<4x8xf32> to vector<4x8x1xf32>
    %126 = vector.broadcast %125 : vector<4x8x1xf32> to vector<4x8x8xf32>
    %127 = arith.subf %123, %126 : vector<4x8x8xf32>
    %128 = math.exp %127 : vector<4x8x8xf32>
    %cst_31 = arith.constant dense<0.000000e+00> : vector<4x8xf32>
    %129 = vector.multi_reduction <add>, %128, %cst_31 [2] : vector<4x8x8xf32> to vector<4x8xf32>
    %130 = vector.shape_cast %129 : vector<4x8xf32> to vector<4x8x1xf32>
    %131 = tpu.reciprocal %130 : vector<4x8x1xf32> -> vector<4x8x1xf32>
    %132 = vector.broadcast %131 : vector<4x8x1xf32> to vector<4x8x8xf32>
    %133 = arith.mulf %128, %132 : vector<4x8x8xf32>
    %134 = vector.broadcast %69 : vector<1x1x32xf32> to vector<4x8x32xf32>
    %135 = arith.mulf %94, %134 : vector<4x8x32xf32>
    "tpu.trace_start"() <{level = 10 : i32, message = "bqk,bkd->bqd"}> : () -> ()
    %cst_32 = arith.constant dense<0.000000e+00> : vector<4x8x32xf32>
    %136 = tpu.matmul %133, %135, %cst_32 {dimension_numbers = #tpu.dot_dimension_numbers<[2], [1], [1], [2], [0, 0, 0, 1, 1, 2], [0], [0]>} : vector<4x8x8xf32>, vector<4x8x32xf32>, vector<4x8x32xf32> -> vector<4x8x32xf32>
    "tpu.trace_stop"() : () -> ()
    %137 = arith.addf %116, %136 : vector<4x8x32xf32>
    %138 = vector.broadcast %76 : vector<1x1x32xf32> to vector<4x8x32xf32>
    %139 = arith.mulf %90, %138 : vector<4x8x32xf32>
    "tpu.trace_start"() <{level = 10 : i32, message = "bqd,bkd->bqk"}> : () -> ()
    %cst_33 = arith.constant dense<0.000000e+00> : vector<4x8x8xf32>
    %140 = tpu.matmul %139, %92, %cst_33 {dimension_numbers = #tpu.dot_dimension_numbers<[2], [2], [1], [1], [0, 0, 0, 1, 1, 1], [0], [0]>} : vector<4x8x32xf32>, vector<4x8x32xf32>, vector<4x8x8xf32> -> vector<4x8x8xf32>
    "tpu.trace_stop"() : () -> ()
    %cst_34 = arith.constant 0.353553385 : f32
    %141 = vector.broadcast %cst_34 : f32 to vector<4x8x8xf32>
    %142 = arith.mulf %140, %141 : vector<4x8x8xf32>
    %143 = vector.broadcast %29 : vector<4x1x8xf32> to vector<4x8x8xf32>
    %144 = arith.addf %142, %143 : vector<4x8x8xf32>
    %cst_35 = arith.constant dense<0xFF800000> : vector<4x8xf32>
    %145 = vector.multi_reduction <maximumf>, %144, %cst_35 [2] : vector<4x8x8xf32> to vector<4x8xf32>
    %146 = vector.shape_cast %145 : vector<4x8xf32> to vector<4x8x1xf32>
    %147 = vector.broadcast %146 : vector<4x8x1xf32> to vector<4x8x8xf32>
    %148 = arith.subf %144, %147 : vector<4x8x8xf32>
    %149 = math.exp %148 : vector<4x8x8xf32>
    %cst_36 = arith.constant dense<0.000000e+00> : vector<4x8xf32>
    %150 = vector.multi_reduction <add>, %149, %cst_36 [2] : vector<4x8x8xf32> to vector<4x8xf32>
    %151 = vector.shape_cast %150 : vector<4x8xf32> to vector<4x8x1xf32>
    %152 = tpu.reciprocal %151 : vector<4x8x1xf32> -> vector<4x8x1xf32>
    %153 = vector.broadcast %152 : vector<4x8x1xf32> to vector<4x8x8xf32>
    %154 = arith.mulf %149, %153 : vector<4x8x8xf32>
    %155 = vector.broadcast %76 : vector<1x1x32xf32> to vector<4x8x32xf32>
    %156 = arith.mulf %94, %155 : vector<4x8x32xf32>
    "tpu.trace_start"() <{level = 10 : i32, message = "bqk,bkd->bqd"}> : () -> ()
    %cst_37 = arith.constant dense<0.000000e+00> : vector<4x8x32xf32>
    %157 = tpu.matmul %154, %156, %cst_37 {dimension_numbers = #tpu.dot_dimension_numbers<[2], [1], [1], [2], [0, 0, 0, 1, 1, 2], [0], [0]>} : vector<4x8x8xf32>, vector<4x8x32xf32>, vector<4x8x32xf32> -> vector<4x8x32xf32>
    "tpu.trace_stop"() : () -> ()
    %158 = arith.addf %137, %157 : vector<4x8x32xf32>
    %159 = vector.broadcast %83 : vector<1x1x32xf32> to vector<4x8x32xf32>
    %160 = arith.mulf %90, %159 : vector<4x8x32xf32>
    "tpu.trace_start"() <{level = 10 : i32, message = "bqd,bkd->bqk"}> : () -> ()
    %cst_38 = arith.constant dense<0.000000e+00> : vector<4x8x8xf32>
    %161 = tpu.matmul %160, %92, %cst_38 {dimension_numbers = #tpu.dot_dimension_numbers<[2], [2], [1], [1], [0, 0, 0, 1, 1, 1], [0], [0]>} : vector<4x8x32xf32>, vector<4x8x32xf32>, vector<4x8x8xf32> -> vector<4x8x8xf32>
    "tpu.trace_stop"() : () -> ()
    %cst_39 = arith.constant 0.353553385 : f32
    %162 = vector.broadcast %cst_39 : f32 to vector<4x8x8xf32>
    %163 = arith.mulf %161, %162 : vector<4x8x8xf32>
    %164 = vector.broadcast %29 : vector<4x1x8xf32> to vector<4x8x8xf32>
    %165 = arith.addf %163, %164 : vector<4x8x8xf32>
    %cst_40 = arith.constant dense<0xFF800000> : vector<4x8xf32>
    %166 = vector.multi_reduction <maximumf>, %165, %cst_40 [2] : vector<4x8x8xf32> to vector<4x8xf32>
    %167 = vector.shape_cast %166 : vector<4x8xf32> to vector<4x8x1xf32>
    %168 = vector.broadcast %167 : vector<4x8x1xf32> to vector<4x8x8xf32>
    %169 = arith.subf %165, %168 : vector<4x8x8xf32>
    %170 = math.exp %169 : vector<4x8x8xf32>
    %cst_41 = arith.constant dense<0.000000e+00> : vector<4x8xf32>
    %171 = vector.multi_reduction <add>, %170, %cst_41 [2] : vector<4x8x8xf32> to vector<4x8xf32>
    %172 = vector.shape_cast %171 : vector<4x8xf32> to vector<4x8x1xf32>
    %173 = tpu.reciprocal %172 : vector<4x8x1xf32> -> vector<4x8x1xf32>
    %174 = vector.broadcast %173 : vector<4x8x1xf32> to vector<4x8x8xf32>
    %175 = arith.mulf %170, %174 : vector<4x8x8xf32>
    %176 = vector.broadcast %83 : vector<1x1x32xf32> to vector<4x8x32xf32>
    %177 = arith.mulf %94, %176 : vector<4x8x32xf32>
    "tpu.trace_start"() <{level = 10 : i32, message = "bqk,bkd->bqd"}> : () -> ()
    %cst_42 = arith.constant dense<0.000000e+00> : vector<4x8x32xf32>
    %178 = tpu.matmul %175, %177, %cst_42 {dimension_numbers = #tpu.dot_dimension_numbers<[2], [1], [1], [2], [0, 0, 0, 1, 1, 2], [0], [0]>} : vector<4x8x8xf32>, vector<4x8x32xf32>, vector<4x8x32xf32> -> vector<4x8x32xf32>
    "tpu.trace_stop"() : () -> ()
    %179 = arith.addf %158, %178 : vector<4x8x32xf32>
    %180 = vector.shape_cast %179 : vector<4x8x32xf32> to vector<32x32xf32>
    %c64_43 = arith.constant 64 : index
    %c96_44 = arith.constant 96 : index
    %181 = vector.load %arg2[%c64_43, %c96_44] : memref<216x128xf32, #tpu.memory_space<vmem>>, vector<32x32xf32>
    %cst_45 = arith.constant dense<0.000000e+00> : vector<32x32xf32>
    %182 = tpu.matmul %180, %181, %cst_45 {dimension_numbers = #tpu.dot_dimension_numbers<[1], [0], [0], [1], [0, 0, 1, 1], [], []>} : vector<32x32xf32>, vector<32x32xf32>, vector<32x32xf32> -> vector<32x32xf32>
    %c197 = arith.constant 197 : index
    %c0_46 = arith.constant 0 : index
    %183 = vector.load %arg2[%c197, %c0_46] : memref<216x128xf32, #tpu.memory_space<vmem>>, vector<1x32xf32>
    %184 = vector.broadcast %183 : vector<1x32xf32> to vector<32x32xf32>
    %185 = arith.addf %182, %184 : vector<32x32xf32>
    %186 = arith.addf %54, %185 : vector<32x32xf32>
    %c198 = arith.constant 198 : index
    %c0_47 = arith.constant 0 : index
    %187 = vector.load %arg2[%c198, %c0_47] : memref<216x128xf32, #tpu.memory_space<vmem>>, vector<1x32xf32>
    %c199 = arith.constant 199 : index
    %c0_48 = arith.constant 0 : index
    %188 = vector.load %arg2[%c199, %c0_48] : memref<216x128xf32, #tpu.memory_space<vmem>>, vector<1x32xf32>
    %cst_49 = arith.constant dense<0.000000e+00> : vector<32xf32>
    %189 = vector.multi_reduction <add>, %186, %cst_49 [1] : vector<32x32xf32> to vector<32xf32>
    %190 = vector.shape_cast %189 : vector<32xf32> to vector<32x1xf32>
    %cst_50 = arith.constant 3.200000e+01 : f32
    %191 = vector.broadcast %cst_50 : f32 to vector<32x1xf32>
    %192 = arith.divf %190, %191 : vector<32x1xf32>
    %193 = vector.broadcast %192 : vector<32x1xf32> to vector<32x32xf32>
    %194 = arith.subf %186, %193 : vector<32x32xf32>
    %195 = arith.mulf %194, %194 : vector<32x32xf32>
    %cst_51 = arith.constant dense<0.000000e+00> : vector<32xf32>
    %196 = vector.multi_reduction <add>, %195, %cst_51 [1] : vector<32x32xf32> to vector<32xf32>
    %197 = vector.shape_cast %196 : vector<32xf32> to vector<32x1xf32>
    %cst_52 = arith.constant 3.200000e+01 : f32
    %198 = vector.broadcast %cst_52 : f32 to vector<32x1xf32>
    %199 = arith.divf %197, %198 : vector<32x1xf32>
    %200 = vector.broadcast %192 : vector<32x1xf32> to vector<32x32xf32>
    %201 = arith.subf %186, %200 : vector<32x32xf32>
    %cst_53 = arith.constant 9.99999996E-13 : f32
    %202 = vector.broadcast %cst_53 : f32 to vector<32x1xf32>
    %203 = arith.addf %199, %202 : vector<32x1xf32>
    %204 = math.rsqrt %203 : vector<32x1xf32>
    %205 = vector.broadcast %204 : vector<32x1xf32> to vector<32x32xf32>
    %206 = arith.mulf %201, %205 : vector<32x32xf32>
    %207 = vector.broadcast %187 : vector<1x32xf32> to vector<32x32xf32>
    %208 = arith.mulf %206, %207 : vector<32x32xf32>
    %209 = vector.broadcast %188 : vector<1x32xf32> to vector<32x32xf32>
    %210 = arith.addf %208, %209 : vector<32x32xf32>
    %c96_54 = arith.constant 96 : index
    %c0_55 = arith.constant 0 : index
    %211 = vector.load %arg2[%c96_54, %c0_55] : memref<216x128xf32, #tpu.memory_space<vmem>>, vector<32x64xf32>
    %cst_56 = arith.constant dense<0.000000e+00> : vector<32x64xf32>
    %212 = tpu.matmul %210, %211, %cst_56 {dimension_numbers = #tpu.dot_dimension_numbers<[1], [0], [0], [1], [0, 0, 1, 1], [], []>} : vector<32x32xf32>, vector<32x64xf32>, vector<32x64xf32> -> vector<32x64xf32>
    %c200 = arith.constant 200 : index
    %c0_57 = arith.constant 0 : index
    %213 = vector.load %arg2[%c200, %c0_57] : memref<216x128xf32, #tpu.memory_space<vmem>>, vector<1x64xf32>
    %214 = vector.broadcast %213 : vector<1x64xf32> to vector<32x64xf32>
    %215 = arith.addf %212, %214 : vector<32x64xf32>
    %216 = arith.mulf %215, %215 : vector<32x64xf32>
    %217 = arith.mulf %215, %216 : vector<32x64xf32>
    %cst_58 = arith.constant 4.471500e-02 : f32
    %218 = vector.broadcast %cst_58 : f32 to vector<32x64xf32>
    %219 = arith.mulf %218, %217 : vector<32x64xf32>
    %220 = arith.addf %215, %219 : vector<32x64xf32>
    %cst_59 = arith.constant 0.797884583 : f32
    %221 = vector.broadcast %cst_59 : f32 to vector<32x64xf32>
    %222 = arith.mulf %221, %220 : vector<32x64xf32>
    %223 = math.tanh %222 : vector<32x64xf32>
    %cst_60 = arith.constant 1.000000e+00 : f32
    %224 = vector.broadcast %cst_60 : f32 to vector<32x64xf32>
    %225 = arith.addf %224, %223 : vector<32x64xf32>
    %cst_61 = arith.constant 5.000000e-01 : f32
    %226 = vector.broadcast %cst_61 : f32 to vector<32x64xf32>
    %227 = arith.mulf %226, %225 : vector<32x64xf32>
    %228 = arith.mulf %215, %227 : vector<32x64xf32>
    %c0_62 = arith.constant 0 : index
    %c32 = arith.constant 32 : index
    %229 = vector.load %arg2[%c0_62, %c32] : memref<216x128xf32, #tpu.memory_space<vmem>>, vector<64x32xf32>
    %cst_63 = arith.constant dense<0.000000e+00> : vector<32x32xf32>
    %230 = tpu.matmul %228, %229, %cst_63 {dimension_numbers = #tpu.dot_dimension_numbers<[1], [0], [0], [1], [0, 0, 1, 1], [], []>} : vector<32x64xf32>, vector<64x32xf32>, vector<32x32xf32> -> vector<32x32xf32>
    %c201 = arith.constant 201 : index
    %c0_64 = arith.constant 0 : index
    %231 = vector.load %arg2[%c201, %c0_64] : memref<216x128xf32, #tpu.memory_space<vmem>>, vector<1x32xf32>
    %232 = vector.broadcast %231 : vector<1x32xf32> to vector<32x32xf32>
    %233 = arith.addf %230, %232 : vector<32x32xf32>
    %234 = arith.addf %210, %233 : vector<32x32xf32>
    %c202 = arith.constant 202 : index
    %c0_65 = arith.constant 0 : index
    %235 = vector.load %arg2[%c202, %c0_65] : memref<216x128xf32, #tpu.memory_space<vmem>>, vector<1x32xf32>
    %c203 = arith.constant 203 : index
    %c0_66 = arith.constant 0 : index
    %236 = vector.load %arg2[%c203, %c0_66] : memref<216x128xf32, #tpu.memory_space<vmem>>, vector<1x32xf32>
    %cst_67 = arith.constant dense<0.000000e+00> : vector<32xf32>
    %237 = vector.multi_reduction <add>, %234, %cst_67 [1] : vector<32x32xf32> to vector<32xf32>
    %238 = vector.shape_cast %237 : vector<32xf32> to vector<32x1xf32>
    %cst_68 = arith.constant 3.200000e+01 : f32
    %239 = vector.broadcast %cst_68 : f32 to vector<32x1xf32>
    %240 = arith.divf %238, %239 : vector<32x1xf32>
    %241 = vector.broadcast %240 : vector<32x1xf32> to vector<32x32xf32>
    %242 = arith.subf %234, %241 : vector<32x32xf32>
    %243 = arith.mulf %242, %242 : vector<32x32xf32>
    %cst_69 = arith.constant dense<0.000000e+00> : vector<32xf32>
    %244 = vector.multi_reduction <add>, %243, %cst_69 [1] : vector<32x32xf32> to vector<32xf32>
    %245 = vector.shape_cast %244 : vector<32xf32> to vector<32x1xf32>
    %cst_70 = arith.constant 3.200000e+01 : f32
    %246 = vector.broadcast %cst_70 : f32 to vector<32x1xf32>
    %247 = arith.divf %245, %246 : vector<32x1xf32>
    %248 = vector.broadcast %240 : vector<32x1xf32> to vector<32x32xf32>
    %249 = arith.subf %234, %248 : vector<32x32xf32>
    %cst_71 = arith.constant 9.99999996E-13 : f32
    %250 = vector.broadcast %cst_71 : f32 to vector<32x1xf32>
    %251 = arith.addf %247, %250 : vector<32x1xf32>
    %252 = math.rsqrt %251 : vector<32x1xf32>
    %253 = vector.broadcast %252 : vector<32x1xf32> to vector<32x32xf32>
    %254 = arith.mulf %249, %253 : vector<32x32xf32>
    %255 = vector.broadcast %235 : vector<1x32xf32> to vector<32x32xf32>
    %256 = arith.mulf %254, %255 : vector<32x32xf32>
    %257 = vector.broadcast %236 : vector<1x32xf32> to vector<32x32xf32>
    %258 = arith.addf %256, %257 : vector<32x32xf32>
    %c128 = arith.constant 128 : index
    %c0_72 = arith.constant 0 : index
    %259 = vector.load %arg2[%c128, %c0_72] : memref<216x128xf32, #tpu.memory_space<vmem>>, vector<32x96xf32>
    %cst_73 = arith.constant dense<0.000000e+00> : vector<32x96xf32>
    %260 = tpu.matmul %258, %259, %cst_73 {dimension_numbers = #tpu.dot_dimension_numbers<[1], [0], [0], [1], [0, 0, 1, 1], [], []>} : vector<32x32xf32>, vector<32x96xf32>, vector<32x96xf32> -> vector<32x96xf32>
    %c204 = arith.constant 204 : index
    %c0_74 = arith.constant 0 : index
    %261 = vector.load %arg2[%c204, %c0_74] : memref<216x128xf32, #tpu.memory_space<vmem>>, vector<1x96xf32>
    %262 = vector.broadcast %261 : vector<1x96xf32> to vector<32x96xf32>
    %263 = arith.addf %260, %262 : vector<32x96xf32>
    %264 = vector.extract_strided_slice %263 {offsets = [0, 0], sizes = [32, 32], strides = [1, 1]} : vector<32x96xf32> to vector<32x32xf32>
    %265 = vector.shape_cast %264 : vector<32x32xf32> to vector<4x8x32xf32>
    %266 = vector.extract_strided_slice %263 {offsets = [0, 32], sizes = [32, 32], strides = [1, 1]} : vector<32x96xf32> to vector<32x32xf32>
    %267 = vector.shape_cast %266 : vector<32x32xf32> to vector<4x8x32xf32>
    %268 = vector.extract_strided_slice %263 {offsets = [0, 64], sizes = [32, 32], strides = [1, 1]} : vector<32x96xf32> to vector<32x32xf32>
    %269 = vector.shape_cast %268 : vector<32x32xf32> to vector<4x8x32xf32>
    %cst_75 = arith.constant 0.000000e+00 : f32
    %270 = vector.broadcast %cst_75 : f32 to vector<4x8x32xf32>
    %271 = vector.broadcast %62 : vector<1x1x32xf32> to vector<4x8x32xf32>
    %272 = arith.mulf %265, %271 : vector<4x8x32xf32>
    "tpu.trace_start"() <{level = 10 : i32, message = "bqd,bkd->bqk"}> : () -> ()
    %cst_76 = arith.constant dense<0.000000e+00> : vector<4x8x8xf32>
    %273 = tpu.matmul %272, %267, %cst_76 {dimension_numbers = #tpu.dot_dimension_numbers<[2], [2], [1], [1], [0, 0, 0, 1, 1, 1], [0], [0]>} : vector<4x8x32xf32>, vector<4x8x32xf32>, vector<4x8x8xf32> -> vector<4x8x8xf32>
    "tpu.trace_stop"() : () -> ()
    %cst_77 = arith.constant 0.353553385 : f32
    %274 = vector.broadcast %cst_77 : f32 to vector<4x8x8xf32>
    %275 = arith.mulf %273, %274 : vector<4x8x8xf32>
    %276 = vector.broadcast %29 : vector<4x1x8xf32> to vector<4x8x8xf32>
    %277 = arith.addf %275, %276 : vector<4x8x8xf32>
    %cst_78 = arith.constant dense<0xFF800000> : vector<4x8xf32>
    %278 = vector.multi_reduction <maximumf>, %277, %cst_78 [2] : vector<4x8x8xf32> to vector<4x8xf32>
    %279 = vector.shape_cast %278 : vector<4x8xf32> to vector<4x8x1xf32>
    %280 = vector.broadcast %279 : vector<4x8x1xf32> to vector<4x8x8xf32>
    %281 = arith.subf %277, %280 : vector<4x8x8xf32>
    %282 = math.exp %281 : vector<4x8x8xf32>
    %cst_79 = arith.constant dense<0.000000e+00> : vector<4x8xf32>
    %283 = vector.multi_reduction <add>, %282, %cst_79 [2] : vector<4x8x8xf32> to vector<4x8xf32>
    %284 = vector.shape_cast %283 : vector<4x8xf32> to vector<4x8x1xf32>
    %285 = tpu.reciprocal %284 : vector<4x8x1xf32> -> vector<4x8x1xf32>
    %286 = vector.broadcast %285 : vector<4x8x1xf32> to vector<4x8x8xf32>
    %287 = arith.mulf %282, %286 : vector<4x8x8xf32>
    %288 = vector.broadcast %62 : vector<1x1x32xf32> to vector<4x8x32xf32>
    %289 = arith.mulf %269, %288 : vector<4x8x32xf32>
    "tpu.trace_start"() <{level = 10 : i32, message = "bqk,bkd->bqd"}> : () -> ()
    %cst_80 = arith.constant dense<0.000000e+00> : vector<4x8x32xf32>
    %290 = tpu.matmul %287, %289, %cst_80 {dimension_numbers = #tpu.dot_dimension_numbers<[2], [1], [1], [2], [0, 0, 0, 1, 1, 2], [0], [0]>} : vector<4x8x8xf32>, vector<4x8x32xf32>, vector<4x8x32xf32> -> vector<4x8x32xf32>
    "tpu.trace_stop"() : () -> ()
    %291 = arith.addf %270, %290 : vector<4x8x32xf32>
    %292 = vector.broadcast %69 : vector<1x1x32xf32> to vector<4x8x32xf32>
    %293 = arith.mulf %265, %292 : vector<4x8x32xf32>
    "tpu.trace_start"() <{level = 10 : i32, message = "bqd,bkd->bqk"}> : () -> ()
    %cst_81 = arith.constant dense<0.000000e+00> : vector<4x8x8xf32>
    %294 = tpu.matmul %293, %267, %cst_81 {dimension_numbers = #tpu.dot_dimension_numbers<[2], [2], [1], [1], [0, 0, 0, 1, 1, 1], [0], [0]>} : vector<4x8x32xf32>, vector<4x8x32xf32>, vector<4x8x8xf32> -> vector<4x8x8xf32>
    "tpu.trace_stop"() : () -> ()
    %cst_82 = arith.constant 0.353553385 : f32
    %295 = vector.broadcast %cst_82 : f32 to vector<4x8x8xf32>
    %296 = arith.mulf %294, %295 : vector<4x8x8xf32>
    %297 = vector.broadcast %29 : vector<4x1x8xf32> to vector<4x8x8xf32>
    %298 = arith.addf %296, %297 : vector<4x8x8xf32>
    %cst_83 = arith.constant dense<0xFF800000> : vector<4x8xf32>
    %299 = vector.multi_reduction <maximumf>, %298, %cst_83 [2] : vector<4x8x8xf32> to vector<4x8xf32>
    %300 = vector.shape_cast %299 : vector<4x8xf32> to vector<4x8x1xf32>
    %301 = vector.broadcast %300 : vector<4x8x1xf32> to vector<4x8x8xf32>
    %302 = arith.subf %298, %301 : vector<4x8x8xf32>
    %303 = math.exp %302 : vector<4x8x8xf32>
    %cst_84 = arith.constant dense<0.000000e+00> : vector<4x8xf32>
    %304 = vector.multi_reduction <add>, %303, %cst_84 [2] : vector<4x8x8xf32> to vector<4x8xf32>
    %305 = vector.shape_cast %304 : vector<4x8xf32> to vector<4x8x1xf32>
    %306 = tpu.reciprocal %305 : vector<4x8x1xf32> -> vector<4x8x1xf32>
    %307 = vector.broadcast %306 : vector<4x8x1xf32> to vector<4x8x8xf32>
    %308 = arith.mulf %303, %307 : vector<4x8x8xf32>
    %309 = vector.broadcast %69 : vector<1x1x32xf32> to vector<4x8x32xf32>
    %310 = arith.mulf %269, %309 : vector<4x8x32xf32>
    "tpu.trace_start"() <{level = 10 : i32, message = "bqk,bkd->bqd"}> : () -> ()
    %cst_85 = arith.constant dense<0.000000e+00> : vector<4x8x32xf32>
    %311 = tpu.matmul %308, %310, %cst_85 {dimension_numbers = #tpu.dot_dimension_numbers<[2], [1], [1], [2], [0, 0, 0, 1, 1, 2], [0], [0]>} : vector<4x8x8xf32>, vector<4x8x32xf32>, vector<4x8x32xf32> -> vector<4x8x32xf32>
    "tpu.trace_stop"() : () -> ()
    %312 = arith.addf %291, %311 : vector<4x8x32xf32>
    %313 = vector.broadcast %76 : vector<1x1x32xf32> to vector<4x8x32xf32>
    %314 = arith.mulf %265, %313 : vector<4x8x32xf32>
    "tpu.trace_start"() <{level = 10 : i32, message = "bqd,bkd->bqk"}> : () -> ()
    %cst_86 = arith.constant dense<0.000000e+00> : vector<4x8x8xf32>
    %315 = tpu.matmul %314, %267, %cst_86 {dimension_numbers = #tpu.dot_dimension_numbers<[2], [2], [1], [1], [0, 0, 0, 1, 1, 1], [0], [0]>} : vector<4x8x32xf32>, vector<4x8x32xf32>, vector<4x8x8xf32> -> vector<4x8x8xf32>
    "tpu.trace_stop"() : () -> ()
    %cst_87 = arith.constant 0.353553385 : f32
    %316 = vector.broadcast %cst_87 : f32 to vector<4x8x8xf32>
    %317 = arith.mulf %315, %316 : vector<4x8x8xf32>
    %318 = vector.broadcast %29 : vector<4x1x8xf32> to vector<4x8x8xf32>
    %319 = arith.addf %317, %318 : vector<4x8x8xf32>
    %cst_88 = arith.constant dense<0xFF800000> : vector<4x8xf32>
    %320 = vector.multi_reduction <maximumf>, %319, %cst_88 [2] : vector<4x8x8xf32> to vector<4x8xf32>
    %321 = vector.shape_cast %320 : vector<4x8xf32> to vector<4x8x1xf32>
    %322 = vector.broadcast %321 : vector<4x8x1xf32> to vector<4x8x8xf32>
    %323 = arith.subf %319, %322 : vector<4x8x8xf32>
    %324 = math.exp %323 : vector<4x8x8xf32>
    %cst_89 = arith.constant dense<0.000000e+00> : vector<4x8xf32>
    %325 = vector.multi_reduction <add>, %324, %cst_89 [2] : vector<4x8x8xf32> to vector<4x8xf32>
    %326 = vector.shape_cast %325 : vector<4x8xf32> to vector<4x8x1xf32>
    %327 = tpu.reciprocal %326 : vector<4x8x1xf32> -> vector<4x8x1xf32>
    %328 = vector.broadcast %327 : vector<4x8x1xf32> to vector<4x8x8xf32>
    %329 = arith.mulf %324, %328 : vector<4x8x8xf32>
    %330 = vector.broadcast %76 : vector<1x1x32xf32> to vector<4x8x32xf32>
    %331 = arith.mulf %269, %330 : vector<4x8x32xf32>
    "tpu.trace_start"() <{level = 10 : i32, message = "bqk,bkd->bqd"}> : () -> ()
    %cst_90 = arith.constant dense<0.000000e+00> : vector<4x8x32xf32>
    %332 = tpu.matmul %329, %331, %cst_90 {dimension_numbers = #tpu.dot_dimension_numbers<[2], [1], [1], [2], [0, 0, 0, 1, 1, 2], [0], [0]>} : vector<4x8x8xf32>, vector<4x8x32xf32>, vector<4x8x32xf32> -> vector<4x8x32xf32>
    "tpu.trace_stop"() : () -> ()
    %333 = arith.addf %312, %332 : vector<4x8x32xf32>
    %334 = vector.broadcast %83 : vector<1x1x32xf32> to vector<4x8x32xf32>
    %335 = arith.mulf %265, %334 : vector<4x8x32xf32>
    "tpu.trace_start"() <{level = 10 : i32, message = "bqd,bkd->bqk"}> : () -> ()
    %cst_91 = arith.constant dense<0.000000e+00> : vector<4x8x8xf32>
    %336 = tpu.matmul %335, %267, %cst_91 {dimension_numbers = #tpu.dot_dimension_numbers<[2], [2], [1], [1], [0, 0, 0, 1, 1, 1], [0], [0]>} : vector<4x8x32xf32>, vector<4x8x32xf32>, vector<4x8x8xf32> -> vector<4x8x8xf32>
    "tpu.trace_stop"() : () -> ()
    %cst_92 = arith.constant 0.353553385 : f32
    %337 = vector.broadcast %cst_92 : f32 to vector<4x8x8xf32>
    %338 = arith.mulf %336, %337 : vector<4x8x8xf32>
    %339 = vector.broadcast %29 : vector<4x1x8xf32> to vector<4x8x8xf32>
    %340 = arith.addf %338, %339 : vector<4x8x8xf32>
    %cst_93 = arith.constant dense<0xFF800000> : vector<4x8xf32>
    %341 = vector.multi_reduction <maximumf>, %340, %cst_93 [2] : vector<4x8x8xf32> to vector<4x8xf32>
    %342 = vector.shape_cast %341 : vector<4x8xf32> to vector<4x8x1xf32>
    %343 = vector.broadcast %342 : vector<4x8x1xf32> to vector<4x8x8xf32>
    %344 = arith.subf %340, %343 : vector<4x8x8xf32>
    %345 = math.exp %344 : vector<4x8x8xf32>
    %cst_94 = arith.constant dense<0.000000e+00> : vector<4x8xf32>
    %346 = vector.multi_reduction <add>, %345, %cst_94 [2] : vector<4x8x8xf32> to vector<4x8xf32>
    %347 = vector.shape_cast %346 : vector<4x8xf32> to vector<4x8x1xf32>
    %348 = tpu.reciprocal %347 : vector<4x8x1xf32> -> vector<4x8x1xf32>
    %349 = vector.broadcast %348 : vector<4x8x1xf32> to vector<4x8x8xf32>
    %350 = arith.mulf %345, %349 : vector<4x8x8xf32>
    %351 = vector.broadcast %83 : vector<1x1x32xf32> to vector<4x8x32xf32>
    %352 = arith.mulf %269, %351 : vector<4x8x32xf32>
    "tpu.trace_start"() <{level = 10 : i32, message = "bqk,bkd->bqd"}> : () -> ()
    %cst_95 = arith.constant dense<0.000000e+00> : vector<4x8x32xf32>
    %353 = tpu.matmul %350, %352, %cst_95 {dimension_numbers = #tpu.dot_dimension_numbers<[2], [1], [1], [2], [0, 0, 0, 1, 1, 2], [0], [0]>} : vector<4x8x8xf32>, vector<4x8x32xf32>, vector<4x8x32xf32> -> vector<4x8x32xf32>
    "tpu.trace_stop"() : () -> ()
    %354 = arith.addf %333, %353 : vector<4x8x32xf32>
    %355 = vector.shape_cast %354 : vector<4x8x32xf32> to vector<32x32xf32>
    %c96_96 = arith.constant 96 : index
    %c64_97 = arith.constant 64 : index
    %356 = vector.load %arg2[%c96_96, %c64_97] : memref<216x128xf32, #tpu.memory_space<vmem>>, vector<32x32xf32>
    %cst_98 = arith.constant dense<0.000000e+00> : vector<32x32xf32>
    %357 = tpu.matmul %355, %356, %cst_98 {dimension_numbers = #tpu.dot_dimension_numbers<[1], [0], [0], [1], [0, 0, 1, 1], [], []>} : vector<32x32xf32>, vector<32x32xf32>, vector<32x32xf32> -> vector<32x32xf32>
    %c205 = arith.constant 205 : index
    %c0_99 = arith.constant 0 : index
    %358 = vector.load %arg2[%c205, %c0_99] : memref<216x128xf32, #tpu.memory_space<vmem>>, vector<1x32xf32>
    %359 = vector.broadcast %358 : vector<1x32xf32> to vector<32x32xf32>
    %360 = arith.addf %357, %359 : vector<32x32xf32>
    %361 = arith.addf %258, %360 : vector<32x32xf32>
    %c206 = arith.constant 206 : index
    %c0_100 = arith.constant 0 : index
    %362 = vector.load %arg2[%c206, %c0_100] : memref<216x128xf32, #tpu.memory_space<vmem>>, vector<1x32xf32>
    %c207 = arith.constant 207 : index
    %c0_101 = arith.constant 0 : index
    %363 = vector.load %arg2[%c207, %c0_101] : memref<216x128xf32, #tpu.memory_space<vmem>>, vector<1x32xf32>
    %cst_102 = arith.constant dense<0.000000e+00> : vector<32xf32>
    %364 = vector.multi_reduction <add>, %361, %cst_102 [1] : vector<32x32xf32> to vector<32xf32>
    %365 = vector.shape_cast %364 : vector<32xf32> to vector<32x1xf32>
    %cst_103 = arith.constant 3.200000e+01 : f32
    %366 = vector.broadcast %cst_103 : f32 to vector<32x1xf32>
    %367 = arith.divf %365, %366 : vector<32x1xf32>
    %368 = vector.broadcast %367 : vector<32x1xf32> to vector<32x32xf32>
    %369 = arith.subf %361, %368 : vector<32x32xf32>
    %370 = arith.mulf %369, %369 : vector<32x32xf32>
    %cst_104 = arith.constant dense<0.000000e+00> : vector<32xf32>
    %371 = vector.multi_reduction <add>, %370, %cst_104 [1] : vector<32x32xf32> to vector<32xf32>
    %372 = vector.shape_cast %371 : vector<32xf32> to vector<32x1xf32>
    %cst_105 = arith.constant 3.200000e+01 : f32
    %373 = vector.broadcast %cst_105 : f32 to vector<32x1xf32>
    %374 = arith.divf %372, %373 : vector<32x1xf32>
    %375 = vector.broadcast %367 : vector<32x1xf32> to vector<32x32xf32>
    %376 = arith.subf %361, %375 : vector<32x32xf32>
    %cst_106 = arith.constant 9.99999996E-13 : f32
    %377 = vector.broadcast %cst_106 : f32 to vector<32x1xf32>
    %378 = arith.addf %374, %377 : vector<32x1xf32>
    %379 = math.rsqrt %378 : vector<32x1xf32>
    %380 = vector.broadcast %379 : vector<32x1xf32> to vector<32x32xf32>
    %381 = arith.mulf %376, %380 : vector<32x32xf32>
    %382 = vector.broadcast %362 : vector<1x32xf32> to vector<32x32xf32>
    %383 = arith.mulf %381, %382 : vector<32x32xf32>
    %384 = vector.broadcast %363 : vector<1x32xf32> to vector<32x32xf32>
    %385 = arith.addf %383, %384 : vector<32x32xf32>
    %c160 = arith.constant 160 : index
    %c0_107 = arith.constant 0 : index
    %386 = vector.load %arg2[%c160, %c0_107] : memref<216x128xf32, #tpu.memory_space<vmem>>, vector<32x64xf32>
    %cst_108 = arith.constant dense<0.000000e+00> : vector<32x64xf32>
    %387 = tpu.matmul %385, %386, %cst_108 {dimension_numbers = #tpu.dot_dimension_numbers<[1], [0], [0], [1], [0, 0, 1, 1], [], []>} : vector<32x32xf32>, vector<32x64xf32>, vector<32x64xf32> -> vector<32x64xf32>
    %c208 = arith.constant 208 : index
    %c0_109 = arith.constant 0 : index
    %388 = vector.load %arg2[%c208, %c0_109] : memref<216x128xf32, #tpu.memory_space<vmem>>, vector<1x64xf32>
    %389 = vector.broadcast %388 : vector<1x64xf32> to vector<32x64xf32>
    %390 = arith.addf %387, %389 : vector<32x64xf32>
    %391 = arith.mulf %390, %390 : vector<32x64xf32>
    %392 = arith.mulf %390, %391 : vector<32x64xf32>
    %cst_110 = arith.constant 4.471500e-02 : f32
    %393 = vector.broadcast %cst_110 : f32 to vector<32x64xf32>
    %394 = arith.mulf %393, %392 : vector<32x64xf32>
    %395 = arith.addf %390, %394 : vector<32x64xf32>
    %cst_111 = arith.constant 0.797884583 : f32
    %396 = vector.broadcast %cst_111 : f32 to vector<32x64xf32>
    %397 = arith.mulf %396, %395 : vector<32x64xf32>
    %398 = math.tanh %397 : vector<32x64xf32>
    %cst_112 = arith.constant 1.000000e+00 : f32
    %399 = vector.broadcast %cst_112 : f32 to vector<32x64xf32>
    %400 = arith.addf %399, %398 : vector<32x64xf32>
    %cst_113 = arith.constant 5.000000e-01 : f32
    %401 = vector.broadcast %cst_113 : f32 to vector<32x64xf32>
    %402 = arith.mulf %401, %400 : vector<32x64xf32>
    %403 = arith.mulf %390, %402 : vector<32x64xf32>
    %c0_114 = arith.constant 0 : index
    %c64_115 = arith.constant 64 : index
    %404 = vector.load %arg2[%c0_114, %c64_115] : memref<216x128xf32, #tpu.memory_space<vmem>>, vector<64x32xf32>
    %cst_116 = arith.constant dense<0.000000e+00> : vector<32x32xf32>
    %405 = tpu.matmul %403, %404, %cst_116 {dimension_numbers = #tpu.dot_dimension_numbers<[1], [0], [0], [1], [0, 0, 1, 1], [], []>} : vector<32x64xf32>, vector<64x32xf32>, vector<32x32xf32> -> vector<32x32xf32>
    %c209 = arith.constant 209 : index
    %c0_117 = arith.constant 0 : index
    %406 = vector.load %arg2[%c209, %c0_117] : memref<216x128xf32, #tpu.memory_space<vmem>>, vector<1x32xf32>
    %407 = vector.broadcast %406 : vector<1x32xf32> to vector<32x32xf32>
    %408 = arith.addf %405, %407 : vector<32x32xf32>
    %409 = arith.addf %385, %408 : vector<32x32xf32>
    %c210 = arith.constant 210 : index
    %c0_118 = arith.constant 0 : index
    %410 = vector.load %arg2[%c210, %c0_118] : memref<216x128xf32, #tpu.memory_space<vmem>>, vector<1x32xf32>
    %c211 = arith.constant 211 : index
    %c0_119 = arith.constant 0 : index
    %411 = vector.load %arg2[%c211, %c0_119] : memref<216x128xf32, #tpu.memory_space<vmem>>, vector<1x32xf32>
    %cst_120 = arith.constant dense<0.000000e+00> : vector<32xf32>
    %412 = vector.multi_reduction <add>, %409, %cst_120 [1] : vector<32x32xf32> to vector<32xf32>
    %413 = vector.shape_cast %412 : vector<32xf32> to vector<32x1xf32>
    %cst_121 = arith.constant 3.200000e+01 : f32
    %414 = vector.broadcast %cst_121 : f32 to vector<32x1xf32>
    %415 = arith.divf %413, %414 : vector<32x1xf32>
    %416 = vector.broadcast %415 : vector<32x1xf32> to vector<32x32xf32>
    %417 = arith.subf %409, %416 : vector<32x32xf32>
    %418 = arith.mulf %417, %417 : vector<32x32xf32>
    %cst_122 = arith.constant dense<0.000000e+00> : vector<32xf32>
    %419 = vector.multi_reduction <add>, %418, %cst_122 [1] : vector<32x32xf32> to vector<32xf32>
    %420 = vector.shape_cast %419 : vector<32xf32> to vector<32x1xf32>
    %cst_123 = arith.constant 3.200000e+01 : f32
    %421 = vector.broadcast %cst_123 : f32 to vector<32x1xf32>
    %422 = arith.divf %420, %421 : vector<32x1xf32>
    %423 = vector.broadcast %415 : vector<32x1xf32> to vector<32x32xf32>
    %424 = arith.subf %409, %423 : vector<32x32xf32>
    %cst_124 = arith.constant 9.99999996E-13 : f32
    %425 = vector.broadcast %cst_124 : f32 to vector<32x1xf32>
    %426 = arith.addf %422, %425 : vector<32x1xf32>
    %427 = math.rsqrt %426 : vector<32x1xf32>
    %428 = vector.broadcast %427 : vector<32x1xf32> to vector<32x32xf32>
    %429 = arith.mulf %424, %428 : vector<32x32xf32>
    %430 = vector.broadcast %410 : vector<1x32xf32> to vector<32x32xf32>
    %431 = arith.mulf %429, %430 : vector<32x32xf32>
    %432 = vector.broadcast %411 : vector<1x32xf32> to vector<32x32xf32>
    %433 = arith.addf %431, %432 : vector<32x32xf32>
    %434 = vector.shape_cast %433 : vector<32x32xf32> to vector<4x8x32xf32>
    %435 = vector.extract_strided_slice %434 {offsets = [0, 0, 0], sizes = [4, 1, 32], strides = [1, 1, 1]} : vector<4x8x32xf32> to vector<4x1x32xf32>
    %436 = vector.shape_cast %435 : vector<4x1x32xf32> to vector<4x32xf32>
    %c96_125 = arith.constant 96 : index
    %c96_126 = arith.constant 96 : index
    %437 = vector.load %arg2[%c96_125, %c96_126] : memref<216x128xf32, #tpu.memory_space<vmem>>, vector<32x32xf32>
    %cst_127 = arith.constant dense<0.000000e+00> : vector<4x32xf32>
    %438 = tpu.matmul %436, %437, %cst_127 {dimension_numbers = #tpu.dot_dimension_numbers<[1], [0], [0], [1], [0, 0, 1, 1], [], []>} : vector<4x32xf32>, vector<32x32xf32>, vector<4x32xf32> -> vector<4x32xf32>
    %c195 = arith.constant 195 : index
    %c0_128 = arith.constant 0 : index
    %439 = vector.load %arg2[%c195, %c0_128] : memref<216x128xf32, #tpu.memory_space<vmem>>, vector<1x32xf32>
    %440 = vector.broadcast %439 : vector<1x32xf32> to vector<4x32xf32>
    %441 = arith.addf %438, %440 : vector<4x32xf32>
    %442 = math.tanh %441 : vector<4x32xf32>
    %443 = vector.shape_cast %442 : vector<4x32xf32> to vector<2x2x32xf32>
    %444 = vector.extract_strided_slice %443 {offsets = [0, 0, 0], sizes = [2, 1, 32], strides = [1, 1, 1]} : vector<2x2x32xf32> to vector<2x1x32xf32>
    %445 = vector.shape_cast %444 : vector<2x1x32xf32> to vector<2x32xf32>
    %446 = vector.extract_strided_slice %443 {offsets = [0, 1, 0], sizes = [2, 1, 32], strides = [1, 1, 1]} : vector<2x2x32xf32> to vector<2x1x32xf32>
    %447 = vector.shape_cast %446 : vector<2x1x32xf32> to vector<2x32xf32>
    %448 = vector.shape_cast %445 : vector<2x32xf32> to vector<1x1x2x32xf32>
    %c0_129 = arith.constant 0 : index
    %c0_130 = arith.constant 0 : index
    %c0_131 = arith.constant 0 : index
    %c0_132 = arith.constant 0 : index
    %449 = vector.load %arg3[%c0_129, %c0_130, %c0_131, %c0_132] : memref<1x4x2x32xf32, #tpu.memory_space<vmem>>, vector<1x1x2x32xf32>
    tpu.vector_store %arg3[%c0_129, %c0_130, %c0_131, %c0_132], %448 {strides = array<i32>} : memref<1x4x2x32xf32, #tpu.memory_space<vmem>>, vector<1x1x2x32xf32>,
    %450 = vector.shape_cast %447 : vector<2x32xf32> to vector<1x1x2x32xf32>
    %c0_133 = arith.constant 0 : index
    %c1 = arith.constant 1 : index
    %c0_134 = arith.constant 0 : index
    %c0_135 = arith.constant 0 : index
    %451 = vector.load %arg3[%c0_133, %c1, %c0_134, %c0_135] : memref<1x4x2x32xf32, #tpu.memory_space<vmem>>, vector<1x1x2x32xf32>
    tpu.vector_store %arg3[%c0_133, %c1, %c0_134, %c0_135], %450 {strides = array<i32>} : memref<1x4x2x32xf32, #tpu.memory_space<vmem>>, vector<1x1x2x32xf32>,
    %452 = arith.subf %445, %447 : vector<2x32xf32>
    %453 = math.absf %452 : vector<2x32xf32>
    %454 = vector.shape_cast %453 : vector<2x32xf32> to vector<1x1x2x32xf32>
    %c0_136 = arith.constant 0 : index
    %c2 = arith.constant 2 : index
    %c0_137 = arith.constant 0 : index
    %c0_138 = arith.constant 0 : index
    %455 = vector.load %arg3[%c0_136, %c2, %c0_137, %c0_138] : memref<1x4x2x32xf32, #tpu.memory_space<vmem>>, vector<1x1x2x32xf32>
    tpu.vector_store %arg3[%c0_136, %c2, %c0_137, %c0_138], %454 {strides = array<i32>} : memref<1x4x2x32xf32, #tpu.memory_space<vmem>>, vector<1x1x2x32xf32>,
    %456 = arith.mulf %445, %447 : vector<2x32xf32>
    %457 = vector.shape_cast %456 : vector<2x32xf32> to vector<1x1x2x32xf32>
    %c0_139 = arith.constant 0 : index
    %c3 = arith.constant 3 : index
    %c0_140 = arith.constant 0 : index
    %c0_141 = arith.constant 0 : index
    %458 = vector.load %arg3[%c0_139, %c3, %c0_140, %c0_141] : memref<1x4x2x32xf32, #tpu.memory_space<vmem>>, vector<1x1x2x32xf32>
    tpu.vector_store %arg3[%c0_139, %c3, %c0_140, %c0_141], %457 {strides = array<i32>} : memref<1x4x2x32xf32, #tpu.memory_space<vmem>>, vector<1x1x2x32xf32>,
    return
  }
  func.func @transform_0(%arg0: i32) -> (i32, i32, i32, i32) {
    %c0_i32 = arith.constant 0 : i32
    %c0_i32_0 = arith.constant 0 : i32
    %c0_i32_1 = arith.constant 0 : i32
    %c0_i32_2 = arith.constant 0 : i32
    return %arg0, %c0_i32, %c0_i32_0, %c0_i32_1 : i32, i32, i32, i32
  }
  func.func @transform_1(%arg0: i32) -> (i32, i32) {
    %c0_i32 = arith.constant 0 : i32
    %c0_i32_0 = arith.constant 0 : i32
    %c0_i32_1 = arith.constant 0 : i32
    return %c0_i32, %c0_i32_0 : i32, i32
  }
  func.func @transform_2(%arg0: i32) -> (i32, i32, i32, i32) {
    %c0_i32 = arith.constant 0 : i32
    %c0_i32_0 = arith.constant 0 : i32
    %c0_i32_1 = arith.constant 0 : i32
    %c0_i32_2 = arith.constant 0 : i32
    return %arg0, %c0_i32, %c0_i32_0, %c0_i32_1 : i32, i32, i32, i32
  }
}

</mosaic_0001>

<bundles_post_ra>
// kernel: _bert_pair_forward.1
= control target key start
LH: loop header
LB: loop body
LE: loop exit
PB: predicated region body
PF: predicated region fallthrough
CT: control target
= control target key end

     0   :  { %7 = vsyncpa [#allocation3], 0  ;;  %s4417_s12 = smov [#allocation2]   ;;  %s4418_s14 = smov 128   ;;  %s5648_s0 = inlined_call_operand.vmem [shape: s32[2,2,2,8], index: 0, kind: input, shape index: {}]   ;;  %s5649_s1 = inlined_call_operand.hbm [shape: f32[216,128], index: 1, kind: input, shape index: {}]   ;;  %s5650_s2 = inlined_call_operand.vmem [shape: f32[1,4,2,32], index: 2, kind: output, shape index: {}]  }
   0x1   :  { %s14_s11 = sshll.u32 %s5649_s1, 4  ;;  %s16_s13 = sshll.u32 %s4417_s12, 4  ;;  %s15_s11 = int_to_ptr.hbm [resolvable:$true] %s14_s11  ;;  %s17_s13 = int_to_ptr.vmem [resolvable:$true] %s16_s13 }
   0x2   :  { %s4419_s15 = smov 8  }
   0x3   :  { %22 = dma.hbm_to_vmem [thread:$0]  %s15_s11, 3456, %s17_s13, [#allocation3], %s4418_s14, %s4418_s14, %s4419_s15  }
   0x4   :  { %4415 = dma.done.wait [#allocation3], 3456  }
   0x5   :  { %4416 = vsyncadd [#allocation3], 4294963840  ;;  %v35_v0 = vlaneseq  ;;  %v4446_v2 = vld [vmem:[%s5648_s0] sm:$0x3]  ;;  %v4451_v3 = vld [vmem:[%s5648_s0 + $0x4] sm:$0x3] }
   0x6   :  { %v37_v4 = vperm.slane %v4446_v2, 0  ;;  %v51_v5 = vperm.slane %v4451_v3, 0  ;;  %v84_v6 = vld [vmem:[#allocation2 + $0x38] sm:$0xff]  ;;  %v83_v7 = vld [vmem:[#allocation2 + $0x30] sm:$0xff]  ;;  %v4458_v8 = vld [vmem:[%s5648_s0 + $0x2] sm:$0x3] }
   0x7   :  { %v39_v1 = vshrl.u32 %v35_v0, 7  ;;  %111 = vmatpush.msra.mxu0 %v84_v6  ;;  %v82_v9 = vld [vmem:[#allocation2 + $0x28] sm:$0xff]  ;;  %v4463_v10 = vld [vmem:[%s5648_s0 + $0x6] sm:$0x3]  ;;  %v44_v12 = vperm.slane %v4458_v8, 0  ;;  %v80_v13 = vld [vmem:[#allocation2 + $0x18] sm:$0xff] }
   0x8   :  { %v81_v11 = vld [vmem:[#allocation2 + $0x20] sm:$0xff]  ;;  %v58_v14 = vperm.slane %v4463_v10, 0  ;;  %v79_v15 = vld [vmem:[#allocation2 + $0x10] sm:$0xff]  ;;  %v78_v16 = vld [vmem:[#allocation2 + $0x8] sm:$0xff]  ;;  %s4420_s0 = smov 32   ;;  %v4468_v18 = vand.u32 127, %v35_v0 }
   0x9   :  { %4066 = vset.pattern.permute.xlu0 %v39_v1  ;;  %4067 = vset.pattern.permute.xlu1 %v39_v1  ;;  %v77_v17 = vld [vmem:[#allocation2] sm:$0xff]  ;;  %vm90_vm0 = vcmask 523264   ;;  %v4421_v20 = vmov 0.0   ;;  %vm148_vm5 = vcmask 261120   ;;  %v4422_v46 = vmov 32.0   ;;  %s4423_s23 = smov 96  }
   0xa   :  { %112 = vmatpush.msra.mxu0 %v83_v7  ;;  %87 = vrot.lane.b32.xlu2 %v77_v17, %s4420_s0  ;;  %v4183_v29 = vld [vmem:[#allocation2 + $0xc0] ss:$0 sm:$0xff]  ;;  %4203 = vrcp.f32 %v4422_v46  ;;  %s4424_s24 = smov 64  }
   0xc   :  { %113 = vmatpush.msra.mxu0 %v82_v9 }
   0xe   :  { %114 = vmatpush.msra.mxu0 %v81_v11 }
  0x10   :  { %115 = vmatpush.msra.mxu0 %v80_v13  ;;  %v4204_v47 = vpop.eup %4203  ;;  %v277_v13 = vld [vmem:[#allocation2 + $0x58] sm:$0xff] }
  0x11   :  { %42 = vperm.xlu0 %4066, %v37_v4   ;;  %56 = vperm.xlu1 %4067, %v51_v5   ;;  %v162_v48 = vmul.f32 32.0, %v4204_v47  ;;  %vm166_vm6 = vweird.f32 %v4204_v47 }
  0x12   :  { %116 = vmatpush.msra.mxu0 %v79_v15  ;;  %304 = vmatpush.msra.mxu1 %v277_v13  ;;  %v275_v15 = vld [vmem:[#allocation2 + $0x48] sm:$0xff] }
  0x13   :  { %v163_v49 = vsub.f32 1.0, %v162_v48 }
  0x14   :  { %117 = vmatpush.msra.mxu0 %v78_v16  ;;  %v274_v16 = vld [vmem:[#allocation2 + $0x40] sm:$0xff] }
  0x15   :  { %v164_v50 = vmul.f32 %v4204_v47, %v163_v49 }
  0x16   :  { %118 = vmatpush.msra.mxu0 %v77_v17 }
  0x17   :  { %v165_v51 = vadd.f32 %v4204_v47, %v164_v50 }
  0x19   :  { %49 = vperm.xlu0 %4066, %v44_v12   ;;  %63 = vperm.xlu1 %4067, %v58_v14   ;;  %v4486_v52 = vsel %vm166_vm6, %v4204_v47, %v165_v51  ;;  %v276_v14 = vld [vmem:[#allocation2 + $0x50] sm:$0xff]  ;;  %vm260_vm6 = vcmp.lt.s32.totalorder %v4468_v18, 16 }
  0x1a   :  { %305 = vmatpush.msra.mxu1 %v276_v14 }
  0x1c   :  { %306 = vmatpush.msra.mxu1 %v275_v15 }
  0x1e   :  { %307 = vmatpush.msra.mxu1 %v274_v16 }
  0x64   :  { %v88_v28 = vpop.permute.xlu2 %87 }
  0x83   :  { %v43_v19 = vpop.permute.xlu0 %42  ;;  %v57_v23 = vpop.permute.xlu1 %56 }
  0x84   :  { %vm65_vm1 = vcmp.eq.s32.totalorder %v43_v19, %v4468_v18  ;;  %vm67_vm3 = vcmp.eq.s32.totalorder %v57_v23, %v4468_v18 }
  0x85   :  { %v3914_v21 = vsel %vm65_vm1, 1.0, %v4421_v20  ;;  %v3916_v25 = vsel %vm67_vm3, 1.0, %v4421_v20 }
  0x86   :  { %3918 = vmatmul.msk.f32.vlgmr.msra.gmra.mxu0 %vm90_vm0, %v3914_v21 }
  0x8b   :  { %v50_v22 = vpop.permute.xlu0 %49  ;;  %v64_v26 = vpop.permute.xlu1 %63 }
  0x8c   :  { %vm66_vm2 = vcmp.eq.s32.totalorder %v50_v22, %v4468_v18  ;;  %vm68_vm4 = vcmp.eq.s32.totalorder %v64_v26, %v4468_v18 }
  0x8d   :  { %v3915_v24 = vsel %vm66_vm2, 1.0, %v4421_v20  ;;  %v3917_v27 = vsel %vm68_vm4, 1.0, %v4421_v20  ;;  %vm259_vm4 = vcmp.ge.s32.totalorder %v4468_v18, 8 }
  0x8e   :  { %3919 = vmatmul.msk.f32.gmra.mxu0 %vm90_vm0, %v3915_v24 }
  0x96   :  { %3920 = vmatmul.msk.f32.gmra.mxu0 %vm90_vm0, %v3916_v25 }
  0x9e   :  { %3921 = vmatmul.msk.f32.gmra.mxu0 %vm90_vm0, %v3917_v27 }
 0x103   :  { %v120_v30 = vpop.f32.mrf.mxu0 }
 0x104   :  { %v121_v31 = vadd.f32 %v120_v30, %v88_v28 }
 0x106   :  { %v134_v32 = vadd.f32 %v4183_v29, %v121_v31 }
 0x108   :  { %v149_v33 = vsel %vm148_vm5, %v134_v32, 0.0 }
 0x109   :  { %150 = vadd.xlane.f32.xlu2 %v149_v33 }
 0x10b   :  { %v123_v34 = vpop.f32.mrf.mxu0 }
 0x10c   :  { %v124_v35 = vadd.f32 %v123_v34, %v88_v28 }
 0x10e   :  { %v135_v36 = vadd.f32 %v4183_v29, %v124_v35 }
 0x110   :  { %v152_v37 = vsel %vm148_vm5, %v135_v36, 0.0 }
 0x111   :  { %153 = vadd.xlane.f32.xlu0 %v152_v37 }
 0x113   :  { %v126_v38 = vpop.f32.mrf.mxu0 }
 0x114   :  { %v127_v39 = vadd.f32 %v126_v38, %v88_v28 }
 0x116   :  { %v136_v40 = vadd.f32 %v4183_v29, %v127_v39 }
 0x118   :  { %v155_v41 = vsel %vm148_vm5, %v136_v40, 0.0 }
 0x119   :  { %156 = vadd.xlane.f32.xlu1 %v155_v41 }
 0x11b   :  { %v129_v42 = vpop.f32.mrf.mxu0 }
 0x11c   :  { %v130_v43 = vadd.f32 %v129_v42, %v88_v28 }
 0x11e   :  { %v137_v44 = vadd.f32 %v4183_v29, %v130_v43 }
 0x120   :  { %v158_v45 = vsel %vm148_vm5, %v137_v44, 0.0 }
 0x121   :  { %159 = vadd.xlane.f32.xlu2 %v158_v45 }
 0x17c   :  { %v151_v53 = vpop.xlane.xlu2 %150 }
 0x17d   :  { %v168_v54 = vmul.f32 %v4486_v52, %v151_v53 }
 0x17f   :  { %v172_v55 = vsub.f32 %v134_v32, %v168_v54 }
 0x181   :  { %v176_v56 = vmul.f32 %v172_v55, %v172_v55 }
 0x183   :  { %v180_v57 = vsel %vm148_vm5, %v176_v56, 0.0 }
 0x184   :  { %181 = vadd.xlane.f32.xlu2 %v180_v57  ;;  %v154_v58 = vpop.xlane.xlu0 %153 }
 0x185   :  { %v169_v59 = vmul.f32 %v4486_v52, %v154_v58 }
 0x187   :  { %v4491_v60 = vsub.f32 %v135_v36, %v169_v59  ;;  %v4184_v36 = vld [vmem:[#allocation2 + $0xc1] ss:$0 sm:$0xff] }
 0x189   :  { %v177_v61 = vmul.f32 %v4491_v60, %v4491_v60 }
 0x18b   :  { %v183_v62 = vsel %vm148_vm5, %v177_v61, 0.0 }
 0x18c   :  { %v157_v63 = vpop.xlane.xlu1 %156  ;;  %184 = vadd.xlane.f32.xlu0 %v183_v62 }
 0x18d   :  { %v170_v0 = vmul.f32 %v4486_v52, %v157_v63 }
 0x18f   :  { %v4497_v1 = vsub.f32 %v136_v40, %v170_v0  ;;  %v4185_v40 = vld [vmem:[#allocation2 + $0xc2] ss:$0 sm:$0xff] }
 0x191   :  { %v178_v4 = vmul.f32 %v4497_v1, %v4497_v1 }
 0x193   :  { %v186_v5 = vsel %vm148_vm5, %v178_v4, 0.0 }
 0x194   :  { %v160_v6 = vpop.xlane.xlu2 %159  ;;  %187 = vadd.xlane.f32.xlu1 %v186_v5 }
 0x195   :  { %v171_v7 = vmul.f32 %v4486_v52, %v160_v6 }
 0x197   :  { %v4503_v9 = vsub.f32 %v137_v44, %v171_v7 }
 0x199   :  { %v179_v11 = vmul.f32 %v4503_v9, %v4503_v9 }
 0x19b   :  { %v189_v12 = vsel %vm148_vm5, %v179_v11, 0.0 }
 0x19c   :  { %190 = vadd.xlane.f32.xlu2 %v189_v12 }
 0x1f7   :  { %v182_v17 = vpop.xlane.xlu2 %181 }
 0x1f8   :  { %v192_v19 = vmul.f32 %v182_v17, %v4486_v52 }
 0x1fa   :  { %v196_v21 = vadd.f32 1e-12, %v192_v19 }
 0x1fc   :  { %4205 = vrsqrt.f32 %v196_v21  ;;  %vm206_vm8 = vweird.f32 %v196_v21 }
 0x1ff   :  { %v185_v22 = vpop.xlane.xlu0 %184 }
 0x200   :  { %v193_v23 = vmul.f32 %v185_v22, %v4486_v52 }
 0x202   :  { %v4206_v24 = vpop.eup %4205  ;;  %v197_v25 = vadd.f32 1e-12, %v193_v23 }
 0x203   :  { %v201_v26 = vmul.f32 %v4206_v24, %v196_v21  ;;  %vm207_vm7 = vweird.f32 %v4206_v24 }
 0x204   :  { %4207 = vrsqrt.f32 %v197_v25  ;;  %vm208_vm9 = vmor %vm206_vm8, %vm207_vm7  ;;  %vm216_vm11 = vweird.f32 %v197_v25  ;;  %vm255_vm7 = vcmp.lt.s32.totalorder %v4468_v18, 8 }
 0x205   :  { %v202_v27 = vmul.f32 %v4206_v24, %v201_v26  ;;  %vm261_vm8 = vmand %vm259_vm4, %vm260_vm6 }
 0x206   :  { %v4554_v26 = vsel %vm261_vm8, 1.0, %v4421_v20  ;;  %vm264_vm8 = vcmp.ge.s32.totalorder %v4468_v18, 16 }
 0x207   :  { %v203_v28 = vmul.f32 0.5, %v202_v27  ;;  %v188_v29 = vpop.xlane.xlu1 %187 }
 0x208   :  { %v194_v30 = vmul.f32 %v188_v29, %v4486_v52 }
 0x209   :  { %v204_v31 = vsub.f32 1.5, %v203_v28 }
 0x20a   :  { %v4208_v32 = vpop.eup %4207  ;;  %v198_v33 = vadd.f32 1e-12, %v194_v30 }
 0x20b   :  { %v205_v34 = vmul.f32 %v4206_v24, %v204_v31  ;;  %v211_v35 = vmul.f32 %v4208_v32, %v197_v25  ;;  %vm217_vm10 = vweird.f32 %v4208_v32  ;;  %v4551_v25 = vsel %vm255_vm7, 1.0, %v4421_v20 }
 0x20c   :  { %4209 = vrsqrt.f32 %v198_v33  ;;  %vm218_vm12 = vmor %vm216_vm11, %vm217_vm10  ;;  %vm226_vm14 = vweird.f32 %v198_v33 }
 0x20d   :  { %v209_v37 = vsel %vm208_vm9, %v4206_v24, %v205_v34  ;;  %v212_v38 = vmul.f32 %v4208_v32, %v211_v35  ;;  %vm449_vm9 = vcmask 64512  }
 0x20e   :  { %v240_v39 = vmul.f32 %v209_v37, %v172_v55 }
 0x20f   :  { %v213_v41 = vmul.f32 0.5, %v212_v38  ;;  %v191_v42 = vpop.xlane.xlu2 %190 }
 0x210   :  { %v195_v43 = vmul.f32 %v191_v42, %v4486_v52  ;;  %v245_v44 = vmul.f32 %v4184_v36, %v240_v39  ;;  %v31_v39 = vcvt.s32.f32 %v4446_v2  ;;  %v33_v42 = vcvt.s32.f32 %v4451_v3 }
 0x211   :  { %v214_v45 = vsub.f32 1.5, %v213_v41 }
 0x212   :  { %v4210_v46 = vpop.eup %4209  ;;  %v199_v47 = vadd.f32 1e-12, %v195_v43  ;;  %v4512_v48 = vadd.f32 %v4185_v40, %v245_v44  ;;  %v32_v43 = vcvt.s32.f32 %v4458_v8 }
 0x213   :  { %v215_v49 = vmul.f32 %v4208_v32, %v214_v45  ;;  %v221_v50 = vmul.f32 %v4210_v46, %v198_v33  ;;  %vm227_vm13 = vweird.f32 %v4210_v46  ;;  %v140_v45 = vsub.f32 1.0, %v33_v42 }
 0x214   :  { %4211 = vrsqrt.f32 %v199_v47  ;;  %3926 = vmatmul.msk.f32.vlgmr.msra.gmra.mxu1 %vm148_vm5, %v4512_v48  ;;  %vm228_vm15 = vmor %vm226_vm14, %vm227_vm13  ;;  %vm236_vm2 = vweird.f32 %v199_v47 }
 0x215   :  { %v222_v51 = vmul.f32 %v4210_v46, %v221_v50  ;;  %v219_v53 = vsel %vm218_vm12, %v4208_v32, %v215_v49 }
 0x216   :  { %v241_v54 = vmul.f32 %v219_v53, %v4491_v60  ;;  %v144_v53 = vmul.f32 -10000.0, %v140_v45 }
 0x217   :  { %v223_v55 = vmul.f32 0.5, %v222_v51 }
 0x218   :  { %v246_v56 = vmul.f32 %v4184_v36, %v241_v54  ;;  %v4613_v8 = vperm.slane %v144_v53, 1 }
 0x219   :  { %v224_v57 = vsub.f32 1.5, %v223_v55 }
 0x21a   :  { %v4212_v58 = vpop.eup %4211  ;;  %v4517_v59 = vadd.f32 %v4185_v40, %v246_v56 }
 0x21b   :  { %v225_v61 = vmul.f32 %v4210_v46, %v224_v57  ;;  %v231_v62 = vmul.f32 %v4212_v58, %v199_v47  ;;  %vm237_vm1 = vweird.f32 %v4212_v58 }
 0x21c   :  { %3927 = vmatmul.msk.f32.gmra.mxu1 %vm148_vm5, %v4517_v59  ;;  %vm238_vm3 = vmor %vm236_vm2, %vm237_vm1 }
 0x21d   :  { %v232_v63 = vmul.f32 %v4212_v58, %v231_v62  ;;  %v229_v0 = vsel %vm228_vm15, %v4210_v46, %v225_v61  ;;  %v139_v46 = vsub.f32 1.0, %v32_v43 }
 0x21e   :  { %v242_v4 = vmul.f32 %v229_v0, %v4497_v1  ;;  %v4186_v1 = vld [vmem:[#allocation2 + $0xc4] ss:$0 sm:$0xff]  ;;  %v34_v0 = vcvt.s32.f32 %v4463_v10 }
 0x21f   :  { %v233_v5 = vmul.f32 0.5, %v232_v63  ;;  %v143_v54 = vmul.f32 -10000.0, %v139_v46 }
 0x220   :  { %v247_v60 = vmul.f32 %v4184_v36, %v242_v4 }
 0x221   :  { %v234_v6 = vsub.f32 1.5, %v233_v5  ;;  %v4615_v57 = vperm.slane %v143_v54, 1 }
 0x222   :  { %v4522_v7 = vadd.f32 %v4185_v40, %v247_v60 }
 0x223   :  { %v235_v11 = vmul.f32 %v4212_v58, %v234_v6 }
 0x224   :  { %3928 = vmatmul.msk.f32.gmra.mxu1 %vm148_vm5, %v4522_v7 }
 0x225   :  { %v239_v12 = vsel %vm238_vm3, %v4212_v58, %v235_v11  ;;  %v141_v11 = vsub.f32 1.0, %v34_v0 }
 0x226   :  { %v243_v13 = vmul.f32 %v239_v12, %v4503_v9 }
 0x228   :  { %v248_v14 = vmul.f32 %v4184_v36, %v243_v13 }
 0x22a   :  { %v4527_v15 = vadd.f32 %v4185_v40, %v248_v14  ;;  %v138_v40 = vsub.f32 1.0, %v31_v39  ;;  %v145_v14 = vmul.f32 -10000.0, %v141_v11 }
 0x22c   :  { %3929 = vmatmul.msk.f32.gmra.mxu1 %vm148_vm5, %v4527_v15  ;;  %v142_v41 = vmul.f32 -10000.0, %v138_v40 }
 0x22e   :  { %v4607_v44 = vperm.slane %v142_v41, 1 }
 0x291   :  { %v309_v16 = vpop.f32.mrf.mxu1 }
 0x292   :  { %v4531_v17 = vadd.f32 %v4186_v1, %v309_v16  ;;  %v4068_v16 = vpack.i.bf16 %v4551_v25, %v4554_v26 }
 0x294   :  { %326 = vrot.lane.b32.xlu0 %v4531_v17, %s4423_s23  ;;  %v321_v29 = vmul.f32 %v4551_v25, %v4531_v17  ;;  %v554_v30 = vmul.f32 %v4554_v26, %v4531_v17 }
 0x299   :  { %v312_v19 = vpop.f32.mrf.mxu1 }
 0x29a   :  { %v4535_v21 = vadd.f32 %v4186_v1, %v312_v19  ;;  %v4629_v19 = vperm.slane %v145_v14, 1 }
 0x29c   :  { %354 = vrot.lane.b32.xlu1 %v4535_v21, %s4423_s23  ;;  %v322_v32 = vmul.f32 %v4551_v25, %v4535_v21  ;;  %v555_v37 = vmul.f32 %v4554_v26, %v4535_v21 }
 0x2a1   :  { %v315_v9 = vpop.f32.mrf.mxu1 }
 0x2a2   :  { %v4539_v22 = vadd.f32 %v4186_v1, %v315_v9 }
 0x2a4   :  { %382 = vrot.lane.b32.xlu2 %v4539_v22, %s4423_s23  ;;  %v556_v33 = vmul.f32 %v4554_v26, %v4539_v22  ;;  %v323_v34 = vmul.f32 %v4551_v25, %v4539_v22 }
 0x2a9   :  { %v318_v23 = vpop.f32.mrf.mxu1 }
 0x2aa   :  { %v4543_v24 = vadd.f32 %v4186_v1, %v318_v23 }
 0x2ac   :  { %410 = vrot.lane.b32.xlu0 %v4543_v24, %s4423_s23  ;;  %v324_v36 = vmul.f32 %v4551_v25, %v4543_v24  ;;  %v557_v38 = vmul.f32 %v4554_v26, %v4543_v24 }
 0x2fe   :  { %v4558_v28 = vpop.permute.xlu2 %382 }
 0x306   :  { %v4556_v27 = vpop.permute.xlu0 %326 }
 0x307   :  { %3930 = vmatpush.xpose.msk.msra.mxu3 %vm148_vm5, %v4556_v27  ;;  %3938 = vmatpush.xpose.msk.msra.mxu2 %vm148_vm5, %v4556_v27 }
 0x30a   :  { %3931 = vmatmul.msk.f32.vlgmr.msra.gmra.mxu3 %vm148_vm5, %v321_v29  ;;  %3939 = vmatmul.msk.f32.vlgmr.msra.gmra.mxu2 %vm148_vm5, %v554_v30 }
 0x30b   :  { %3942 = vmatpush.xpose.msk.msrb.mxu2 %vm148_vm5, %v4558_v28 }
 0x30e   :  { %v4572_v31 = vpop.permute.xlu1 %354 }
 0x30f   :  { %3932 = vmatpush.xpose.msk.msrb.mxu3 %vm148_vm5, %v4572_v31 }
 0x312   :  { %3933 = vmatmul.msk.f32.vlgmr.msrb.gmra.mxu3 %vm148_vm5, %v322_v32  ;;  %3943 = vmatmul.msk.f32.vlgmr.msrb.gmra.mxu2 %vm148_vm5, %v556_v33 }
 0x313   :  { %3934 = vmatpush.xpose.msk.msra.mxu3 %vm148_vm5, %v4558_v28 }
 0x31a   :  { %3935 = vmatmul.msk.f32.vlgmr.msra.gmra.mxu3 %vm148_vm5, %v323_v34 }
 0x31e   :  { %v4587_v35 = vpop.permute.xlu0 %410 }
 0x31f   :  { %3936 = vmatpush.xpose.msk.msrb.mxu3 %vm148_vm5, %v4587_v35 }
 0x322   :  { %3937 = vmatmul.msk.f32.vlgmr.msrb.gmra.mxu3 %vm148_vm5, %v324_v36 }
 0x323   :  { %3940 = vmatpush.xpose.msk.msra.mxu3 %vm148_vm5, %v4572_v31 }
 0x327   :  { %3944 = vmatpush.xpose.msk.msrb.mxu3 %vm148_vm5, %v4587_v35 }
 0x32a   :  { %3941 = vmatmul.msk.f32.vlgmr.msra.gmra.mxu3 %vm148_vm5, %v555_v37 }
 0x332   :  { %3945 = vmatmul.msk.f32.vlgmr.msrb.gmra.mxu3 %vm148_vm5, %v557_v38 }
 0x38d   :  { %v350_v47 = vpop.f32.mrf.mxu3  ;;  %v578_v49 = vpop.f32.mrf.mxu2 }
 0x38e   :  { %v437_v50 = vmul.f32 0.35355338, %v350_v47  ;;  %v650_v51 = vmul.f32 0.35355338, %v578_v49 }
 0x390   :  { %v654_v55 = vadd.f32 %v650_v51, %v4607_v44  ;;  %v445_v2 = vadd.f32 %v4607_v44, %v437_v50 }
 0x392   :  { %v658_v56 = vsel %vm449_vm9, %v654_v55, -inf  ;;  %v450_v3 = vsel %vm449_vm9, %v445_v2, -inf }
 0x393   :  { %659 = vmax.xlane.f32.xlu2 %v658_v56  ;;  %451 = vmax.xlane.f32.xlu0 %v450_v3 }
 0x395   :  { %v378_v58 = vpop.f32.mrf.mxu3  ;;  %v624_v61 = vpop.f32.mrf.mxu2 }
 0x396   :  { %v438_v62 = vmul.f32 0.35355338, %v378_v58  ;;  %v652_v63 = vmul.f32 0.35355338, %v624_v61 }
 0x398   :  { %v446_v4 = vadd.f32 %v4615_v57, %v438_v62  ;;  %v4620_v5 = vadd.f32 %v652_v63, %v4613_v8 }
 0x39a   :  { %v453_v60 = vsel %vm449_vm9, %v446_v4, -inf  ;;  %v664_v6 = vsel %vm449_vm9, %v4620_v5, -inf }
 0x39b   :  { %454 = vmax.xlane.f32.xlu1 %v453_v60  ;;  %665 = vmax.xlane.f32.xlu2 %v664_v6 }
 0x39d   :  { %v406_v12 = vpop.f32.mrf.mxu3 }
 0x39e   :  { %v439_v13 = vmul.f32 0.35355338, %v406_v12 }
 0x3a0   :  { %v447_v1 = vadd.f32 %v4613_v8, %v439_v13 }
 0x3a2   :  { %v456_v10 = vsel %vm449_vm9, %v447_v1, -inf }
 0x3a3   :  { %457 = vmax.xlane.f32.xlu1 %v456_v10 }
 0x3a5   :  { %v434_v9 = vpop.f32.mrf.mxu3 }
 0x3a6   :  { %v440_v23 = vmul.f32 0.35355338, %v434_v9 }
 0x3a7   :  { %4069 = vrot.lane.b32.xlu0 %v4068_v16, %s4424_s24 }
 0x3a8   :  { %v448_v29 = vadd.f32 %v4629_v19, %v440_v23 }
 0x3aa   :  { %v459_v30 = vsel %vm449_vm9, %v448_v29, -inf }
 0x3ab   :  { %460 = vmax.xlane.f32.xlu2 %v459_v30 }
 0x3ad   :  { %v601_v32 = vpop.f32.mrf.mxu3 }
 0x3ae   :  { %v651_v33 = vmul.f32 0.35355338, %v601_v32 }
 0x3b0   :  { %v655_v34 = vadd.f32 %v651_v33, %v4615_v57 }
 0x3b2   :  { %v661_v36 = vsel %vm449_vm9, %v655_v34, -inf }
 0x3b3   :  { %662 = vmax.xlane.f32.xlu1 %v661_v36 }
 0x3b5   :  { %v647_v37 = vpop.f32.mrf.mxu3 }
 0x3b6   :  { %v653_v38 = vmul.f32 0.35355338, %v647_v37 }
 0x3b8   :  { %v4637_v39 = vadd.f32 %v653_v38, %v4629_v19 }
 0x3ba   :  { %v667_v40 = vsel %vm449_vm9, %v4637_v39, -inf }
 0x3bb   :  { %668 = vmax.xlane.f32.xlu1 %v667_v40 }
 0x406   :  { %v660_v41 = vpop.xlane.xlu2 %659  ;;  %v452_v42 = vpop.xlane.xlu0 %451 }
 0x407   :  { %v670_v43 = vsub.f32 %v654_v55, %v660_v41  ;;  %v462_v45 = vsub.f32 %v445_v2, %v452_v42 }
 0x409   :  { %v674_v46 = vmul.f32 1.442695, %v670_v43  ;;  %v466_v47 = vmul.f32 1.442695, %v462_v45 }
 0x40b   :  { %4213 = vpow2.f32 %v674_v46 }
 0x40c   :  { %4215 = vpow2.f32 %v466_v47 }
 0x40e   :  { %v455_v49 = vpop.xlane.xlu1 %454  ;;  %v666_v56 = vpop.xlane.xlu2 %665 }
 0x40f   :  { %v463_v63 = vsub.f32 %v446_v4, %v455_v49  ;;  %v672_v43 = vsub.f32 %v4620_v5, %v666_v56 }
 0x411   :  { %v4641_v50 = vpop.eup %4213  ;;  %v468_v6 = vmul.f32 1.442695, %v463_v63  ;;  %v678_v45 = vmul.f32 1.442695, %v672_v43 }
 0x412   :  { %v4643_v51 = vpop.eup %4215  ;;  %v682_v53 = vsel %vm449_vm9, %v4641_v50, 0.0 }
 0x413   :  { %683 = vadd.xlane.f32.xlu1 %v682_v53  ;;  %v474_v54 = vsel %vm449_vm9, %v4643_v51, 0.0 }
 0x414   :  { %475 = vadd.xlane.f32.xlu0 %v474_v54 }
 0x416   :  { %v458_v55 = vpop.xlane.xlu1 %457 }
 0x417   :  { %v464_v2 = vsub.f32 %v447_v1, %v458_v55 }
 0x419   :  { %v470_v3 = vmul.f32 1.442695, %v464_v2  ;;  %v4070_v10 = vpop.permute.xlu0 %4069 }
 0x41a   :  { %v4661_v9 = vunpack.i.l.bf16 %v4070_v10  ;;  %v4670_v32 = vunpack.i.h.bf16 %v4070_v10 }
 0x41b   :  { %4217 = vpow2.f32 %v470_v3 }
 0x41c   :  { %v761_v30 = vmul.f32 %v4661_v9, %v4543_v24  ;;  %v552_v33 = vmul.f32 %v4670_v32, %v4539_v22  ;;  %v759_v36 = vmul.f32 %v4661_v9, %v4535_v21  ;;  %v758_v38 = vmul.f32 %v4661_v9, %v4531_v17 }
 0x41d   :  { %v553_v40 = vmul.f32 %v4670_v32, %v4543_v24  ;;  %v760_v41 = vmul.f32 %v4661_v9, %v4539_v22  ;;  %v551_v5 = vmul.f32 %v4670_v32, %v4535_v21 }
 0x41e   :  { %v461_v58 = vpop.xlane.xlu2 %460 }
 0x41f   :  { %v465_v61 = vsub.f32 %v448_v29, %v461_v58  ;;  %v4078_v42 = vpack.i.bf16 %v760_v41, %v553_v40 }
 0x421   :  { %v4649_v62 = vpop.eup %4217  ;;  %v472_v0 = vmul.f32 1.442695, %v465_v61 }
 0x422   :  { %v480_v60 = vsel %vm449_vm9, %v4649_v62, 0.0 }
 0x423   :  { %4219 = vpow2.f32 %v472_v0  ;;  %481 = vadd.xlane.f32.xlu0 %v480_v60 }
 0x424   :  { %4221 = vpow2.f32 %v468_v6 }
 0x426   :  { %v663_v11 = vpop.xlane.xlu1 %662 }
 0x427   :  { %v671_v12 = vsub.f32 %v655_v34, %v663_v11  ;;  %v550_v34 = vmul.f32 %v4670_v32, %v4531_v17 }
 0x429   :  { %v4653_v13 = vpop.eup %4219  ;;  %v676_v14 = vmul.f32 1.442695, %v671_v12  ;;  %v4073_v37 = vpack.i.bf16 %v550_v34, %v759_v36 }
 0x42a   :  { %v483_v1 = vsel %vm449_vm9, %v4653_v13, 0.0  ;;  %v4657_v4 = vpop.eup %4221 }
 0x42b   :  { %4223 = vpow2.f32 %v676_v14  ;;  %484 = vadd.xlane.f32.xlu1 %v483_v1  ;;  %v477_v29 = vsel %vm449_vm9, %v4657_v4, 0.0 }
 0x42c   :  { %4225 = vpow2.f32 %v678_v45 }
 0x42e   :  { %v669_v46 = vpop.xlane.xlu1 %668 }
 0x42f   :  { %v673_v47 = vsub.f32 %v4637_v39, %v669_v46 }
 0x431   :  { %v4659_v16 = vpop.eup %4223  ;;  %v680_v53 = vmul.f32 1.442695, %v673_v47 }
 0x432   :  { %v685_v23 = vsel %vm449_vm9, %v4659_v16, 0.0  ;;  %v4690_v49 = vpop.eup %4225 }
 0x433   :  { %686 = vadd.xlane.f32.xlu2 %v685_v23  ;;  %478 = vadd.xlane.f32.xlu1 %v477_v29  ;;  %v688_v54 = vsel %vm449_vm9, %v4690_v49, 0.0  ;;  %4227 = vpow2.f32 %v680_v53 }
 0x437   :  { %844 = vrot.lane.b32.xlu0 %v761_v30, %s4424_s24 }
 0x439   :  { %v4694_v55 = vpop.eup %4227 }
 0x43a   :  { %v691_v2 = vsel %vm449_vm9, %v4694_v55, 0.0 }
 0x43f   :  { %925 = vrot.lane.b32.xlu0 %v552_v33, %s4424_s24 }
 0x44b   :  { %4074 = vrot.lane.b32.xlu2 %v4073_v37, %s4424_s24 }
 0x44c   :  { %763 = vrot.lane.b32.xlu1 %v758_v38, %s4424_s24 }
 0x454   :  { %4079 = vrot.lane.b32.xlu1 %v4078_v42, %s4424_s24 }
 0x474   :  { %689 = vadd.xlane.f32.xlu2 %v688_v54 }
 0x47e   :  { %692 = vadd.xlane.f32.xlu1 %v691_v2 }
 0x486   :  { %v684_v39 = vpop.xlane.xlu1 %683 }
 0x487   :  { %4229 = vrcp.f32 %v684_v39  ;;  %v476_v56 = vpop.xlane.xlu0 %475  ;;  %v705_v40 = vand.u32 2147483648, %v684_v39  ;;  %vm699_vm13 = vweird.f32 %v684_v39  ;;  %v703_v42 = vand.u32 2147483647, %v684_v39 }
 0x488   :  { %4231 = vrcp.f32 %v476_v56  ;;  %vm491_vm3 = vweird.f32 %v476_v56 }
 0x489   :  { %vm704_vm4 = vcmp.eq.f32.partialorder %v703_v42, 8.507059e+37 }
 0x48d   :  { %v4230_v3 = vpop.eup %4229 }
 0x48e   :  { %v4232_v61 = vpop.eup %4231  ;;  %v695_v63 = vmul.f32 %v4230_v3, %v684_v39  ;;  %vm700_vm11 = vweird.f32 %v4230_v3  ;;  %v706_v39 = vor.u32 1.1754944e-38, %v705_v40 }
 0x48f   :  { %v487_v0 = vmul.f32 %v4232_v61, %v476_v56  ;;  %vm4705_vm15 = vmor %vm699_vm13, %vm700_vm11  ;;  %vm492_vm1 = vweird.f32 %v4232_v61 }
 0x490   :  { %v696_v60 = vsub.f32 1.0, %v695_v63  ;;  %v495_v63 = vand.u32 2147483647, %v476_v56  ;;  %vm493_vm6 = vmor %vm491_vm3, %vm492_vm1 }
 0x491   :  { %v488_v14 = vsub.f32 1.0, %v487_v0 }
 0x492   :  { %v697_v23 = vmul.f32 %v4230_v3, %v696_v60  ;;  %vm496_vm7 = vcmp.eq.f32.partialorder %v495_v63, 8.507059e+37 }
 0x493   :  { %v489_v34 = vmul.f32 %v4232_v61, %v488_v14 }
 0x494   :  { %v698_v38 = vadd.f32 %v4230_v3, %v697_v23 }
 0x495   :  { %v490_v47 = vadd.f32 %v4232_v61, %v489_v34 }
 0x496   :  { %v4709_v53 = vpop.xlane.xlu0 %481  ;;  %v702_v2 = vsel %vm4705_vm15, %v4230_v3, %v698_v38 }
 0x497   :  { %898 = vrot.lane.b32.xlu1 %v551_v5, %s4424_s24  ;;  %v497_v5 = vand.u32 2147483648, %v476_v56  ;;  %v707_v60 = vsel %vm704_vm4, %v706_v39, %v702_v2 }
 0x499   :  { %v498_v14 = vor.u32 1.1754944e-38, %v497_v5 }
 0x49e   :  { %v4701_v6 = vpop.xlane.xlu1 %484 }
 0x4a6   :  { %v687_v58 = vpop.xlane.xlu2 %686  ;;  %v4703_v43 = vpop.xlane.xlu1 %478 }
 0x4a7   :  { %4233 = vrcp.f32 %v687_v58  ;;  %v719_v33 = vand.u32 2147483648, %v687_v58  ;;  %v717_v37 = vand.u32 2147483647, %v687_v58  ;;  %vm713_vm12 = vweird.f32 %v687_v58 }
 0x4a8   :  { %4235 = vrcp.f32 %v4709_v53 }
 0x4a9   :  { %v720_v45 = vor.u32 1.1754944e-38, %v719_v33  ;;  %vm718_vm2 = vcmp.eq.f32.partialorder %v717_v37, 8.507059e+37 }
 0x4ad   :  { %v4234_v11 = vpop.eup %4233 }
 0x4ae   :  { %v4075_v12 = vpop.permute.xlu2 %4074  ;;  %v709_v1 = vmul.f32 %v4234_v11, %v687_v58  ;;  %vm714_vm10 = vweird.f32 %v4234_v11 }
 0x4af   :  { %v4077_v10 = vunpack.i.h.bf16 %v4075_v12  ;;  %v4076_v29 = vunpack.i.l.bf16 %v4075_v12  ;;  %vm715_vm14 = vmor %vm713_vm12, %vm714_vm10  ;;  %v494_v12 = vsel %vm493_vm6, %v4232_v61, %v490_v47  ;;  %vm265_vm10 = vcmp.lt.s32.totalorder %v4468_v18, 24 }
 0x4b0   :  { %v710_v30 = vsub.f32 1.0, %v709_v1  ;;  %v750_v1 = vmul.f32 %v4641_v50, %v707_v60  ;;  %vm266_vm11 = vmand %vm264_vm8, %vm265_vm10 }
 0x4b1   :  { %811 = vmatpush.msra.mxu3 %v4076_v29  ;;  %v4724_v61 = vsel %vm266_vm11, 1.0, %v4421_v20  ;;  %vm505_vm11 = vweird.f32 %v4703_v43 }
 0x4b2   :  { %v711_v36 = vmul.f32 %v4234_v11, %v710_v30  ;;  %v978_v30 = vmul.f32 %v4724_v61, %v4531_v17 }
 0x4b3   :  { %892 = vmatpush.msrb.mxu3 %v4077_v10  ;;  %v845_v10 = vpop.permute.xlu0 %844 }
 0x4b4   :  { %v712_v41 = vadd.f32 %v4234_v11, %v711_v36 }
 0x4b6   :  { %v716_v54 = vsel %vm715_vm14, %v4234_v11, %v712_v41  ;;  %v499_v11 = vsel %vm496_vm7, %v498_v14, %v494_v12 }
 0x4b7   :  { %v721_v58 = vsel %vm718_vm2, %v720_v45, %v716_v54  ;;  %vm519_vm2 = vweird.f32 %v4709_v53 }
 0x4b8   :  { %v751_v0 = vmul.f32 %v4659_v16, %v721_v58  ;;  %v542_v16 = vmul.f32 %v4643_v51, %v499_v11  ;;  %v4236_v51 = vpop.eup %4235  ;;  %v523_v11 = vand.u32 2147483647, %v4709_v53 }
 0x4b9   :  { %v515_v34 = vmul.f32 %v4236_v51, %v4709_v53  ;;  %vm520_vm14 = vweird.f32 %v4236_v51 }
 0x4ba   :  { %3947 = vmatmul.msk.f32.vlgmr.msra.gmra.mxu3 %vm449_vm9, %v751_v0  ;;  %vm521_vm3 = vmor %vm519_vm2, %vm520_vm14  ;;  %vm524_vm4 = vcmp.eq.f32.partialorder %v523_v11, 8.507059e+37 }
 0x4bb   :  { %3954 = vmatpush.xpose.msk.msra.mxu3 %vm148_vm5, %v4556_v27  ;;  %v926_v29 = vpop.permute.xlu0 %925  ;;  %v516_v37 = vsub.f32 1.0, %v515_v34 }
 0x4bd   :  { %v517_v46 = vmul.f32 %v4236_v51, %v516_v37 }
 0x4be   :  { %v764_v3 = vpop.permute.xlu1 %763 }
 0x4bf   :  { %784 = vmatpush.msra.mxu2 %v764_v3  ;;  %v518_v0 = vadd.f32 %v4236_v51, %v517_v46  ;;  %v525_v3 = vand.u32 2147483648, %v4709_v53 }
 0x4c0   :  { %3946 = vmatmul.msk.f32.vlgmr.msra.gmra.mxu2 %vm449_vm9, %v750_v1 }
 0x4c1   :  { %865 = vmatpush.msrb.mxu2 %v845_v10 }
 0x4c2   :  { %3950 = vmatmul.msk.f32.vlgmr.msrb.gmra.mxu3 %vm449_vm9, %v542_v16 }
 0x4c6   :  { %v4080_v56 = vpop.permute.xlu1 %4079 }
 0x4c7   :  { %v4081_v23 = vunpack.i.l.bf16 %v4080_v56  ;;  %v4082_v50 = vunpack.i.h.bf16 %v4080_v56 }
 0x4c9   :  { %838 = vmatpush.msrb.mxu1 %v4082_v50  ;;  %973 = vmatpush.msra.mxu2 %v4081_v23  ;;  %v522_v23 = vsel %vm521_vm3, %v4236_v51, %v518_v0 }
 0x4ca   :  { %3955 = vmatmul.msk.f32.vlgmr.msra.gmra.mxu3 %vm148_vm5, %v978_v30  ;;  %v526_v30 = vor.u32 1.1754944e-38, %v525_v3 }
 0x4cb   :  { %946 = vmatpush.msra.mxu1 %v926_v29 }
 0x4e7   :  { %v690_v33 = vpop.xlane.xlu2 %689 }
 0x4e8   :  { %4237 = vrcp.f32 %v690_v33  ;;  %v733_v47 = vand.u32 2147483648, %v690_v33  ;;  %v731_v5 = vand.u32 2147483647, %v690_v33  ;;  %vm727_vm13 = vweird.f32 %v690_v33 }
 0x4e9   :  { %4239 = vrcp.f32 %v4703_v43 }
 0x4ea   :  { %4241 = vrcp.f32 %v4701_v6  ;;  %v734_v63 = vor.u32 1.1754944e-38, %v733_v47  ;;  %vm732_vm1 = vcmp.eq.f32.partialorder %v731_v5, 8.507059e+37  ;;  %v539_v5 = vand.u32 2147483648, %v4701_v6 }
 0x4ec   :  { %v540_v0 = vor.u32 1.1754944e-38, %v539_v5 }
 0x4ee   :  { %v4238_v36 = vpop.eup %4237 }
 0x4ef   :  { %v723_v38 = vmul.f32 %v4238_v36, %v690_v33  ;;  %v4733_v40 = vpop.eup %4239  ;;  %vm728_vm12 = vweird.f32 %v4238_v36 }
 0x4f0   :  { %v4735_v45 = vpop.eup %4241  ;;  %v501_v54 = vmul.f32 %v4733_v40, %v4703_v43  ;;  %vm729_vm15 = vmor %vm727_vm13, %vm728_vm12  ;;  %vm506_vm8 = vweird.f32 %v4733_v40 }
 0x4f1   :  { %v724_v41 = vsub.f32 1.0, %v723_v38  ;;  %v693_v42 = vpop.xlane.xlu1 %692  ;;  %v529_v58 = vmul.f32 %v4735_v45, %v4701_v6  ;;  %vm534_vm7 = vweird.f32 %v4735_v45  ;;  %v509_v38 = vand.u32 2147483647, %v4703_v43  ;;  %vm507_vm14 = vmor %vm505_vm11, %vm506_vm8 }
 0x4f2   :  { %4243 = vrcp.f32 %v693_v42  ;;  %v502_v60 = vsub.f32 1.0, %v501_v54  ;;  %v747_v33 = vand.u32 2147483648, %v693_v42  ;;  %vm741_vm10 = vweird.f32 %v693_v42 }
 0x4f3   :  { %v725_v2 = vmul.f32 %v4238_v36, %v724_v41  ;;  %v530_v10 = vsub.f32 1.0, %v529_v58  ;;  %v511_v41 = vand.u32 2147483648, %v4703_v43  ;;  %vm510_vm2 = vcmp.eq.f32.partialorder %v509_v38, 8.507059e+37 }
 0x4f4   :  { %v503_v50 = vmul.f32 %v4733_v40, %v502_v60  ;;  %v748_v46 = vor.u32 1.1754944e-38, %v747_v33  ;;  %vm270_vm11 = vcmp.lt.s32.totalorder %v4468_v18, 32 }
 0x4f5   :  { %v726_v39 = vadd.f32 %v4238_v36, %v725_v2  ;;  %v531_v53 = vmul.f32 %v4735_v45, %v530_v10 }
 0x4f6   :  { %v504_v51 = vadd.f32 %v4733_v40, %v503_v50 }
 0x4f7   :  { %v730_v12 = vsel %vm729_vm15, %v4238_v36, %v726_v39  ;;  %v745_v36 = vand.u32 2147483647, %v693_v42  ;;  %v532_v47 = vadd.f32 %v4735_v45, %v531_v53  ;;  %vm533_vm15 = vweird.f32 %v4701_v6 }
 0x4f8   :  { %v4244_v14 = vpop.eup %4243  ;;  %v735_v1 = vsel %vm732_vm1, %v734_v63, %v730_v12  ;;  %v508_v39 = vsel %vm507_vm14, %v4733_v40, %v504_v51  ;;  %vm535_vm1 = vmor %vm533_vm15, %vm534_vm7  ;;  %v512_v63 = vor.u32 1.1754944e-38, %v511_v41  ;;  %v980_v40 = vmul.f32 %v4724_v61, %v4539_v22 }
 0x4f9   :  { %v737_v16 = vmul.f32 %v4244_v14, %v693_v42  ;;  %v752_v56 = vmul.f32 %v4690_v49, %v735_v1  ;;  %vm742_vm6 = vweird.f32 %v4244_v14  ;;  %v527_v49 = vsel %vm524_vm4, %v526_v30, %v522_v23 }
 0x4fa   :  { %vm743_vm12 = vmor %vm741_vm10, %vm742_vm6  ;;  %vm746_vm13 = vcmp.eq.f32.partialorder %v745_v36, 8.507059e+37  ;;  %v544_v2 = vmul.f32 %v4649_v62, %v527_v49  ;;  %v537_v42 = vand.u32 2147483647, %v4701_v6  ;;  %v536_v62 = vsel %vm535_vm1, %v4735_v45, %v532_v47 }
 0x4fb   :  { %v738_v29 = vsub.f32 1.0, %v737_v16  ;;  %3948 = vmatmul.msk.f32.vlgmr.msrb.gmra.mxu1 %vm449_vm9, %v752_v56  ;;  %v513_v6 = vsel %vm510_vm2, %v512_v63, %v508_v39  ;;  %vm269_vm10 = vcmp.ge.s32.totalorder %v4468_v18, 24 }
 0x4fc   :  { %3958 = vmatpush.xpose.msk.msrb.mxu1 %vm148_vm5, %v4558_v28  ;;  %vm538_vm3 = vcmp.eq.f32.partialorder %v537_v42, 8.507059e+37 }
 0x4fd   :  { %v739_v34 = vmul.f32 %v4244_v14, %v738_v29  ;;  %v541_v60 = vsel %vm538_vm3, %v540_v0, %v536_v62 }
 0x4fe   :  { %v545_v45 = vmul.f32 %v4653_v13, %v541_v60 }
 0x4ff   :  { %v740_v37 = vadd.f32 %v4244_v14, %v739_v34 }
 0x501   :  { %v744_v54 = vsel %vm743_vm12, %v4244_v14, %v740_v37  ;;  %v979_v14 = vmul.f32 %v4724_v61, %v4535_v21  ;;  %vm271_vm12 = vmand %vm269_vm10, %vm270_vm11 }
 0x502   :  { %v749_v58 = vsel %vm746_vm13, %v748_v46, %v744_v54 }
 0x503   :  { %3952 = vmatmul.msk.f32.vlgmr.msra.gmra.mxu1 %vm449_vm9, %v544_v2  ;;  %v753_v43 = vmul.f32 %v4694_v55, %v749_v58  ;;  %v543_v55 = vmul.f32 %v4657_v4, %v513_v6  ;;  %v981_v4 = vmul.f32 %v4724_v61, %v4543_v24 }
 0x505   :  { %3949 = vmatmul.msk.f32.vlgmr.msrb.gmra.mxu2 %vm449_vm9, %v753_v43 }
 0x506   :  { %3960 = vmatpush.xpose.msk.msrb.mxu2 %vm148_vm5, %v4587_v35 }
 0x509   :  { %v899_v12 = vpop.permute.xlu1 %898 }
 0x50a   :  { %919 = vmatpush.msrb.mxu0 %v899_v12 }
 0x50b   :  { %3951 = vmatmul.msk.f32.vlgmr.msrb.gmra.mxu0 %vm449_vm9, %v543_v55  ;;  %3959 = vmatmul.msk.f32.vlgmr.msrb.gmra.mxu1 %vm148_vm5, %v980_v40 }
 0x50c   :  { %3956 = vmatpush.xpose.msk.msra.mxu0 %vm148_vm5, %v4572_v31 }
 0x50d   :  { %3953 = vmatmul.msk.f32.vlgmr.msra.gmra.mxu2 %vm449_vm9, %v545_v45 }
 0x513   :  { %3957 = vmatmul.msk.f32.vlgmr.msra.gmra.mxu0 %vm148_vm5, %v979_v14 }
 0x515   :  { %3961 = vmatmul.msk.f32.vlgmr.msrb.gmra.mxu2 %vm148_vm5, %v981_v4 }
 0x53d   :  { %v4786_v11 = vpop.f32.mrf.mxu3 }
 0x543   :  { %v4792_v23 = vpop.f32.mrf.mxu2 }
 0x545   :  { %v4788_v3 = vpop.f32.mrf.mxu3 }
 0x54d   :  { %v1002_v13 = vpop.f32.mrf.mxu3 }
 0x54e   :  { %v1074_v1 = vmul.f32 0.35355338, %v1002_v13 }
 0x550   :  { %v1078_v10 = vadd.f32 %v1074_v1, %v4607_v44 }
 0x552   :  { %v1082_v16 = vsel %vm449_vm9, %v1078_v10, -inf }
 0x553   :  { %1083 = vmax.xlane.f32.xlu2 %v1082_v16 }
 0x578   :  { %v840_v56 = vpop.f32.mrf.mxu1 }
 0x580   :  { %v948_v50 = vpop.f32.mrf.mxu1 }
 0x581   :  { %v4794_v29 = vadd.f32 %v948_v50, %v840_v56 }
 0x588   :  { %v867_v30 = vpop.f32.mrf.mxu2  ;;  %v4796_v33 = vpop.f32.mrf.mxu0 }
 0x589   :  { %v1048_v53 = vpop.f32.mrf.mxu1 }
 0x58a   :  { %v1076_v34 = vmul.f32 0.35355338, %v1048_v53 }
 0x58c   :  { %v1080_v36 = vadd.f32 %v1076_v34, %v4613_v8 }
 0x58e   :  { %v1088_v49 = vsel %vm449_vm9, %v1080_v36, -inf }
 0x58f   :  { %1089 = vmax.xlane.f32.xlu2 %v1088_v49 }
 0x590   :  { %v975_v51 = vpop.f32.mrf.mxu2  ;;  %v1025_v37 = vpop.f32.mrf.mxu0 }
 0x591   :  { %v4800_v38 = vadd.f32 %v975_v51, %v867_v30  ;;  %v1075_v41 = vmul.f32 0.35355338, %v1025_v37 }
 0x593   :  { %v1079_v46 = vadd.f32 %v1075_v41, %v4615_v57 }
 0x595   :  { %v1085_v47 = vsel %vm449_vm9, %v1079_v46, -inf }
 0x596   :  { %1086 = vmax.xlane.f32.xlu1 %v1085_v47 }
 0x598   :  { %v1071_v54 = vpop.f32.mrf.mxu2 }
 0x599   :  { %v1077_v2 = vmul.f32 0.35355338, %v1071_v54 }
 0x59b   :  { %v1081_v5 = vadd.f32 %v1077_v2, %v4629_v19 }
 0x59d   :  { %v1091_v58 = vsel %vm449_vm9, %v1081_v5, -inf }
 0x59e   :  { %1092 = vmax.xlane.f32.xlu0 %v1091_v58 }
 0x5a7   :  { %1179 = vrot.lane.b32.xlu2 %v4724_v61, %s4424_s24 }
 0x5c6   :  { %v1084_v42 = vpop.xlane.xlu2 %1083 }
 0x5c7   :  { %v1094_v43 = vsub.f32 %v1078_v10, %v1084_v42 }
 0x5c9   :  { %v1098_v39 = vmul.f32 1.442695, %v1094_v43 }
 0x5cb   :  { %4245 = vpow2.f32 %v1098_v39 }
 0x5d1   :  { %v4246_v63 = vpop.eup %4245 }
 0x5d2   :  { %v1106_v62 = vsel %vm449_vm9, %v4246_v63, 0.0 }
 0x5d3   :  { %1107 = vadd.xlane.f32.xlu2 %v1106_v62 }
 0x602   :  { %v1090_v0 = vpop.xlane.xlu2 %1089 }
 0x603   :  { %v1096_v40 = vsub.f32 %v1080_v36, %v1090_v0  ;;  %v4841_v0 = vsel %vm271_vm12, 1.0, %v4421_v20 }
 0x605   :  { %v1102_v14 = vmul.f32 1.442695, %v1096_v40 }
 0x609   :  { %v1087_v6 = vpop.xlane.xlu1 %1086 }
 0x60a   :  { %v1095_v60 = vsub.f32 %v1079_v46, %v1087_v6  ;;  %v4809_v12 = vpop.permute.xlu2 %1179 }
 0x60b   :  { %v1182_v55 = vmul.f32 %v4809_v12, %v4531_v17  ;;  %v1183_v13 = vmul.f32 %v4809_v12, %v4535_v21  ;;  %v1184_v30 = vmul.f32 %v4809_v12, %v4539_v22  ;;  %v1185_v49 = vmul.f32 %v4809_v12, %v4543_v24 }
 0x60c   :  { %v1100_v45 = vmul.f32 1.442695, %v1095_v60  ;;  %v1298_v60 = vmul.f32 %v4841_v0, %v4531_v17 }
 0x60d   :  { %1187 = vrot.lane.b32.xlu1 %v1182_v55, %s4424_s24 }
 0x60e   :  { %4247 = vpow2.f32 %v1100_v45 }
 0x60f   :  { %4249 = vpow2.f32 %v1102_v14 }
 0x611   :  { %v1093_v4 = vpop.xlane.xlu0 %1092 }
 0x612   :  { %v1097_v10 = vsub.f32 %v1081_v5, %v1093_v4 }
 0x614   :  { %v4816_v1 = vpop.eup %4247  ;;  %v1104_v56 = vmul.f32 1.442695, %v1097_v10 }
 0x615   :  { %1214 = vrot.lane.b32.xlu1 %v1183_v13, %s4424_s24  ;;  %v1109_v16 = vsel %vm449_vm9, %v4816_v1, 0.0  ;;  %v4821_v50 = vpop.eup %4249 }
 0x616   :  { %1110 = vadd.xlane.f32.xlu0 %v1109_v16  ;;  %4251 = vpow2.f32 %v1104_v56  ;;  %v1112_v53 = vsel %vm449_vm9, %v4821_v50, 0.0 }
 0x61c   :  { %v4828_v34 = vpop.eup %4251 }
 0x61d   :  { %1241 = vrot.lane.b32.xlu1 %v1184_v30, %s4424_s24  ;;  %v1115_v36 = vsel %vm449_vm9, %v4828_v34, 0.0 }
 0x61e   :  { %1113 = vadd.xlane.f32.xlu0 %v1112_v53 }
 0x626   :  { %1116 = vadd.xlane.f32.xlu0 %v1115_v36 }
 0x63a   :  { %1268 = vrot.lane.b32.xlu0 %v1185_v49, %s4424_s24 }
 0x646   :  { %v1108_v51 = vpop.xlane.xlu2 %1107 }
 0x647   :  { %4253 = vrcp.f32 %v1108_v51  ;;  %v1129_v2 = vand.u32 2147483648, %v1108_v51  ;;  %vm1123_vm6 = vweird.f32 %v1108_v51  ;;  %v1127_v5 = vand.u32 2147483647, %v1108_v51 }
 0x649   :  { %v1130_v42 = vor.u32 1.1754944e-38, %v1129_v2  ;;  %vm1128_vm8 = vcmp.eq.f32.partialorder %v1127_v5, 8.507059e+37 }
 0x64d   :  { %v4254_v37 = vpop.eup %4253 }
 0x64e   :  { %v1119_v41 = vmul.f32 %v4254_v37, %v1108_v51  ;;  %vm1124_vm4 = vweird.f32 %v4254_v37 }
 0x64f   :  { %vm1125_vm7 = vmor %vm1123_vm6, %vm1124_vm4 }
 0x650   :  { %v1120_v46 = vsub.f32 1.0, %v1119_v41 }
 0x652   :  { %v1121_v47 = vmul.f32 %v4254_v37, %v1120_v46 }
 0x654   :  { %v1122_v54 = vadd.f32 %v4254_v37, %v1121_v47 }
 0x656   :  { %v1126_v58 = vsel %vm1125_vm7, %v4254_v37, %v1122_v54 }
 0x657   :  { %v1131_v43 = vsel %vm1128_vm8, %v1130_v42, %v1126_v58 }
 0x658   :  { %v1174_v62 = vmul.f32 %v4246_v63, %v1131_v43 }
 0x67f   :  { %v1188_v39 = vpop.permute.xlu1 %1187 }
 0x680   :  { %1208 = vmatpush.msrb.mxu3 %v1188_v39 }
 0x681   :  { %3962 = vmatmul.msk.f32.vlgmr.msrb.gmra.mxu3 %vm449_vm9, %v1174_v62 }
 0x682   :  { %3966 = vmatpush.xpose.msk.msra.mxu3 %vm148_vm5, %v4556_v27 }
 0x687   :  { %v1215_v6 = vpop.permute.xlu1 %1214 }
 0x688   :  { %1235 = vmatpush.msrb.mxu0 %v1215_v6 }
 0x689   :  { %3967 = vmatmul.msk.f32.vlgmr.msra.gmra.mxu3 %vm148_vm5, %v1298_v60  ;;  %v1111_v18 = vpop.xlane.xlu0 %1110 }
 0x68a   :  { %3968 = vmatpush.xpose.msk.msra.mxu0 %vm148_vm5, %v4572_v31  ;;  %4255 = vrcp.f32 %v1111_v18  ;;  %v1143_v45 = vand.u32 2147483648, %v1111_v18  ;;  %v1141_v4 = vand.u32 2147483647, %v1111_v18  ;;  %vm1137_vm14 = vweird.f32 %v1111_v18 }
 0x68c   :  { %v1144_v31 = vor.u32 1.1754944e-38, %v1143_v45  ;;  %vm1142_vm1 = vcmp.eq.f32.partialorder %v1141_v4, 8.507059e+37 }
 0x68f   :  { %v1242_v63 = vpop.permute.xlu1 %1241 }
 0x690   :  { %v4256_v55 = vpop.eup %4255  ;;  %1262 = vmatpush.msra.mxu1 %v1242_v63 }
 0x691   :  { %v1133_v40 = vmul.f32 %v4256_v55, %v1111_v18  ;;  %v1114_v20 = vpop.xlane.xlu0 %1113  ;;  %vm1138_vm13 = vweird.f32 %v4256_v55 }
 0x692   :  { %3970 = vmatpush.xpose.msk.msrb.mxu1 %vm148_vm5, %v4558_v28  ;;  %4257 = vrcp.f32 %v1114_v20  ;;  %vm1139_vm15 = vmor %vm1137_vm14, %vm1138_vm13  ;;  %v1157_v49 = vand.u32 2147483648, %v1114_v20  ;;  %v1155_v37 = vand.u32 2147483647, %v1114_v20  ;;  %vm1151_vm3 = vweird.f32 %v1114_v20 }
 0x693   :  { %v1134_v27 = vsub.f32 1.0, %v1133_v40 }
 0x694   :  { %v1158_v47 = vor.u32 1.1754944e-38, %v1157_v49  ;;  %vm1156_vm6 = vcmp.eq.f32.partialorder %v1155_v37, 8.507059e+37 }
 0x695   :  { %v1135_v14 = vmul.f32 %v4256_v55, %v1134_v27  ;;  %v895_v27 = vadd.f32 %v4788_v3, %v4792_v23 }
 0x697   :  { %v1136_v13 = vadd.f32 %v4256_v55, %v1135_v14 }
 0x698   :  { %v4258_v10 = vpop.eup %4257 }
 0x699   :  { %v1140_v16 = vsel %vm1139_vm15, %v4256_v55, %v1136_v13  ;;  %v1147_v56 = vmul.f32 %v4258_v10, %v1114_v20  ;;  %v1117_v30 = vpop.xlane.xlu0 %1116  ;;  %vm1152_vm2 = vweird.f32 %v4258_v10  ;;  %v1301_v20 = vmul.f32 %v4841_v0, %v4543_v24 }
 0x69a   :  { %v1145_v53 = vsel %vm1142_vm1, %v1144_v31, %v1140_v16  ;;  %4259 = vrcp.f32 %v1117_v30  ;;  %vm1153_vm4 = vmor %vm1151_vm3, %vm1152_vm2  ;;  %v1171_v43 = vand.u32 2147483648, %v1117_v30  ;;  %v1169_v62 = vand.u32 2147483647, %v1117_v30 }
 0x69b   :  { %v1148_v36 = vsub.f32 1.0, %v1147_v56  ;;  %v1175_v28 = vmul.f32 %v4816_v1, %v1145_v53  ;;  %v1299_v1 = vmul.f32 %v4841_v0, %v4535_v21  ;;  %vm1165_vm8 = vweird.f32 %v1117_v30 }
 0x69c   :  { %v1172_v60 = vor.u32 1.1754944e-38, %v1171_v43  ;;  %vm1170_vm11 = vcmp.eq.f32.partialorder %v1169_v62, 8.507059e+37 }
 0x69d   :  { %v1149_v51 = vmul.f32 %v4258_v10, %v1148_v36  ;;  %3963 = vmatmul.msk.f32.vlgmr.msrb.gmra.mxu0 %vm449_vm9, %v1175_v28 }
 0x69f   :  { %v1150_v41 = vadd.f32 %v4258_v10, %v1149_v51 }
 0x6a0   :  { %v4260_v46 = vpop.eup %4259 }
 0x6a1   :  { %v1154_v54 = vsel %vm1153_vm4, %v4258_v10, %v1150_v41  ;;  %v1161_v2 = vmul.f32 %v4260_v46, %v1117_v30  ;;  %vm1166_vm7 = vweird.f32 %v4260_v46 }
 0x6a2   :  { %v1159_v5 = vsel %vm1156_vm6, %v1158_v47, %v1154_v54  ;;  %vm1167_vm10 = vmor %vm1165_vm8, %vm1166_vm7 }
 0x6a3   :  { %v1162_v58 = vsub.f32 1.0, %v1161_v2  ;;  %v1176_v42 = vmul.f32 %v4821_v50, %v1159_v5  ;;  %v1300_v50 = vmul.f32 %v4841_v0, %v4539_v22 }
 0x6a5   :  { %v1163_v39 = vmul.f32 %v4260_v46, %v1162_v58  ;;  %3964 = vmatmul.msk.f32.vlgmr.msra.gmra.mxu1 %vm449_vm9, %v1176_v42  ;;  %3969 = vmatmul.msk.f32.vlgmr.msra.gmra.mxu0 %vm148_vm5, %v1299_v1 }
 0x6a7   :  { %v1164_v6 = vadd.f32 %v4260_v46, %v1163_v39 }
 0x6a9   :  { %v1168_v18 = vsel %vm1167_vm10, %v4260_v46, %v1164_v6 }
 0x6aa   :  { %v1173_v63 = vsel %vm1170_vm11, %v1172_v60, %v1168_v18 }
 0x6ab   :  { %v1177_v55 = vmul.f32 %v4828_v34, %v1173_v63  ;;  %v922_v34 = vadd.f32 %v4796_v33, %v4786_v11 }
 0x6ac   :  { %v1269_v40 = vpop.permute.xlu0 %1268 }
 0x6ad   :  { %1289 = vmatpush.msra.mxu2 %v1269_v40  ;;  %3971 = vmatmul.msk.f32.vlgmr.msrb.gmra.mxu1 %vm148_vm5, %v1300_v50 }
 0x6ae   :  { %3965 = vmatmul.msk.f32.vlgmr.msra.gmra.mxu2 %vm449_vm9, %v1177_v55 }
 0x6af   :  { %3972 = vmatpush.xpose.msk.msrb.mxu2 %vm148_vm5, %v4587_v35 }
 0x6b6   :  { %3973 = vmatmul.msk.f32.vlgmr.msrb.gmra.mxu2 %vm148_vm5, %v1301_v20 }
 0x704   :  { %v1210_v45 = vpop.f32.mrf.mxu3 }
 0x705   :  { %v4869_v14 = vadd.f32 %v1210_v45, %v895_v27 }
 0x70c   :  { %v1322_v53 = vpop.f32.mrf.mxu3 }
 0x70d   :  { %v1394_v11 = vmul.f32 0.35355338, %v1322_v53 }
 0x71a   :  { %v1237_v4 = vpop.f32.mrf.mxu0 }
 0x71b   :  { %v4873_v13 = vadd.f32 %v1237_v4, %v922_v34 }
 0x722   :  { %v1264_v10 = vpop.f32.mrf.mxu1  ;;  %v1345_v31 = vpop.f32.mrf.mxu0 }
 0x723   :  { %v4876_v35 = vadd.f32 %v1264_v10, %v4794_v29  ;;  %v1395_v16 = vmul.f32 0.35355338, %v1345_v31  ;;  %v1398_v29 = vadd.f32 %v1394_v11, %v4607_v44 }
 0x725   :  { %v1399_v56 = vadd.f32 %v1395_v16, %v4615_v57  ;;  %v1402_v51 = vsel %vm449_vm9, %v1398_v29, -inf }
 0x727   :  { %v1405_v30 = vsel %vm449_vm9, %v1399_v56, -inf }
 0x728   :  { %1406 = vmax.xlane.f32.xlu1 %v1405_v30 }
 0x72a   :  { %v1368_v3 = vpop.f32.mrf.mxu1 }
 0x72b   :  { %v1396_v23 = vmul.f32 0.35355338, %v1368_v3  ;;  %v1618_v3 = vld [vmem:[#allocation2 + $0x40] sm:$0xff] }
 0x72d   :  { %v1400_v36 = vadd.f32 %v1396_v23, %v4613_v8  ;;  %v1619_v23 = vld [vmem:[#allocation2 + $0x48] sm:$0xff] }
 0x72e   :  { %v4093_v11 = vpack.i.bf16 %v1618_v3, %v1619_v23 }
 0x72f   :  { %v1408_v33 = vsel %vm449_vm9, %v1400_v36, -inf }
 0x730   :  { %1409 = vmax.xlane.f32.xlu2 %v1408_v33  ;;  %v1620_v33 = vld [vmem:[#allocation2 + $0x50] sm:$0xff] }
 0x731   :  { %v1291_v28 = vpop.f32.mrf.mxu2 }
 0x732   :  { %v4883_v49 = vadd.f32 %v1291_v28, %v4800_v38  ;;  %v1621_v28 = vld [vmem:[#allocation2 + $0x58] sm:$0xff] }
 0x738   :  { %1403 = vmax.xlane.f32.xlu2 %v1402_v51 }
 0x739   :  { %v1391_v37 = vpop.f32.mrf.mxu2 }
 0x73a   :  { %v1397_v41 = vmul.f32 0.35355338, %v1391_v37 }
 0x73c   :  { %v1401_v46 = vadd.f32 %v1397_v41, %v4629_v19 }
 0x73e   :  { %v1411_v47 = vsel %vm449_vm9, %v1401_v46, -inf }
 0x73f   :  { %1412 = vmax.xlane.f32.xlu0 %v1411_v47 }
 0x750   :  { %1499 = vrot.lane.b32.xlu2 %v4841_v0, %s4424_s24 }
 0x79b   :  { %v1407_v54 = vpop.xlane.xlu1 %1406 }
 0x79c   :  { %v1415_v2 = vsub.f32 %v1399_v56, %v1407_v54 }
 0x79e   :  { %v1420_v5 = vmul.f32 1.442695, %v1415_v2 }
 0x7a0   :  { %4261 = vpow2.f32 %v1420_v5 }
 0x7a3   :  { %v1410_v38 = vpop.xlane.xlu2 %1409 }
 0x7a4   :  { %v1416_v58 = vsub.f32 %v1400_v36, %v1410_v38 }
 0x7a6   :  { %v4891_v42 = vpop.eup %4261  ;;  %v1422_v1 = vmul.f32 1.442695, %v1416_v58 }
 0x7a7   :  { %v1429_v43 = vsel %vm449_vm9, %v4891_v42, 0.0 }
 0x7a8   :  { %4263 = vpow2.f32 %v1422_v1  ;;  %1430 = vadd.xlane.f32.xlu1 %v1429_v43 }
 0x7ab   :  { %v1404_v39 = vpop.xlane.xlu2 %1403 }
 0x7ac   :  { %v1414_v62 = vsub.f32 %v1398_v29, %v1404_v39  ;;  %v4088_v29 = vpack.i.bf16 %v1620_v33, %v1621_v28 }
 0x7ae   :  { %v4895_v6 = vpop.eup %4263  ;;  %v1418_v60 = vmul.f32 1.442695, %v1414_v62 }
 0x7af   :  { %v1432_v18 = vsel %vm449_vm9, %v4895_v6, 0.0 }
 0x7b0   :  { %4265 = vpow2.f32 %v1418_v60  ;;  %1433 = vadd.xlane.f32.xlu1 %v1432_v18 }
 0x7b2   :  { %v1413_v63 = vpop.xlane.xlu0 %1412 }
 0x7b3   :  { %v1417_v50 = vsub.f32 %v1401_v46, %v1413_v63  ;;  %v4899_v55 = vpop.permute.xlu2 %1499 }
 0x7b4   :  { %v1502_v40 = vmul.f32 %v4899_v55, %v4531_v17  ;;  %v1504_v34 = vmul.f32 %v4899_v55, %v4539_v22  ;;  %v1505_v4 = vmul.f32 %v4899_v55, %v4543_v24  ;;  %v1503_v16 = vmul.f32 %v4899_v55, %v4535_v21 }
 0x7b5   :  { %v1424_v20 = vmul.f32 1.442695, %v1417_v50 }
 0x7b6   :  { %v4903_v27 = vpop.eup %4265  ;;  %1507 = vrot.lane.b32.xlu0 %v1502_v40, %s4424_s24  ;;  %v4083_v10 = vpack.i.bf16 %v1505_v4, %v1504_v34 }
 0x7b7   :  { %4267 = vpow2.f32 %v1424_v20  ;;  %v1426_v45 = vsel %vm449_vm9, %v4903_v27, 0.0 }
 0x7b8   :  { %1427 = vadd.xlane.f32.xlu2 %v1426_v45 }
 0x7bd   :  { %v4912_v31 = vpop.eup %4267 }
 0x7be   :  { %4084 = vrot.lane.b32.xlu0 %v4083_v10, %s4424_s24  ;;  %v1435_v17 = vsel %vm449_vm9, %v4912_v31, 0.0 }
 0x7bf   :  { %1436 = vadd.xlane.f32.xlu1 %v1435_v17 }
 0x7c6   :  { %4094 = vrot.lane.b32.xlu0 %v4093_v11, %s4420_s0 }
 0x7d0   :  { %4089 = vrot.lane.b32.xlu2 %v4088_v29, %s4420_s0 }
 0x7d8   :  { %1534 = vrot.lane.b32.xlu1 %v1503_v16, %s4424_s24 }
 0x81b   :  { %v4920_v56 = vpop.xlane.xlu1 %1430 }
 0x81c   :  { %vm1457_vm11 = vweird.f32 %v4920_v56 }
 0x823   :  { %v1434_v22 = vpop.xlane.xlu1 %1433 }
 0x824   :  { %4269 = vrcp.f32 %v1434_v22  ;;  %v1477_v51 = vand.u32 2147483648, %v1434_v22  ;;  %v1475_v41 = vand.u32 2147483647, %v1434_v22  ;;  %vm1471_vm13 = vweird.f32 %v1434_v22 }
 0x825   :  { %4271 = vrcp.f32 %v4920_v56 }
 0x826   :  { %v1478_v58 = vor.u32 1.1754944e-38, %v1477_v51  ;;  %vm1476_vm15 = vcmp.eq.f32.partialorder %v1475_v41, 8.507059e+37 }
 0x828   :  { %v1508_v30 = vpop.permute.xlu0 %1507 }
 0x829   :  { %1528 = vmatpush.msrb.mxu3 %v1508_v30 }
 0x82a   :  { %v4270_v24 = vpop.eup %4269 }
 0x82b   :  { %v1467_v53 = vmul.f32 %v4270_v24, %v1434_v22  ;;  %v1428_v36 = vpop.xlane.xlu2 %1427  ;;  %vm1472_vm12 = vweird.f32 %v4270_v24  ;;  %v4272_v47 = vpop.eup %4271 }
 0x82c   :  { %4273 = vrcp.f32 %v1428_v36  ;;  %vm1473_vm14 = vmor %vm1471_vm13, %vm1472_vm12  ;;  %v1453_v62 = vmul.f32 %v4272_v47, %v4920_v56  ;;  %v1449_v50 = vand.u32 2147483648, %v1428_v36  ;;  %v1447_v20 = vand.u32 2147483647, %v1428_v36 }
 0x82d   :  { %v1468_v21 = vsub.f32 1.0, %v1467_v53  ;;  %vm1443_vm2 = vweird.f32 %v1428_v36  ;;  %vm1458_vm7 = vweird.f32 %v4272_v47 }
 0x82e   :  { %v1454_v45 = vsub.f32 1.0, %v1453_v62  ;;  %v1450_v10 = vor.u32 1.1754944e-38, %v1449_v50  ;;  %vm1448_vm4 = vcmp.eq.f32.partialorder %v1447_v20, 8.507059e+37  ;;  %vm1459_vm13 = vmor %vm1457_vm11, %vm1458_vm7  ;;  %v4187_v50 = vld [vmem:[#allocation2 + $0xc5] ss:$0 sm:$0xff] }
 0x82f   :  { %v1469_v37 = vmul.f32 %v4270_v24, %v1468_v21  ;;  %v1461_v21 = vand.u32 2147483647, %v4920_v56 }
 0x830   :  { %v4085_v46 = vpop.permute.xlu0 %4084  ;;  %v1455_v22 = vmul.f32 %v4272_v47, %v1454_v45 }
 0x831   :  { %v1470_v54 = vadd.f32 %v4270_v24, %v1469_v37  ;;  %v4087_v2 = vunpack.i.h.bf16 %v4085_v46  ;;  %v4086_v5 = vunpack.i.l.bf16 %v4085_v46 }
 0x832   :  { %v4274_v38 = vpop.eup %4273  ;;  %v1437_v1 = vpop.xlane.xlu1 %1436  ;;  %v1456_v11 = vadd.f32 %v4272_v47, %v1455_v22 }
 0x833   :  { %v1474_v43 = vsel %vm1473_vm14, %v4270_v24, %v1470_v54  ;;  %v1439_v39 = vmul.f32 %v4274_v38, %v1428_v36  ;;  %4275 = vrcp.f32 %v1437_v1  ;;  %1582 = vmatpush.msra.mxu1 %v4086_v5  ;;  %1609 = vmatpush.msra.mxu2 %v4087_v2  ;;  %vm1444_vm1 = vweird.f32 %v4274_v38  ;;  %v4090_v5 = vpop.permute.xlu2 %4089 }
 0x834   :  { %v1479_v60 = vsel %vm1476_vm15, %v1478_v58, %v1474_v43  ;;  %vm1445_vm3 = vmor %vm1443_vm2, %vm1444_vm1  ;;  %v1491_v3 = vand.u32 2147483648, %v1437_v1  ;;  %v1489_v53 = vand.u32 2147483647, %v1437_v1  ;;  %vm1485_vm8 = vweird.f32 %v1437_v1 }
 0x835   :  { %v1440_v18 = vsub.f32 1.0, %v1439_v39  ;;  %v1496_v63 = vmul.f32 %v4895_v6, %v1479_v60  ;;  %v1463_v36 = vand.u32 2147483648, %v4920_v56  ;;  %v1460_v51 = vsel %vm1459_vm13, %v4272_v47, %v1456_v11 }
 0x836   :  { %v1492_v28 = vor.u32 1.1754944e-38, %v1491_v3  ;;  %vm1490_vm12 = vcmp.eq.f32.partialorder %v1489_v53, 8.507059e+37  ;;  %vm1462_vm14 = vcmp.eq.f32.partialorder %v1461_v21, 8.507059e+37  ;;  %v4092_v56 = vunpack.i.h.bf16 %v4090_v5 }
 0x837   :  { %v1441_v40 = vmul.f32 %v4274_v38, %v1440_v18  ;;  %3976 = vmatmul.msk.f32.vlgmr.msra.gmra.mxu1 %vm449_vm9, %v1496_v63  ;;  %v1464_v41 = vor.u32 1.1754944e-38, %v1463_v36 }
 0x838   :  { %v4095_v58 = vpop.permute.xlu0 %4094 }
 0x839   :  { %v4276_v34 = vpop.eup %4275  ;;  %v1442_v4 = vadd.f32 %v4274_v38, %v1441_v40  ;;  %v1465_v46 = vsel %vm1462_vm14, %v1464_v41, %v1460_v51  ;;  %v4097_v47 = vunpack.i.h.bf16 %v4095_v58 }
 0x83a   :  { %v1481_v17 = vmul.f32 %v4276_v34, %v1437_v1  ;;  %vm1486_vm6 = vweird.f32 %v4276_v34  ;;  %v1495_v2 = vmul.f32 %v4891_v42, %v1465_v46  ;;  %v4096_v1 = vunpack.i.l.bf16 %v4095_v58  ;;  %v1785_v58 = vld [vmem:[#allocation2 + $0x60] sm:$0xff] }
 0x83b   :  { %v1446_v16 = vsel %vm1445_vm3, %v4274_v38, %v1442_v4  ;;  %vm1487_vm10 = vmor %vm1485_vm8, %vm1486_vm6  ;;  %v4091_v38 = vunpack.i.l.bf16 %v4090_v5  ;;  %v1788_v5 = vld [vmem:[#allocation2 + $0x78] sm:$0xff] }
 0x83c   :  { %v1451_v30 = vsel %vm1448_vm4, %v1450_v10, %v1446_v16  ;;  %v1482_v24 = vsub.f32 1.0, %v1481_v17 }
 0x83d   :  { %v1494_v6 = vmul.f32 %v4903_v27, %v1451_v30  ;;  %1664 = vmatpush.msra.mxu3 %v4091_v38  ;;  %v1786_v38 = vld [vmem:[#allocation2 + $0x68] sm:$0xff] }
 0x83e   :  { %v1483_v23 = vmul.f32 %v4276_v34, %v1482_v24 }
 0x83f   :  { %3974 = vmatmul.msk.f32.vlgmr.msrb.gmra.mxu3 %vm449_vm9, %v1494_v6 }
 0x840   :  { %v1484_v33 = vadd.f32 %v4276_v34, %v1483_v23  ;;  %1665 = vmatpush.msra.mxu3 %v4092_v56  ;;  %v1787_v56 = vld [vmem:[#allocation2 + $0x70] sm:$0xff] }
 0x842   :  { %v1488_v29 = vsel %vm1487_vm10, %v4276_v34, %v1484_v33  ;;  %1666 = vmatpush.msra.mxu3 %v4096_v1 }
 0x843   :  { %v1493_v27 = vsel %vm1490_vm12, %v1492_v28, %v1488_v29 }
 0x844   :  { %v1497_v37 = vmul.f32 %v4912_v31, %v1493_v27  ;;  %1667 = vmatpush.msra.mxu3 %v4097_v47 }
 0x846   :  { %3977 = vmatmul.msk.f32.vlgmr.msra.gmra.mxu2 %vm449_vm9, %v1497_v37 }
 0x84a   :  { %v1535_v54 = vpop.permute.xlu1 %1534 }
 0x84b   :  { %1555 = vmatpush.msrb.mxu0 %v1535_v54 }
 0x84c   :  { %3975 = vmatmul.msk.f32.vlgmr.msrb.gmra.mxu0 %vm449_vm9, %v1495_v2 }
 0x84d   :  { %1815 = vmatpush.msra.mxu0 %v1788_v5 }
 0x84f   :  { %1816 = vmatpush.msra.mxu0 %v1787_v56 }
 0x851   :  { %1817 = vmatpush.msra.mxu0 %v1786_v38 }
 0x853   :  { %1818 = vmatpush.msra.mxu0 %v1785_v58 }
 0x8b4   :  { %v1584_v62 = vpop.f32.mrf.mxu1 }
 0x8b5   :  { %v1616_v60 = vadd.f32 %v1584_v62, %v4876_v35 }
 0x8c2   :  { %v1530_v31 = vpop.f32.mrf.mxu3 }
 0x8c3   :  { %v1614_v43 = vadd.f32 %v1530_v31, %v4869_v14 }
 0x8c5   :  { %3978 = vmatmul.msk.f32.vlgmr.msra.gmra.mxu3 %vm148_vm5, %v1614_v43 }
 0x8c9   :  { %v1557_v39 = vpop.f32.mrf.mxu0  ;;  %v1611_v18 = vpop.f32.mrf.mxu2 }
 0x8ca   :  { %v1615_v42 = vadd.f32 %v1557_v39, %v4873_v13  ;;  %v1617_v63 = vadd.f32 %v1611_v18, %v4883_v49  ;;  %v1874_v18 = vld [vmem:[#allocation2 + $0x30] sm:$0xff] }
 0x8cd   :  { %3979 = vmatmul.msk.f32.gmra.mxu3 %vm148_vm5, %v1615_v42 }
 0x8d5   :  { %3980 = vmatmul.msk.f32.gmra.mxu3 %vm148_vm5, %v1616_v60 }
 0x8dd   :  { %3981 = vmatmul.msk.f32.gmra.mxu3 %vm148_vm5, %v1617_v63  ;;  %v1875_v63 = vld [vmem:[#allocation2 + $0x38] sm:$0xff] }
 0x948   :  { %v1669_v40 = vpop.f32.mrf.mxu3 }
 0x949   :  { %v1670_v14 = vadd.f32 %v4187_v50, %v1669_v40  ;;  %v4098_v40 = vpack.i.bf16 %v1874_v18, %v1875_v63 }
 0x94b   :  { %v1681_v20 = vadd.f32 %v1670_v14, %v4512_v48  ;;  %v1872_v14 = vld [vmem:[#allocation2 + $0x20] sm:$0xff] }
 0x94d   :  { %v1687_v45 = vsel %vm148_vm5, %v1681_v20, 0.0 }
 0x94e   :  { %1688 = vadd.xlane.f32.xlu0 %v1687_v45 }
 0x950   :  { %v1672_v13 = vpop.f32.mrf.mxu3 }
 0x951   :  { %v1673_v34 = vadd.f32 %v4187_v50, %v1672_v13 }
 0x953   :  { %v1682_v4 = vadd.f32 %v1673_v34, %v4517_v59 }
 0x955   :  { %v1690_v35 = vsel %vm148_vm5, %v1682_v4, 0.0 }
 0x956   :  { %1691 = vadd.xlane.f32.xlu1 %v1690_v35 }
 0x958   :  { %v1675_v10 = vpop.f32.mrf.mxu3 }
 0x959   :  { %v1676_v17 = vadd.f32 %v4187_v50, %v1675_v10 }
 0x95b   :  { %v1683_v49 = vadd.f32 %v1676_v17, %v4522_v7 }
 0x95d   :  { %v1693_v16 = vsel %vm148_vm5, %v1683_v49, 0.0 }
 0x95e   :  { %1694 = vadd.xlane.f32.xlu2 %v1693_v16 }
 0x960   :  { %v1678_v22 = vpop.f32.mrf.mxu3 }
 0x961   :  { %v1679_v30 = vadd.f32 %v4187_v50, %v1678_v22 }
 0x963   :  { %v1684_v48 = vadd.f32 %v1679_v30, %v4527_v15  ;;  %v1868_v30 = vld [vmem:[#allocation2] sm:$0xff] }
 0x965   :  { %v1696_v24 = vsel %vm148_vm5, %v1684_v48, 0.0 }
 0x966   :  { %1697 = vadd.xlane.f32.xlu0 %v1696_v24 }
 0x9c1   :  { %v1689_v3 = vpop.xlane.xlu0 %1688 }
 0x9c2   :  { %v1699_v59 = vmul.f32 %v1689_v3, %v4486_v52 }
 0x9c4   :  { %v4954_v6 = vsub.f32 %v1681_v20, %v1699_v59  ;;  %v1873_v20 = vld [vmem:[#allocation2 + $0x28] sm:$0xff] }
 0x9c5   :  { %v4103_v45 = vpack.i.bf16 %v1872_v14, %v1873_v20 }
 0x9c6   :  { %v1707_v23 = vmul.f32 %v4954_v6, %v4954_v6 }
 0x9c8   :  { %v1711_v7 = vsel %vm148_vm5, %v1707_v23, 0.0  ;;  %v1870_v23 = vld [vmem:[#allocation2 + $0x10] sm:$0xff] }
 0x9c9   :  { %v1692_v53 = vpop.xlane.xlu1 %1691  ;;  %1712 = vadd.xlane.f32.xlu1 %v1711_v7  ;;  %v1871_v7 = vld [vmem:[#allocation2 + $0x18] sm:$0xff] }
 0x9ca   :  { %v1700_v11 = vmul.f32 %v1692_v53, %v4486_v52 }
 0x9cc   :  { %v4960_v33 = vsub.f32 %v1682_v4, %v1700_v11  ;;  %v4189_v11 = vld [vmem:[#allocation2 + $0xc7] ss:$0 sm:$0xff] }
 0x9ce   :  { %v1708_v15 = vmul.f32 %v4960_v33, %v4960_v33 }
 0x9d0   :  { %v1714_v36 = vsel %vm148_vm5, %v1708_v15, 0.0  ;;  %v4108_v15 = vpack.i.bf16 %v1870_v23, %v1871_v7 }
 0x9d1   :  { %v1695_v28 = vpop.xlane.xlu2 %1694  ;;  %1715 = vadd.xlane.f32.xlu0 %v1714_v36 }
 0x9d2   :  { %v1701_v21 = vmul.f32 %v1695_v28, %v4486_v52 }
 0x9d4   :  { %v4966_v29 = vsub.f32 %v1683_v49, %v1701_v21  ;;  %v4188_v49 = vld [vmem:[#allocation2 + $0xc6] ss:$0 sm:$0xff] }
 0x9d6   :  { %v1709_v27 = vmul.f32 %v4966_v29, %v4966_v29 }
 0x9d8   :  { %v1717_v51 = vsel %vm148_vm5, %v1709_v27, 0.0 }
 0x9d9   :  { %1718 = vadd.xlane.f32.xlu1 %v1717_v51  ;;  %v1698_v37 = vpop.xlane.xlu0 %1697 }
 0x9da   :  { %v1702_v41 = vmul.f32 %v1698_v37, %v4486_v52 }
 0x9dc   :  { %v4972_v46 = vsub.f32 %v1684_v48, %v1702_v41  ;;  %v1869_v48 = vld [vmem:[#allocation2 + $0x8] sm:$0xff] }
 0x9dd   :  { %v4113_v59 = vpack.i.bf16 %v1868_v30, %v1869_v48 }
 0x9de   :  { %v1710_v54 = vmul.f32 %v4972_v46, %v4972_v46 }
 0x9e0   :  { %v1720_v2 = vsel %vm148_vm5, %v1710_v54, 0.0 }
 0x9e1   :  { %1721 = vadd.xlane.f32.xlu2 %v1720_v2 }
 0x9e5   :  { %4099 = vrot.lane.b32.xlu0 %v4098_v40, %s4423_s23 }
 0x9ed   :  { %4114 = vrot.lane.b32.xlu0 %v4113_v59, %s4423_s23 }
 0x9f2   :  { %4104 = vrot.lane.b32.xlu1 %v4103_v45, %s4423_s23 }
 0x9f9   :  { %4109 = vrot.lane.b32.xlu2 %v4108_v15, %s4423_s23 }
 0xa3c   :  { %v1713_v47 = vpop.xlane.xlu1 %1712 }
 0xa3d   :  { %v1723_v1 = vmul.f32 %v1713_v47, %v4486_v52 }
 0xa3f   :  { %v1727_v31 = vadd.f32 1e-12, %v1723_v1 }
 0xa41   :  { %4277 = vrsqrt.f32 %v1727_v31  ;;  %vm1737_vm1 = vweird.f32 %v1727_v31 }
 0xa44   :  { %v1716_v43 = vpop.xlane.xlu0 %1715 }
 0xa45   :  { %v1724_v39 = vmul.f32 %v1716_v43, %v4486_v52 }
 0xa47   :  { %v4278_v42 = vpop.eup %4277  ;;  %v1728_v62 = vadd.f32 1e-12, %v1724_v39 }
 0xa48   :  { %v1732_v60 = vmul.f32 %v4278_v42, %v1727_v31  ;;  %vm1738_vm15 = vweird.f32 %v4278_v42 }
 0xa49   :  { %4279 = vrsqrt.f32 %v1728_v62  ;;  %vm1739_vm2 = vmor %vm1737_vm1, %vm1738_vm15  ;;  %vm1747_vm4 = vweird.f32 %v1728_v62 }
 0xa4a   :  { %v1733_v50 = vmul.f32 %v4278_v42, %v1732_v60 }
 0xa4c   :  { %v1734_v13 = vmul.f32 0.5, %v1733_v50  ;;  %v1719_v34 = vpop.xlane.xlu1 %1718 }
 0xa4d   :  { %v1725_v4 = vmul.f32 %v1719_v34, %v4486_v52 }
 0xa4e   :  { %v1735_v35 = vsub.f32 1.5, %v1734_v13 }
 0xa4f   :  { %v4280_v10 = vpop.eup %4279  ;;  %v1729_v17 = vadd.f32 1e-12, %v1725_v4 }
 0xa50   :  { %v1736_v16 = vmul.f32 %v4278_v42, %v1735_v35  ;;  %v1742_v22 = vmul.f32 %v4280_v10, %v1728_v62  ;;  %vm1748_vm3 = vweird.f32 %v4280_v10 }
 0xa51   :  { %4281 = vrsqrt.f32 %v1729_v17  ;;  %vm1749_vm6 = vmor %vm1747_vm4, %vm1748_vm3  ;;  %vm1757_vm8 = vweird.f32 %v1729_v17 }
 0xa52   :  { %v1740_v24 = vsel %vm1739_vm2, %v4278_v42, %v1736_v16  ;;  %v1743_v3 = vmul.f32 %v4280_v10, %v1742_v22 }
 0xa53   :  { %v1771_v53 = vmul.f32 %v1740_v24, %v4954_v6 }
 0xa54   :  { %v1744_v36 = vmul.f32 0.5, %v1743_v3  ;;  %v1722_v28 = vpop.xlane.xlu2 %1721  ;;  %v4190_v3 = vld [vmem:[#allocation2 + $0xc8] ss:$0 sm:$0xff] }
 0xa55   :  { %v1776_v21 = vmul.f32 %v4188_v49, %v1771_v53  ;;  %v1726_v27 = vmul.f32 %v1722_v28, %v4486_v52 }
 0xa56   :  { %v1745_v51 = vsub.f32 1.5, %v1744_v36 }
 0xa57   :  { %v4282_v37 = vpop.eup %4281  ;;  %v1730_v41 = vadd.f32 1e-12, %v1726_v27  ;;  %v4986_v54 = vadd.f32 %v4189_v11, %v1776_v21 }
 0xa58   :  { %v1746_v2 = vmul.f32 %v4280_v10, %v1745_v51  ;;  %v1752_v6 = vmul.f32 %v4282_v37, %v1729_v17  ;;  %vm1758_vm7 = vweird.f32 %v4282_v37 }
 0xa59   :  { %4283 = vrsqrt.f32 %v1730_v41  ;;  %3982 = vmatmul.msk.f32.vlgmr.msra.gmra.mxu0 %vm148_vm5, %v4986_v54  ;;  %vm1759_vm10 = vmor %vm1757_vm8, %vm1758_vm7  ;;  %vm1767_vm12 = vweird.f32 %v1730_v41 }
 0xa5a   :  { %v1750_v5 = vsel %vm1749_vm6, %v4280_v10, %v1746_v2  ;;  %v1753_v56 = vmul.f32 %v4282_v37, %v1752_v6 }
 0xa5b   :  { %v1772_v38 = vmul.f32 %v1750_v5, %v4960_v33 }
 0xa5c   :  { %v1754_v58 = vmul.f32 0.5, %v1753_v56  ;;  %v4110_v22 = vpop.permute.xlu2 %4109 }
 0xa5d   :  { %v1777_v47 = vmul.f32 %v4188_v49, %v1772_v38  ;;  %v4111_v30 = vunpack.i.l.bf16 %v4110_v22  ;;  %v4112_v48 = vunpack.i.h.bf16 %v4110_v22 }
 0xa5e   :  { %v1755_v1 = vsub.f32 1.5, %v1754_v58 }
 0xa5f   :  { %v4284_v31 = vpop.eup %4283  ;;  %v4991_v43 = vadd.f32 %v4189_v11, %v1777_v47 }
 0xa60   :  { %v1756_v39 = vmul.f32 %v4282_v37, %v1755_v1  ;;  %v1762_v42 = vmul.f32 %v4284_v31, %v1730_v41  ;;  %vm1768_vm11 = vweird.f32 %v4284_v31 }
 0xa61   :  { %3983 = vmatmul.msk.f32.gmra.mxu0 %vm148_vm5, %v4991_v43  ;;  %vm1769_vm13 = vmor %vm1767_vm12, %vm1768_vm11 }
 0xa62   :  { %v1760_v62 = vsel %vm1759_vm10, %v4282_v37, %v1756_v39  ;;  %v1763_v60 = vmul.f32 %v4284_v31, %v1762_v42 }
 0xa63   :  { %v1773_v18 = vmul.f32 %v1760_v62, %v4966_v29  ;;  %v4100_v29 = vpop.permute.xlu0 %4099 }
 0xa64   :  { %v1764_v63 = vmul.f32 0.5, %v1763_v60  ;;  %v4101_v4 = vunpack.i.l.bf16 %v4100_v29  ;;  %v4102_v35 = vunpack.i.h.bf16 %v4100_v29  ;;  %v4105_v10 = vpop.permute.xlu1 %4104 }
 0xa65   :  { %v1778_v33 = vmul.f32 %v4188_v49, %v1773_v18  ;;  %v4106_v17 = vunpack.i.l.bf16 %v4105_v10  ;;  %v4107_v16 = vunpack.i.h.bf16 %v4105_v10 }
 0xa66   :  { %v1765_v50 = vsub.f32 1.5, %v1764_v63  ;;  %1930 = vmatpush.msrb.mxu1 %v4101_v4 }
 0xa67   :  { %v4996_v40 = vadd.f32 %v4189_v11, %v1778_v33 }
 0xa68   :  { %v1766_v14 = vmul.f32 %v4284_v31, %v1765_v50  ;;  %1931 = vmatpush.msrb.mxu1 %v4102_v35 }
 0xa69   :  { %3984 = vmatmul.msk.f32.gmra.mxu0 %vm148_vm5, %v4996_v40 }
 0xa6a   :  { %v1770_v20 = vsel %vm1769_vm13, %v4284_v31, %v1766_v14  ;;  %1932 = vmatpush.msrb.mxu1 %v4106_v17 }
 0xa6b   :  { %v1774_v45 = vmul.f32 %v1770_v20, %v4972_v46  ;;  %v4115_v46 = vpop.permute.xlu0 %4114 }
 0xa6c   :  { %1933 = vmatpush.msrb.mxu1 %v4107_v16  ;;  %v4117_v24 = vunpack.i.h.bf16 %v4115_v46 }
 0xa6d   :  { %v1779_v13 = vmul.f32 %v4188_v49, %v1774_v45  ;;  %v4116_v49 = vunpack.i.l.bf16 %v4115_v46 }
 0xa6e   :  { %1934 = vmatpush.msrb.mxu1 %v4111_v30 }
 0xa6f   :  { %v5001_v34 = vadd.f32 %v4189_v11, %v1779_v13 }
 0xa70   :  { %1935 = vmatpush.msrb.mxu1 %v4112_v48 }
 0xa71   :  { %3985 = vmatmul.msk.f32.gmra.mxu0 %vm148_vm5, %v5001_v34 }
 0xa72   :  { %1936 = vmatpush.msrb.mxu1 %v4116_v49  ;;  %v4191_v49 = vld [vmem:[#allocation2 + $0xc9] ss:$0 sm:$0xff] }
 0xa74   :  { %1937 = vmatpush.msrb.mxu1 %v4117_v24 }
 0xad6   :  { %v1820_v59 = vpop.f32.mrf.mxu0 }
 0xad7   :  { %v1821_v23 = vadd.f32 %v4190_v3, %v1820_v59 }
 0xad9   :  { %v1832_v7 = vmul.f32 %v1821_v23, %v1821_v23 }
 0xadb   :  { %v1836_v53 = vmul.f32 %v1832_v7, %v1821_v23 }
 0xadd   :  { %v1840_v11 = vmul.f32 0.044715, %v1836_v53 }
 0xade   :  { %v1823_v15 = vpop.f32.mrf.mxu0 }
 0xadf   :  { %v1844_v36 = vadd.f32 %v1840_v11, %v1821_v23  ;;  %v1824_v28 = vadd.f32 %v4190_v3, %v1823_v15 }
 0xae1   :  { %v1848_v21 = vmul.f32 0.7978846, %v1844_v36  ;;  %v1833_v27 = vmul.f32 %v1824_v28, %v1824_v28 }
 0xae3   :  { %4285 = vtanh.f32 %v1848_v21  ;;  %v1837_v51 = vmul.f32 %v1833_v27, %v1824_v28 }
 0xae5   :  { %v1841_v37 = vmul.f32 0.044715, %v1837_v51 }
 0xae6   :  { %v1826_v41 = vpop.f32.mrf.mxu0 }
 0xae7   :  { %v1845_v2 = vadd.f32 %v1841_v37, %v1824_v28  ;;  %v1827_v6 = vadd.f32 %v4190_v3, %v1826_v41 }
 0xae9   :  { %v4286_v5 = vpop.eup %4285  ;;  %v1834_v56 = vmul.f32 %v1827_v6, %v1827_v6  ;;  %v1849_v38 = vmul.f32 0.7978846, %v1845_v2 }
 0xaea   :  { %v1856_v58 = vadd.f32 1.0, %v4286_v5 }
 0xaeb   :  { %v1838_v47 = vmul.f32 %v1834_v56, %v1827_v6  ;;  %4287 = vtanh.f32 %v1849_v38 }
 0xaec   :  { %v1860_v1 = vmul.f32 0.5, %v1856_v58 }
 0xaed   :  { %v1842_v31 = vmul.f32 0.044715, %v1838_v47 }
 0xaee   :  { %v1864_v39 = vmul.f32 %v1860_v1, %v1821_v23  ;;  %v1829_v42 = vpop.f32.mrf.mxu0 }
 0xaef   :  { %v1846_v62 = vadd.f32 %v1842_v31, %v1827_v6  ;;  %v1830_v60 = vadd.f32 %v4190_v3, %v1829_v42 }
 0xaf0   :  { %3986 = vmatmul.msk.f32.vlgmr.msrb.gmra.mxu1 %vm90_vm0, %v1864_v39 }
 0xaf1   :  { %v4288_v18 = vpop.eup %4287  ;;  %v1835_v63 = vmul.f32 %v1830_v60, %v1830_v60  ;;  %v1850_v33 = vmul.f32 0.7978846, %v1846_v62 }
 0xaf2   :  { %v1857_v50 = vadd.f32 1.0, %v4288_v18 }
 0xaf3   :  { %v1839_v14 = vmul.f32 %v1835_v63, %v1830_v60  ;;  %4289 = vtanh.f32 %v1850_v33 }
 0xaf4   :  { %v1861_v20 = vmul.f32 0.5, %v1857_v50 }
 0xaf5   :  { %v1843_v45 = vmul.f32 0.044715, %v1839_v14  ;;  %v2058_v14 = vld [vmem:[#allocation2 + $0x98] sm:$0xff] }
 0xaf6   :  { %v1865_v13 = vmul.f32 %v1861_v20, %v1824_v28  ;;  %2085 = vmatpush.msrb.mxu2 %v2058_v14  ;;  %v2057_v20 = vld [vmem:[#allocation2 + $0x90] sm:$0xff] }
 0xaf7   :  { %v1847_v29 = vadd.f32 %v1843_v45, %v1830_v60  ;;  %v2056_v45 = vld [vmem:[#allocation2 + $0x88] sm:$0xff] }
 0xaf8   :  { %3987 = vmatmul.msk.f32.gmra.mxu1 %vm90_vm0, %v1865_v13  ;;  %2086 = vmatpush.msrb.mxu2 %v2057_v20  ;;  %v2055_v13 = vld [vmem:[#allocation2 + $0x80] sm:$0xff] }
 0xaf9   :  { %v4290_v4 = vpop.eup %4289  ;;  %v1851_v35 = vmul.f32 0.7978846, %v1847_v29 }
 0xafa   :  { %v1858_v10 = vadd.f32 1.0, %v4290_v4  ;;  %2087 = vmatpush.msrb.mxu2 %v2056_v45 }
 0xafb   :  { %4291 = vtanh.f32 %v1851_v35 }
 0xafc   :  { %v1862_v17 = vmul.f32 0.5, %v1858_v10  ;;  %2088 = vmatpush.msrb.mxu2 %v2055_v13 }
 0xafe   :  { %v1866_v16 = vmul.f32 %v1862_v17, %v1827_v6 }
 0xb00   :  { %3988 = vmatmul.msk.f32.gmra.mxu1 %vm90_vm0, %v1866_v16 }
 0xb01   :  { %v4292_v22 = vpop.eup %4291 }
 0xb02   :  { %v1859_v30 = vadd.f32 1.0, %v4292_v22 }
 0xb04   :  { %v1863_v48 = vmul.f32 0.5, %v1859_v30 }
 0xb06   :  { %v1867_v46 = vmul.f32 %v1863_v48, %v1830_v60 }
 0xb08   :  { %3989 = vmatmul.msk.f32.gmra.mxu1 %vm90_vm0, %v1867_v46 }
 0xb6d   :  { %v1939_v24 = vpop.f32.mrf.mxu1 }
 0xb6e   :  { %v1940_v3 = vadd.f32 %v4191_v49, %v1939_v24 }
 0xb70   :  { %v1951_v59 = vadd.f32 %v1940_v3, %v4986_v54 }
 0xb72   :  { %v1957_v23 = vsel %vm148_vm5, %v1951_v59, 0.0 }
 0xb73   :  { %1958 = vadd.xlane.f32.xlu0 %v1957_v23 }
 0xb75   :  { %v1942_v7 = vpop.f32.mrf.mxu1 }
 0xb76   :  { %v1943_v53 = vadd.f32 %v4191_v49, %v1942_v7 }
 0xb78   :  { %v1952_v11 = vadd.f32 %v1943_v53, %v4991_v43 }
 0xb7a   :  { %v1960_v15 = vsel %vm148_vm5, %v1952_v11, 0.0 }
 0xb7b   :  { %1961 = vadd.xlane.f32.xlu2 %v1960_v15 }
 0xb7d   :  { %v1945_v36 = vpop.f32.mrf.mxu1 }
 0xb7e   :  { %v1946_v28 = vadd.f32 %v4191_v49, %v1945_v36 }
 0xb80   :  { %v1953_v21 = vadd.f32 %v1946_v28, %v4996_v40 }
 0xb82   :  { %v1963_v27 = vsel %vm148_vm5, %v1953_v21, 0.0 }
 0xb83   :  { %1964 = vadd.xlane.f32.xlu1 %v1963_v27 }
 0xb85   :  { %v1948_v51 = vpop.f32.mrf.mxu1 }
 0xb86   :  { %v1949_v37 = vadd.f32 %v4191_v49, %v1948_v51 }
 0xb88   :  { %v1954_v54 = vadd.f32 %v1949_v37, %v5001_v34 }
 0xb8a   :  { %v1966_v41 = vsel %vm148_vm5, %v1954_v54, 0.0 }
 0xb8b   :  { %1967 = vadd.xlane.f32.xlu0 %v1966_v41 }
 0xbe6   :  { %v1959_v2 = vpop.xlane.xlu0 %1958 }
 0xbe7   :  { %v1969_v43 = vmul.f32 %v1959_v2, %v4486_v52 }
 0xbe9   :  { %v1973_v6 = vsub.f32 %v1951_v59, %v1969_v43 }
 0xbeb   :  { %v1977_v5 = vmul.f32 %v1973_v6, %v1973_v6 }
 0xbed   :  { %v1981_v56 = vsel %vm148_vm5, %v1977_v5, 0.0 }
 0xbee   :  { %v1962_v38 = vpop.xlane.xlu2 %1961  ;;  %1982 = vadd.xlane.f32.xlu2 %v1981_v56 }
 0xbef   :  { %v1970_v40 = vmul.f32 %v1962_v38, %v4486_v52 }
 0xbf1   :  { %v5020_v58 = vsub.f32 %v1952_v11, %v1970_v40  ;;  %v4192_v11 = vld [vmem:[#allocation2 + $0xca] ss:$0 sm:$0xff] }
 0xbf3   :  { %v1978_v47 = vmul.f32 %v5020_v58, %v5020_v58 }
 0xbf5   :  { %v1984_v34 = vsel %vm148_vm5, %v1978_v47, 0.0 }
 0xbf6   :  { %v1965_v1 = vpop.xlane.xlu1 %1964  ;;  %1985 = vadd.xlane.f32.xlu1 %v1984_v34 }
 0xbf7   :  { %v1971_v31 = vmul.f32 %v1965_v1, %v4486_v52 }
 0xbf9   :  { %v5026_v39 = vsub.f32 %v1953_v21, %v1971_v31  ;;  %v4193_v21 = vld [vmem:[#allocation2 + $0xcb] ss:$0 sm:$0xff] }
 0xbfb   :  { %v1979_v42 = vmul.f32 %v5026_v39, %v5026_v39 }
 0xbfd   :  { %v1987_v62 = vsel %vm148_vm5, %v1979_v42, 0.0 }
 0xbfe   :  { %1988 = vadd.xlane.f32.xlu0 %v1987_v62  ;;  %v1968_v60 = vpop.xlane.xlu0 %1967 }
 0xbff   :  { %v1972_v18 = vmul.f32 %v1968_v60, %v4486_v52 }
 0xc01   :  { %v5032_v63 = vsub.f32 %v1954_v54, %v1972_v18 }
 0xc03   :  { %v1980_v33 = vmul.f32 %v5032_v63, %v5032_v63 }
 0xc05   :  { %v1990_v50 = vsel %vm148_vm5, %v1980_v33, 0.0 }
 0xc06   :  { %1991 = vadd.xlane.f32.xlu2 %v1990_v50 }
 0xc61   :  { %v1983_v29 = vpop.xlane.xlu2 %1982 }
 0xc62   :  { %v1993_v4 = vmul.f32 %v1983_v29, %v4486_v52 }
 0xc64   :  { %v1997_v35 = vadd.f32 1e-12, %v1993_v4 }
 0xc66   :  { %4293 = vrsqrt.f32 %v1997_v35  ;;  %vm2007_vm15 = vweird.f32 %v1997_v35 }
 0xc69   :  { %v1986_v10 = vpop.xlane.xlu1 %1985 }
 0xc6a   :  { %v1994_v17 = vmul.f32 %v1986_v10, %v4486_v52 }
 0xc6c   :  { %v4294_v16 = vpop.eup %4293  ;;  %v1998_v22 = vadd.f32 1e-12, %v1994_v17 }
 0xc6d   :  { %v2002_v30 = vmul.f32 %v4294_v16, %v1997_v35  ;;  %vm2008_vm14 = vweird.f32 %v4294_v16 }
 0xc6e   :  { %4295 = vrsqrt.f32 %v1998_v22  ;;  %vm2009_vm1 = vmor %vm2007_vm15, %vm2008_vm14  ;;  %vm2017_vm3 = vweird.f32 %v1998_v22 }
 0xc6f   :  { %v2003_v48 = vmul.f32 %v4294_v16, %v2002_v30 }
 0xc71   :  { %v2004_v46 = vmul.f32 0.5, %v2003_v48  ;;  %v1989_v49 = vpop.xlane.xlu0 %1988 }
 0xc72   :  { %v1995_v24 = vmul.f32 %v1989_v49, %v4486_v52 }
 0xc73   :  { %v2005_v3 = vsub.f32 1.5, %v2004_v46 }
 0xc74   :  { %v4296_v59 = vpop.eup %4295  ;;  %v1999_v23 = vadd.f32 1e-12, %v1995_v24 }
 0xc75   :  { %v2006_v7 = vmul.f32 %v4294_v16, %v2005_v3  ;;  %v2012_v53 = vmul.f32 %v4296_v59, %v1998_v22  ;;  %vm2018_vm2 = vweird.f32 %v4296_v59 }
 0xc76   :  { %4297 = vrsqrt.f32 %v1999_v23  ;;  %vm2019_vm4 = vmor %vm2017_vm3, %vm2018_vm2  ;;  %vm2027_vm7 = vweird.f32 %v1999_v23 }
 0xc77   :  { %v2010_v15 = vsel %vm2009_vm1, %v4294_v16, %v2006_v7  ;;  %v2013_v36 = vmul.f32 %v4296_v59, %v2012_v53 }
 0xc78   :  { %v2041_v28 = vmul.f32 %v2010_v15, %v1973_v6 }
 0xc79   :  { %v2014_v27 = vmul.f32 0.5, %v2013_v36  ;;  %v1992_v51 = vpop.xlane.xlu2 %1991 }
 0xc7a   :  { %v2046_v37 = vmul.f32 %v4192_v11, %v2041_v28  ;;  %v1996_v54 = vmul.f32 %v1992_v51, %v4486_v52 }
 0xc7b   :  { %v2015_v41 = vsub.f32 1.5, %v2014_v27 }
 0xc7c   :  { %v4298_v2 = vpop.eup %4297  ;;  %v2000_v43 = vadd.f32 1e-12, %v1996_v54  ;;  %v5041_v5 = vadd.f32 %v4193_v21, %v2046_v37 }
 0xc7d   :  { %v2016_v56 = vmul.f32 %v4296_v59, %v2015_v41  ;;  %v2022_v38 = vmul.f32 %v4298_v2, %v1999_v23  ;;  %vm2028_vm6 = vweird.f32 %v4298_v2 }
 0xc7e   :  { %4299 = vrsqrt.f32 %v2000_v43  ;;  %3990 = vmatmul.msk.f32.vlgmr.msrb.gmra.mxu2 %vm148_vm5, %v5041_v5  ;;  %vm2029_vm8 = vmor %vm2027_vm7, %vm2028_vm6  ;;  %vm2037_vm11 = vweird.f32 %v2000_v43 }
 0xc7f   :  { %v2020_v6 = vsel %vm2019_vm4, %v4296_v59, %v2016_v56  ;;  %v2023_v40 = vmul.f32 %v4298_v2, %v2022_v38 }
 0xc80   :  { %v2042_v47 = vmul.f32 %v2020_v6, %v5020_v58 }
 0xc81   :  { %v2024_v34 = vmul.f32 0.5, %v2023_v40 }
 0xc82   :  { %v2047_v1 = vmul.f32 %v4192_v11, %v2042_v47 }
 0xc83   :  { %v2025_v31 = vsub.f32 1.5, %v2024_v34 }
 0xc84   :  { %v4300_v42 = vpop.eup %4299  ;;  %v5046_v62 = vadd.f32 %v4193_v21, %v2047_v1 }
 0xc85   :  { %v2026_v60 = vmul.f32 %v4298_v2, %v2025_v31  ;;  %v2032_v18 = vmul.f32 %v4300_v42, %v2000_v43  ;;  %vm2038_vm10 = vweird.f32 %v4300_v42 }
 0xc86   :  { %3991 = vmatmul.msk.f32.gmra.mxu2 %vm148_vm5, %v5046_v62  ;;  %vm2039_vm12 = vmor %vm2037_vm11, %vm2038_vm10 }
 0xc87   :  { %v2030_v33 = vsel %vm2029_vm8, %v4298_v2, %v2026_v60  ;;  %v2033_v50 = vmul.f32 %v4300_v42, %v2032_v18 }
 0xc88   :  { %v2043_v14 = vmul.f32 %v2030_v33, %v5026_v39  ;;  %v4194_v39 = vld [vmem:[#allocation2 + $0xcc] ss:$0 sm:$0xff] }
 0xc89   :  { %v2034_v20 = vmul.f32 0.5, %v2033_v50 }
 0xc8a   :  { %v2048_v58 = vmul.f32 %v4192_v11, %v2043_v14 }
 0xc8b   :  { %v2035_v45 = vsub.f32 1.5, %v2034_v20 }
 0xc8c   :  { %v5051_v13 = vadd.f32 %v4193_v21, %v2048_v58 }
 0xc8d   :  { %v2036_v29 = vmul.f32 %v4300_v42, %v2035_v45 }
 0xc8e   :  { %3992 = vmatmul.msk.f32.gmra.mxu2 %vm148_vm5, %v5051_v13 }
 0xc8f   :  { %v2040_v4 = vsel %vm2039_vm12, %v4300_v42, %v2036_v29 }
 0xc90   :  { %v2044_v35 = vmul.f32 %v2040_v4, %v5032_v63 }
 0xc92   :  { %v2049_v10 = vmul.f32 %v4192_v11, %v2044_v35 }
 0xc94   :  { %v5056_v17 = vadd.f32 %v4193_v21, %v2049_v10 }
 0xc96   :  { %3993 = vmatmul.msk.f32.gmra.mxu2 %vm148_vm5, %v5056_v17 }
 0xd01   :  { %v2090_v16 = vpop.f32.mrf.mxu2 }
 0xd02   :  { %v5060_v22 = vadd.f32 %v4194_v39, %v2090_v16 }
 0xd04   :  { %2107 = vrot.lane.b32.xlu1 %v5060_v22, %s4423_s23  ;;  %v5070_v63 = vmul.f32 %v4670_v32, %v5060_v22  ;;  %v5084_v59 = vmul.f32 %v4661_v9, %v5060_v22  ;;  %v2102_v56 = vmul.f32 %v4551_v25, %v5060_v22  ;;  %v2326_v38 = vmul.f32 %v4554_v26, %v5060_v22 }
 0xd09   :  { %v2093_v30 = vpop.f32.mrf.mxu2 }
 0xd0a   :  { %v5064_v48 = vadd.f32 %v4194_v39, %v2093_v30 }
 0xd0c   :  { %2135 = vrot.lane.b32.xlu2 %v5064_v48, %s4423_s23  ;;  %v5074_v46 = vmul.f32 %v4661_v9, %v5064_v48  ;;  %v5092_v7 = vmul.f32 %v5064_v48, %v4899_v55  ;;  %v5116_v51 = vmul.f32 %v4670_v32, %v5064_v48 }
 0xd0e   :  { %v4128_v49 = vpack.i.bf16 %v5070_v63, %v5074_v46 }
 0xd11   :  { %v2096_v24 = vpop.f32.mrf.mxu2 }
 0xd12   :  { %v5078_v3 = vadd.f32 %v4194_v39, %v2096_v24 }
 0xd14   :  { %2163 = vrot.lane.b32.xlu0 %v5078_v3, %s4423_s23  ;;  %v5088_v23 = vmul.f32 %v4661_v9, %v5078_v3  ;;  %v5096_v53 = vmul.f32 %v5078_v3, %v4899_v55  ;;  %v5108_v21 = vmul.f32 %v4670_v32, %v5078_v3  ;;  %v2104_v40 = vmul.f32 %v4551_v25, %v5078_v3 }
 0xd15   :  { %v2328_v1 = vmul.f32 %v4554_v26, %v5078_v3 }
 0xd16   :  { %v4118_v11 = vpack.i.bf16 %v5084_v59, %v5088_v23  ;;  %v4138_v15 = vpack.i.bf16 %v5096_v53, %v5092_v7  ;;  %v3380_v7 = vld [vmem:[#allocation2 + $0x70] sm:$0xff] }
 0xd19   :  { %v2099_v36 = vpop.f32.mrf.mxu2 }
 0xd1a   :  { %v5102_v28 = vadd.f32 %v4194_v39, %v2099_v36 }
 0xd1c   :  { %2191 = vrot.lane.b32.xlu0 %v5102_v28, %s4423_s23  ;;  %v5112_v27 = vmul.f32 %v4661_v9, %v5102_v28  ;;  %v5120_v37 = vmul.f32 %v4670_v32, %v5102_v28  ;;  %v2103_v9 = vmul.f32 %v4551_v25, %v5064_v48  ;;  %v2327_v32 = vmul.f32 %v4554_v26, %v5064_v48 }
 0xd1d   :  { %v2105_v34 = vmul.f32 %v4551_v25, %v5102_v28  ;;  %v2329_v31 = vmul.f32 %v4554_v26, %v5102_v28 }
 0xd1e   :  { %v4123_v54 = vpack.i.bf16 %v5108_v21, %v5112_v27  ;;  %v4133_v41 = vpack.i.bf16 %v5116_v51, %v5120_v37 }
 0xd66   :  { %v5126_v2 = vpop.permute.xlu2 %2135 }
 0xd67   :  { %3996 = vmatpush.xpose.msk.msrb.mxu0 %vm148_vm5, %v5126_v2  ;;  %4004 = vmatpush.xpose.msk.msra.mxu1 %vm148_vm5, %v5126_v2 }
 0xd6a   :  { %3997 = vmatmul.msk.f32.vlgmr.msrb.gmra.mxu0 %vm148_vm5, %v2103_v9  ;;  %4005 = vmatmul.msk.f32.vlgmr.msra.gmra.mxu1 %vm148_vm5, %v2327_v32 }
 0xd76   :  { %v5138_v43 = vpop.permute.xlu1 %2107 }
 0xd77   :  { %3994 = vmatpush.xpose.msk.msrb.mxu3 %vm148_vm5, %v5138_v43  ;;  %4002 = vmatpush.xpose.msk.msra.mxu0 %vm148_vm5, %v5138_v43 }
 0xd7a   :  { %3995 = vmatmul.msk.f32.vlgmr.msrb.gmra.mxu3 %vm148_vm5, %v2102_v56  ;;  %4003 = vmatmul.msk.f32.vlgmr.msra.gmra.mxu0 %vm148_vm5, %v2326_v38 }
 0xd86   :  { %v5150_v6 = vpop.permute.xlu0 %2163 }
 0xd87   :  { %3998 = vmatpush.xpose.msk.msra.mxu2 %vm148_vm5, %v5150_v6 }
 0xd8a   :  { %3999 = vmatmul.msk.f32.vlgmr.msra.gmra.mxu2 %vm148_vm5, %v2104_v40 }
 0xd8b   :  { %4006 = vmatpush.xpose.msk.msrb.mxu2 %vm148_vm5, %v5150_v6 }
 0xd8e   :  { %v5159_v47 = vpop.permute.xlu0 %2191 }
 0xd8f   :  { %4000 = vmatpush.xpose.msk.msra.mxu3 %vm148_vm5, %v5159_v47 }
 0xd92   :  { %4001 = vmatmul.msk.f32.vlgmr.msra.gmra.mxu3 %vm148_vm5, %v2105_v34  ;;  %4007 = vmatmul.msk.f32.vlgmr.msrb.gmra.mxu2 %vm148_vm5, %v2328_v1 }
 0xd93   :  { %4008 = vmatpush.xpose.msk.msrb.mxu3 %vm148_vm5, %v5159_v47 }
 0xd9a   :  { %4009 = vmatmul.msk.f32.vlgmr.msrb.gmra.mxu3 %vm148_vm5, %v2329_v31 }
 0xde7   :  { %v2373_v42 = vpop.f32.mrf.mxu1  ;;  %v2159_v25 = vpop.f32.mrf.mxu0 }
 0xde8   :  { %v2423_v60 = vmul.f32 0.35355338, %v2373_v42  ;;  %v2219_v4 = vmul.f32 0.35355338, %v2159_v25 }
 0xdea   :  { %v2427_v18 = vadd.f32 %v2423_v60, %v4615_v57  ;;  %v2223_v10 = vadd.f32 %v2219_v4, %v4615_v57 }
 0xdec   :  { %v2433_v33 = vsel %vm449_vm9, %v2427_v18, -inf  ;;  %v2229_v39 = vsel %vm449_vm9, %v2223_v10, -inf }
 0xded   :  { %2434 = vmax.xlane.f32.xlu0 %v2433_v33 }
 0xdf7   :  { %v2350_v50 = vpop.f32.mrf.mxu0 }
 0xdf8   :  { %v2422_v14 = vmul.f32 0.35355338, %v2350_v50 }
 0xdfa   :  { %v2426_v20 = vadd.f32 %v2422_v14, %v4607_v44 }
 0xdfc   :  { %v2430_v58 = vsel %vm449_vm9, %v2426_v20, -inf }
 0xdfd   :  { %v2131_v45 = vpop.f32.mrf.mxu3  ;;  %2431 = vmax.xlane.f32.xlu2 %v2430_v58 }
 0xdfe   :  { %v2218_v29 = vmul.f32 0.35355338, %v2131_v45 }
 0xe00   :  { %v2222_v26 = vadd.f32 %v2218_v29, %v4607_v44 }
 0xe02   :  { %v2226_v35 = vsel %vm449_vm9, %v2222_v26, -inf }
 0xe05   :  { %2227 = vmax.xlane.f32.xlu2 %v2226_v35 }
 0xe0d   :  { %2230 = vmax.xlane.f32.xlu2 %v2229_v39  ;;  %v2187_v16 = vpop.f32.mrf.mxu2 }
 0xe0e   :  { %v2220_v30 = vmul.f32 0.35355338, %v2187_v16 }
 0xe10   :  { %v2224_v24 = vadd.f32 %v2220_v30, %v4613_v8 }
 0xe12   :  { %v2232_v36 = vsel %vm449_vm9, %v2224_v24, -inf }
 0xe13   :  { %2233 = vmax.xlane.f32.xlu0 %v2232_v36 }
 0xe15   :  { %v2215_v9 = vpop.f32.mrf.mxu3  ;;  %v2396_v32 = vpop.f32.mrf.mxu2 }
 0xe16   :  { %v2424_v56 = vmul.f32 0.35355338, %v2396_v32  ;;  %v2221_v42 = vmul.f32 0.35355338, %v2215_v9 }
 0xe18   :  { %v2428_v38 = vadd.f32 %v2424_v56, %v4613_v8  ;;  %v2225_v33 = vadd.f32 %v2221_v42, %v4629_v19 }
 0xe1a   :  { %v2436_v40 = vsel %vm449_vm9, %v2428_v38, -inf  ;;  %v2235_v25 = vsel %vm449_vm9, %v2225_v33, -inf }
 0xe1b   :  { %2437 = vmax.xlane.f32.xlu1 %v2436_v40 }
 0xe1d   :  { %v2419_v34 = vpop.f32.mrf.mxu3 }
 0xe1e   :  { %v2425_v1 = vmul.f32 0.35355338, %v2419_v34 }
 0xe20   :  { %v2429_v31 = vadd.f32 %v2425_v1, %v4629_v19 }
 0xe22   :  { %v2439_v60 = vsel %vm449_vm9, %v2429_v31, -inf }
 0xe23   :  { %2440 = vmax.xlane.f32.xlu1 %v2439_v60 }
 0xe27   :  { %4124 = vrot.lane.b32.xlu0 %v4123_v54, %s4424_s24 }
 0xe2b   :  { %2236 = vmax.xlane.f32.xlu1 %v2235_v25 }
 0xe60   :  { %v2435_v50 = vpop.xlane.xlu0 %2434 }
 0xe61   :  { %v2443_v14 = vsub.f32 %v2427_v18, %v2435_v50 }
 0xe63   :  { %v2448_v58 = vmul.f32 1.442695, %v2443_v14 }
 0xe65   :  { %4301 = vpow2.f32 %v2448_v58 }
 0xe6b   :  { %v5194_v45 = vpop.eup %4301 }
 0xe6c   :  { %v2457_v29 = vsel %vm449_vm9, %v5194_v45, 0.0 }
 0xe6d   :  { %2458 = vadd.xlane.f32.xlu2 %v2457_v29 }
 0xe70   :  { %v2432_v4 = vpop.xlane.xlu2 %2431 }
 0xe71   :  { %v2442_v54 = vsub.f32 %v2426_v20, %v2432_v4 }
 0xe73   :  { %v2446_v9 = vmul.f32 1.442695, %v2442_v54 }
 0xe78   :  { %v2228_v35 = vpop.xlane.xlu2 %2227 }
 0xe79   :  { %v2238_v39 = vsub.f32 %v2222_v26, %v2228_v35 }
 0xe7b   :  { %v2242_v16 = vmul.f32 1.442695, %v2238_v39 }
 0xe7d   :  { %4303 = vpow2.f32 %v2242_v16 }
 0xe80   :  { %v2231_v21 = vpop.xlane.xlu2 %2230 }
 0xe81   :  { %v2239_v27 = vsub.f32 %v2223_v10, %v2231_v21 }
 0xe83   :  { %v5198_v30 = vpop.eup %4303  ;;  %v2244_v36 = vmul.f32 1.442695, %v2239_v27 }
 0xe84   :  { %v2250_v18 = vsel %vm449_vm9, %v5198_v30, 0.0 }
 0xe85   :  { %4305 = vpow2.f32 %v2244_v36  ;;  %2251 = vadd.xlane.f32.xlu1 %v2250_v18 }
 0xe86   :  { %v2234_v32 = vpop.xlane.xlu0 %2233  ;;  %4307 = vpow2.f32 %v2446_v9 }
 0xe87   :  { %v2240_v56 = vsub.f32 %v2224_v24, %v2234_v32 }
 0xe89   :  { %v2246_v40 = vmul.f32 1.442695, %v2240_v56 }
 0xe8b   :  { %v5202_v34 = vpop.eup %4305  ;;  %4309 = vpow2.f32 %v2246_v40 }
 0xe8c   :  { %v2253_v26 = vsel %vm449_vm9, %v5202_v34, 0.0  ;;  %v5206_v1 = vpop.eup %4307 }
 0xe8d   :  { %2254 = vadd.xlane.f32.xlu1 %v2253_v26  ;;  %v2454_v24 = vsel %vm449_vm9, %v5206_v1, 0.0 }
 0xe8e   :  { %v2438_v20 = vpop.xlane.xlu1 %2437 }
 0xe8f   :  { %v2444_v10 = vsub.f32 %v2428_v38, %v2438_v20 }
 0xe91   :  { %v5208_v42 = vpop.eup %4309  ;;  %v2450_v60 = vmul.f32 1.442695, %v2444_v10 }
 0xe92   :  { %v2256_v25 = vsel %vm449_vm9, %v5208_v42, 0.0 }
 0xe93   :  { %4311 = vpow2.f32 %v2450_v60  ;;  %2257 = vadd.xlane.f32.xlu2 %v2256_v25 }
 0xe95   :  { %2455 = vadd.xlane.f32.xlu1 %v2454_v24 }
 0xe96   :  { %v2441_v50 = vpop.xlane.xlu1 %2440 }
 0xe97   :  { %v2445_v39 = vsub.f32 %v2429_v31, %v2441_v50 }
 0xe99   :  { %v5214_v14 = vpop.eup %4311  ;;  %v4125_v58 = vpop.permute.xlu0 %4124  ;;  %v2452_v21 = vmul.f32 1.442695, %v2445_v39 }
 0xe9a   :  { %v4126_v29 = vunpack.i.l.bf16 %v4125_v58  ;;  %v2460_v38 = vsel %vm449_vm9, %v5214_v14, 0.0  ;;  %v4127_v20 = vunpack.i.h.bf16 %v4125_v58 }
 0xe9b   :  { %2461 = vadd.xlane.f32.xlu0 %v2460_v38 }
 0xe9c   :  { %2633 = vmatpush.msra.mxu3 %v4126_v29 }
 0xe9e   :  { %v2237_v4 = vpop.xlane.xlu1 %2236 }
 0xe9f   :  { %v2241_v35 = vsub.f32 %v2225_v33, %v2237_v4 }
 0xea1   :  { %v2248_v16 = vmul.f32 1.442695, %v2241_v35 }
 0xea3   :  { %4313 = vpow2.f32 %v2248_v16 }
 0xea4   :  { %4315 = vpow2.f32 %v2452_v21 }
 0xea9   :  { %v5218_v27 = vpop.eup %4313 }
 0xeaa   :  { %v2259_v54 = vsel %vm449_vm9, %v5218_v27, 0.0  ;;  %v5230_v31 = vpop.eup %4315 }
 0xeab   :  { %2260 = vadd.xlane.f32.xlu0 %v2259_v54  ;;  %4119 = vrot.lane.b32.xlu2 %v4118_v11, %s4424_s24  ;;  %v2463_v33 = vsel %vm449_vm9, %v5230_v31, 0.0 }
 0xeae   :  { %4129 = vrot.lane.b32.xlu1 %v4128_v49, %s4424_s24 }
 0xeb3   :  { %2464 = vadd.xlane.f32.xlu0 %v2463_v33 }
 0xec7   :  { %4134 = vrot.lane.b32.xlu0 %v4133_v41, %s4424_s24 }
 0xee0   :  { %v5240_v59 = vpop.xlane.xlu2 %2458 }
 0xee1   :  { %4317 = vrcp.f32 %v5240_v59  ;;  %vm2485_vm14 = vweird.f32 %v5240_v59  ;;  %v2489_v58 = vand.u32 2147483647, %v5240_v59  ;;  %v2491_v39 = vand.u32 2147483648, %v5240_v59 }
 0xee3   :  { %vm5287_vm8 = vcmp.eq.f32.partialorder %v2489_v58, 8.507059e+37 }
 0xee7   :  { %v5248_v46 = vpop.eup %4317 }
 0xee8   :  { %v2481_v51 = vmul.f32 %v5248_v46, %v5240_v59  ;;  %vm2486_vm1 = vweird.f32 %v5248_v46 }
 0xee9   :  { %vm5283_vm7 = vmor %vm2485_vm14, %vm2486_vm1 }
 0xeea   :  { %v2482_v56 = vsub.f32 1.0, %v2481_v51 }
 0xeec   :  { %v2483_v50 = vmul.f32 %v5248_v46, %v2482_v56 }
 0xeee   :  { %v2484_v51 = vadd.f32 %v5248_v46, %v2483_v50 }
 0xef8   :  { %v5238_v36 = vpop.xlane.xlu1 %2251 }
 0xef9   :  { %4319 = vrcp.f32 %v5238_v36  ;;  %vm2267_vm10 = vweird.f32 %v5238_v36 }
 0xeff   :  { %v5251_v11 = vpop.eup %4319 }
 0xf00   :  { %v5242_v23 = vpop.xlane.xlu1 %2254  ;;  %v2263_v37 = vmul.f32 %v5251_v11, %v5238_v36  ;;  %vm2268_vm3 = vweird.f32 %v5251_v11 }
 0xf01   :  { %vm5298_vm11 = vmor %vm2267_vm10, %vm2268_vm3 }
 0xf02   :  { %v2264_v60 = vsub.f32 1.0, %v2263_v37  ;;  %v2273_v37 = vand.u32 2147483648, %v5238_v36 }
 0xf04   :  { %v2265_v16 = vmul.f32 %v5251_v11, %v2264_v60  ;;  %v2274_v58 = vor.u32 1.1754944e-38, %v2273_v37 }
 0xf06   :  { %v5246_v63 = vpop.xlane.xlu2 %2257 }
 0xf07   :  { %4321 = vrcp.f32 %v5246_v63 }
 0xf08   :  { %v2456_v49 = vpop.xlane.xlu1 %2455 }
 0xf09   :  { %4323 = vrcp.f32 %v2456_v49  ;;  %v2477_v29 = vand.u32 2147483648, %v2456_v49  ;;  %v2475_v4 = vand.u32 2147483647, %v2456_v49  ;;  %vm2471_vm15 = vweird.f32 %v2456_v49 }
 0xf0b   :  { %vm2476_vm4 = vcmp.eq.f32.partialorder %v2475_v4, 8.507059e+37  ;;  %v2492_v4 = vor.u32 1.1754944e-38, %v2491_v39  ;;  %v2301_v39 = vand.u32 2147483648, %v5246_v63 }
 0xf0d   :  { %v5257_v41 = vpop.eup %4321 }
 0xf0e   :  { %v4120_v18 = vpop.permute.xlu2 %4119  ;;  %v5259_v9 = vpop.xlane.xlu0 %2461  ;;  %v2291_v25 = vmul.f32 %v5257_v41, %v5246_v63  ;;  %vm2296_vm14 = vweird.f32 %v5257_v41 }
 0xf0f   :  { %v4324_v32 = vpop.eup %4323  ;;  %v4122_v40 = vunpack.i.h.bf16 %v4120_v18  ;;  %v4121_v26 = vunpack.i.l.bf16 %v4120_v18  ;;  %4325 = vrcp.f32 %v5259_v9  ;;  %v2478_v18 = vor.u32 1.1754944e-38, %v2477_v29 }
 0xf10   :  { %v2467_v10 = vmul.f32 %v4324_v32, %v2456_v49  ;;  %vm2472_vm13 = vweird.f32 %v4324_v32  ;;  %v2292_v21 = vsub.f32 1.0, %v2291_v25  ;;  %v2503_v49 = vand.u32 2147483647, %v5259_v9 }
 0xf11   :  { %2552 = vmatpush.msrb.mxu0 %v4122_v40  ;;  %2606 = vmatpush.msra.mxu2 %v4121_v26  ;;  %vm2473_vm2 = vmor %vm2471_vm15, %vm2472_vm13  ;;  %v2266_v26 = vadd.f32 %v5251_v11, %v2265_v16  ;;  %v2271_v29 = vand.u32 2147483647, %v5238_v36  ;;  %4327 = vrcp.f32 %v5242_v23  ;;  %vm2499_vm12 = vweird.f32 %v5259_v9 }
 0xf12   :  { %v2468_v24 = vsub.f32 1.0, %v2467_v10  ;;  %v2505_v10 = vand.u32 2147483648, %v5259_v9  ;;  %v2293_v60 = vmul.f32 %v5257_v41, %v2292_v21  ;;  %vm2504_vm15 = vcmp.eq.f32.partialorder %v2503_v49, 8.507059e+37 }
 0xf13   :  { %2714 = vmatpush.msrb.mxu2 %v4127_v20  ;;  %v2270_v36 = vsel %vm5298_vm11, %v5251_v11, %v2266_v26  ;;  %vm2272_vm1 = vcmp.eq.f32.partialorder %v2271_v29, 8.507059e+37  ;;  %v2302_v49 = vor.u32 1.1754944e-38, %v2301_v39 }
 0xf14   :  { %v2469_v38 = vmul.f32 %v4324_v32, %v2468_v24  ;;  %v2294_v16 = vadd.f32 %v5257_v41, %v2293_v60  ;;  %v2275_v11 = vsel %vm2272_vm1, %v2274_v58, %v2270_v36 }
 0xf15   :  { %v4326_v35 = vpop.eup %4325 }
 0xf16   :  { %v2470_v54 = vadd.f32 %v4324_v32, %v2469_v38  ;;  %v2495_v33 = vmul.f32 %v4326_v35, %v5259_v9  ;;  %vm2500_vm6 = vweird.f32 %v4326_v35 }
 0xf17   :  { %vm2501_vm13 = vmor %vm2499_vm12, %vm2500_vm6  ;;  %v4328_v26 = vpop.eup %4327 }
 0xf18   :  { %v2474_v56 = vsel %vm2473_vm2, %v4324_v32, %v2470_v54  ;;  %v2496_v40 = vsub.f32 1.0, %v2495_v33  ;;  %vm2295_vm2 = vweird.f32 %v5246_v63  ;;  %v2746_v32 = vmul.f32 %v4724_v61, %v5060_v22 }
 0xf19   :  { %v2479_v20 = vsel %vm2476_vm4, %v2478_v18, %v2474_v56  ;;  %vm5319_vm3 = vmor %vm2295_vm2, %vm2296_vm14  ;;  %vm2282_vm6 = vweird.f32 %v4328_v26 }
 0xf1a   :  { %v2497_v25 = vmul.f32 %v4326_v35, %v2496_v40  ;;  %v2522_v24 = vmul.f32 %v5206_v1, %v2479_v20  ;;  %v2488_v1 = vsel %vm5283_vm7, %v5248_v46, %v2484_v51  ;;  %v2506_v46 = vor.u32 1.1754944e-38, %v2505_v10 }
 0xf1b   :  { %v2493_v9 = vsel %vm5287_vm8, %v2492_v4, %v2488_v1  ;;  %v2299_v51 = vand.u32 2147483647, %v5246_v63  ;;  %v2298_v20 = vsel %vm5319_vm3, %v5257_v41, %v2294_v16  ;;  %v2277_v10 = vmul.f32 %v4328_v26, %v5242_v23 }
 0xf1c   :  { %v2498_v38 = vadd.f32 %v4326_v35, %v2497_v25  ;;  %4010 = vmatmul.msk.f32.vlgmr.msrb.gmra.mxu0 %vm449_vm9, %v2522_v24  ;;  %v2523_v63 = vmul.f32 %v5194_v45, %v2493_v9  ;;  %v2748_v4 = vmul.f32 %v4724_v61, %v5078_v3  ;;  %vm2281_vm8 = vweird.f32 %v5242_v23 }
 0xf1d   :  { %vm2300_vm4 = vcmp.eq.f32.partialorder %v2299_v51, 8.507059e+37  ;;  %v2278_v24 = vsub.f32 1.0, %v2277_v10  ;;  %v2285_v9 = vand.u32 2147483647, %v5242_v23  ;;  %vm2283_vm10 = vmor %vm2281_vm8, %vm2282_vm6 }
 0xf1e   :  { %v2502_v21 = vsel %vm2501_vm13, %v4326_v35, %v2498_v38  ;;  %v5311_v54 = vpop.xlane.xlu0 %2260  ;;  %v2303_v60 = vsel %vm2300_vm4, %v2302_v49, %v2298_v20 }
 0xf1f   :  { %v2507_v33 = vsel %vm2504_vm15, %v2506_v46, %v2502_v21  ;;  %4329 = vrcp.f32 %v5311_v54  ;;  %v2320_v25 = vmul.f32 %v5208_v42, %v2303_v60  ;;  %v2279_v29 = vmul.f32 %v4328_v26, %v2278_v24 }
 0xf20   :  { %v4130_v37 = vpop.permute.xlu1 %4129  ;;  %v2524_v18 = vmul.f32 %v5214_v14, %v2507_v33  ;;  %v2318_v14 = vmul.f32 %v5198_v30, %v2275_v11  ;;  %v2287_v42 = vand.u32 2147483648, %v5242_v23  ;;  %vm2286_vm15 = vcmp.eq.f32.partialorder %v2285_v9, 8.507059e+37 }
 0xf21   :  { %v4132_v56 = vunpack.i.h.bf16 %v4130_v37  ;;  %v4131_v40 = vunpack.i.l.bf16 %v4130_v37  ;;  %v2280_v36 = vadd.f32 %v4328_v26, %v2279_v29  ;;  %v2315_v35 = vand.u32 2147483648, %v5311_v54 }
 0xf22   :  { %4012 = vmatmul.msk.f32.vlgmr.msra.gmra.mxu2 %vm449_vm9, %v2524_v18  ;;  %v2288_v11 = vor.u32 1.1754944e-38, %v2287_v42  ;;  %vm2309_vm1 = vweird.f32 %v5311_v54  ;;  %v2313_v23 = vand.u32 2147483647, %v5311_v54 }
 0xf23   :  { %4022 = vmatpush.xpose.msk.msra.mxu2 %vm148_vm5, %v5150_v6  ;;  %2579 = vmatpush.msrb.mxu1 %v4131_v40  ;;  %v2284_v33 = vsel %vm2283_vm10, %v4328_v26, %v2280_v36  ;;  %v2316_v10 = vor.u32 1.1754944e-38, %v2315_v35 }
 0xf24   :  { %2660 = vmatpush.msra.mxu0 %v4132_v56  ;;  %4011 = vmatmul.msk.f32.vlgmr.msrb.gmra.mxu1 %vm449_vm9, %v2523_v63  ;;  %v2289_v40 = vsel %vm2286_vm15, %v2288_v11, %v2284_v33  ;;  %vm2314_vm3 = vcmp.eq.f32.partialorder %v2313_v23, 8.507059e+37 }
 0xf25   :  { %4014 = vmatmul.msk.f32.vlgmr.msra.gmra.mxu0 %vm449_vm9, %v2318_v14  ;;  %v4330_v41 = vpop.eup %4329  ;;  %v2319_v60 = vmul.f32 %v5202_v34, %v2289_v40  ;;  %v2749_v34 = vmul.f32 %v4724_v61, %v5102_v28 }
 0xf26   :  { %4018 = vmatpush.xpose.msk.msrb.mxu0 %vm148_vm5, %v5138_v43  ;;  %v2465_v45 = vpop.xlane.xlu0 %2464  ;;  %v2305_v30 = vmul.f32 %v4330_v41, %v5311_v54  ;;  %vm2310_vm13 = vweird.f32 %v4330_v41  ;;  %v2747_v54 = vmul.f32 %v4724_v61, %v5064_v48 }
 0xf27   :  { %4331 = vrcp.f32 %v2465_v45  ;;  %v2519_v58 = vand.u32 2147483648, %v2465_v45  ;;  %v2517_v21 = vand.u32 2147483647, %v2465_v45  ;;  %vm2513_vm11 = vweird.f32 %v2465_v45  ;;  %vm2311_vm2 = vmor %vm2309_vm1, %vm2310_vm13 }
 0xf28   :  { %v2306_v1 = vsub.f32 1.0, %v2305_v30 }
 0xf29   :  { %v2520_v51 = vor.u32 1.1754944e-38, %v2519_v58  ;;  %vm2518_vm14 = vcmp.eq.f32.partialorder %v2517_v21, 8.507059e+37 }
 0xf2a   :  { %4016 = vmatmul.msk.f32.vlgmr.msrb.gmra.mxu2 %vm449_vm9, %v2320_v25  ;;  %v2307_v46 = vmul.f32 %v4330_v41, %v2306_v1 }
 0xf2c   :  { %v2308_v37 = vadd.f32 %v4330_v41, %v2307_v46 }
 0xf2d   :  { %v4332_v50 = vpop.eup %4331  ;;  %4019 = vmatmul.msk.f32.vlgmr.msrb.gmra.mxu0 %vm148_vm5, %v2746_v32 }
 0xf2e   :  { %v2509_v59 = vmul.f32 %v4332_v50, %v2465_v45  ;;  %vm2514_vm7 = vweird.f32 %v4332_v50  ;;  %v2312_v63 = vsel %vm2311_vm2, %v4330_v41, %v2308_v37 }
 0xf2f   :  { %vm2515_vm12 = vmor %vm2513_vm11, %vm2514_vm7  ;;  %v2317_v45 = vsel %vm2314_vm3, %v2316_v10, %v2312_v63 }
 0xf30   :  { %v2510_v38 = vsub.f32 1.0, %v2509_v59 }
 0xf32   :  { %v2511_v16 = vmul.f32 %v4332_v50, %v2510_v38  ;;  %4023 = vmatmul.msk.f32.vlgmr.msra.gmra.mxu2 %vm148_vm5, %v2748_v4 }
 0xf34   :  { %v2512_v39 = vadd.f32 %v4332_v50, %v2511_v16 }
 0xf36   :  { %v2516_v18 = vsel %vm2515_vm12, %v4332_v50, %v2512_v39 }
 0xf37   :  { %v2521_v56 = vsel %vm2518_vm14, %v2520_v51, %v2516_v18 }
 0xf38   :  { %v2525_v20 = vmul.f32 %v5230_v31, %v2521_v56  ;;  %v2321_v31 = vmul.f32 %v5218_v27, %v2317_v45 }
 0xf39   :  { %v4135_v26 = vpop.permute.xlu0 %4134 }
 0xf3a   :  { %v4137_v49 = vunpack.i.h.bf16 %v4135_v26  ;;  %v4136_v14 = vunpack.i.l.bf16 %v4135_v26  ;;  %4013 = vmatmul.msk.f32.vlgmr.msra.gmra.mxu3 %vm449_vm9, %v2525_v20 }
 0xf3c   :  { %2687 = vmatpush.msra.mxu1 %v4137_v49  ;;  %2741 = vmatpush.msrb.mxu3 %v4136_v14 }
 0xf3d   :  { %4015 = vmatmul.msk.f32.vlgmr.msra.gmra.mxu1 %vm449_vm9, %v2319_v60 }
 0xf3e   :  { %4024 = vmatpush.xpose.msk.msra.mxu3 %vm148_vm5, %v5159_v47  ;;  %4020 = vmatpush.xpose.msk.msrb.mxu1 %vm148_vm5, %v5126_v2 }
 0xf42   :  { %4017 = vmatmul.msk.f32.vlgmr.msrb.gmra.mxu3 %vm449_vm9, %v2321_v31 }
 0xf45   :  { %4021 = vmatmul.msk.f32.vlgmr.msrb.gmra.mxu1 %vm148_vm5, %v2747_v54 }
 0xf4a   :  { %4025 = vmatmul.msk.f32.vlgmr.msra.gmra.mxu3 %vm148_vm5, %v2749_v34 }
 0xf99   :  { %v2554_v41 = vpop.f32.mrf.mxu0 }
 0xfa1   :  { %v2581_v38 = vpop.f32.mrf.mxu1 }
 0xfa2   :  { %v2662_v25 = vpop.f32.mrf.mxu0 }
 0xfa3   :  { %v5368_v24 = vadd.f32 %v2662_v25, %v2554_v41 }
 0xfa5   :  { %v2608_v30 = vpop.f32.mrf.mxu2 }
 0xfaa   :  { %v2770_v32 = vpop.f32.mrf.mxu0 }
 0xfab   :  { %v2842_v50 = vmul.f32 0.35355338, %v2770_v32 }
 0xfad   :  { %v2716_v27 = vpop.f32.mrf.mxu2  ;;  %v2846_v29 = vadd.f32 %v2842_v50, %v4607_v44 }
 0xfae   :  { %v5371_v1 = vadd.f32 %v2716_v27, %v2608_v30 }
 0xfaf   :  { %v2850_v59 = vsel %vm449_vm9, %v2846_v29, -inf }
 0xfb0   :  { %2851 = vmax.xlane.f32.xlu2 %v2850_v59 }
 0xfb5   :  { %v2816_v4 = vpop.f32.mrf.mxu2 }
 0xfb6   :  { %v2844_v61 = vmul.f32 0.35355338, %v2816_v4  ;;  %v2949_v4 = vmul.f32 %v5102_v28, %v4809_v12 }
 0xfb8   :  { %v2848_v36 = vadd.f32 %v2844_v61, %v4613_v8  ;;  %v2947_v61 = vmul.f32 %v5064_v48, %v4809_v12 }
 0xfba   :  { %v2689_v42 = vpop.f32.mrf.mxu1  ;;  %v2856_v58 = vsel %vm449_vm9, %v2848_v36, -inf }
 0xfbb   :  { %v5376_v46 = vadd.f32 %v2689_v42, %v2581_v38  ;;  %2857 = vmax.xlane.f32.xlu1 %v2856_v58  ;;  %v2948_v38 = vmul.f32 %v5078_v3, %v4809_v12 }
 0xfbd   :  { %v2635_v16 = vpop.f32.mrf.mxu3 }
 0xfc2   :  { %v2793_v21 = vpop.f32.mrf.mxu1 }
 0xfc3   :  { %v2843_v9 = vmul.f32 0.35355338, %v2793_v21 }
 0xfc5   :  { %v2743_v39 = vpop.f32.mrf.mxu3  ;;  %v2847_v33 = vadd.f32 %v2843_v9, %v4615_v57 }
 0xfc6   :  { %v5379_v11 = vadd.f32 %v2743_v39, %v2635_v16 }
 0xfc7   :  { %v2853_v51 = vsel %vm449_vm9, %v2847_v33, -inf }
 0xfc8   :  { %2854 = vmax.xlane.f32.xlu0 %v2853_v51 }
 0xfcd   :  { %v2839_v37 = vpop.f32.mrf.mxu3 }
 0xfce   :  { %v2845_v18 = vmul.f32 0.35355338, %v2839_v37 }
 0xfd0   :  { %v2849_v35 = vadd.f32 %v2845_v18, %v4629_v19 }
 0xfd2   :  { %v2859_v56 = vsel %vm449_vm9, %v2849_v35, -inf }
 0xfd3   :  { %2860 = vmax.xlane.f32.xlu2 %v2859_v56 }
0x1023   :  { %v2852_v40 = vpop.xlane.xlu2 %2851 }
0x1024   :  { %v2862_v23 = vsub.f32 %v2846_v29, %v2852_v40  ;;  %v2946_v29 = vmul.f32 %v5060_v22, %v4809_v12 }
0x1026   :  { %v2866_v20 = vmul.f32 1.442695, %v2862_v23 }
0x1028   :  { %4333 = vpow2.f32 %v2866_v20 }
0x102e   :  { %v4334_v26 = vpop.eup %4333  ;;  %v2858_v63 = vpop.xlane.xlu1 %2857 }
0x102f   :  { %v2864_v49 = vsub.f32 %v2848_v36, %v2858_v63  ;;  %v2874_v14 = vsel %vm449_vm9, %v4334_v26, 0.0 }
0x1030   :  { %2875 = vadd.xlane.f32.xlu1 %v2874_v14 }
0x1031   :  { %v2870_v10 = vmul.f32 1.442695, %v2864_v49  ;;  %v3062_v49 = vmul.f32 %v4841_v0, %v5060_v22 }
0x1033   :  { %4335 = vpow2.f32 %v2870_v10 }
0x1039   :  { %v5385_v60 = vpop.eup %4335 }
0x103a   :  { %v2880_v45 = vsel %vm449_vm9, %v5385_v60, 0.0 }
0x103b   :  { %v2855_v31 = vpop.xlane.xlu0 %2854  ;;  %2881 = vadd.xlane.f32.xlu2 %v2880_v45 }
0x103c   :  { %v2863_v54 = vsub.f32 %v2847_v33, %v2855_v31 }
0x103e   :  { %v2868_v34 = vmul.f32 1.442695, %v2863_v54 }
0x1040   :  { %4337 = vpow2.f32 %v2868_v34 }
0x1046   :  { %v5389_v41 = vpop.eup %4337  ;;  %v2861_v25 = vpop.xlane.xlu2 %2860 }
0x1047   :  { %v2865_v30 = vsub.f32 %v2849_v35, %v2861_v25  ;;  %v2877_v32 = vsel %vm449_vm9, %v5389_v41, 0.0 }
0x1048   :  { %2878 = vadd.xlane.f32.xlu0 %v2877_v32 }
0x1049   :  { %v2872_v50 = vmul.f32 1.442695, %v2865_v30 }
0x104b   :  { %4339 = vpow2.f32 %v2872_v50 }
0x1051   :  { %v5393_v27 = vpop.eup %4339 }
0x1052   :  { %v2883_v59 = vsel %vm449_vm9, %v5393_v27, 0.0 }
0x1053   :  { %2951 = vrot.lane.b32.xlu2 %v2946_v29, %s4424_s24  ;;  %2884 = vadd.xlane.f32.xlu1 %v2883_v59 }
0x105c   :  { %3005 = vrot.lane.b32.xlu0 %v2948_v38, %s4424_s24 }
0x1064   :  { %3032 = vrot.lane.b32.xlu0 %v2949_v4, %s4424_s24 }
0x106c   :  { %2978 = vrot.lane.b32.xlu1 %v2947_v61, %s4424_s24 }
0x10a3   :  { %v2876_v36 = vpop.xlane.xlu1 %2875 }
0x10a4   :  { %4341 = vrcp.f32 %v2876_v36  ;;  %v2897_v21 = vand.u32 2147483648, %v2876_v36  ;;  %v2895_v33 = vand.u32 2147483647, %v2876_v36  ;;  %vm2891_vm6 = vweird.f32 %v2876_v36 }
0x10a6   :  { %v2898_v37 = vor.u32 1.1754944e-38, %v2897_v21  ;;  %vm2896_vm8 = vcmp.eq.f32.partialorder %v2895_v33, 8.507059e+37 }
0x10aa   :  { %v4342_v42 = vpop.eup %4341 }
0x10ab   :  { %v2887_v58 = vmul.f32 %v4342_v42, %v2876_v36  ;;  %vm2892_vm4 = vweird.f32 %v4342_v42 }
0x10ac   :  { %vm2893_vm7 = vmor %vm2891_vm6, %vm2892_vm4 }
0x10ad   :  { %v2888_v16 = vsub.f32 1.0, %v2887_v58 }
0x10ae   :  { %v2882_v9 = vpop.xlane.xlu2 %2881 }
0x10af   :  { %v2889_v39 = vmul.f32 %v4342_v42, %v2888_v16  ;;  %4343 = vrcp.f32 %v2882_v9  ;;  %vm2919_vm11 = vweird.f32 %v2882_v9  ;;  %v2923_v31 = vand.u32 2147483647, %v2882_v9 }
0x10b1   :  { %v2890_v51 = vadd.f32 %v4342_v42, %v2889_v39  ;;  %vm2924_vm13 = vcmp.eq.f32.partialorder %v2923_v31, 8.507059e+37 }
0x10b3   :  { %v2894_v18 = vsel %vm2893_vm7, %v4342_v42, %v2890_v51 }
0x10b4   :  { %v2899_v12 = vsel %vm2896_vm8, %v2898_v37, %v2894_v18 }
0x10b5   :  { %v4344_v35 = vpop.eup %4343  ;;  %v2942_v40 = vmul.f32 %v4334_v26, %v2899_v12  ;;  %v2925_v26 = vand.u32 2147483648, %v2882_v9 }
0x10b6   :  { %v2952_v56 = vpop.permute.xlu2 %2951  ;;  %v2915_v23 = vmul.f32 %v4344_v35, %v2882_v9  ;;  %vm2920_vm10 = vweird.f32 %v4344_v35 }
0x10b7   :  { %2972 = vmatpush.msra.mxu0 %v2952_v56  ;;  %vm2921_vm12 = vmor %vm2919_vm11, %vm2920_vm10  ;;  %v2926_v25 = vor.u32 1.1754944e-38, %v2925_v26 }
0x10b8   :  { %4026 = vmatmul.msk.f32.vlgmr.msra.gmra.mxu0 %vm449_vm9, %v2942_v40  ;;  %v2916_v20 = vsub.f32 1.0, %v2915_v23  ;;  %v3065_v23 = vmul.f32 %v4841_v0, %v5102_v28 }
0x10b9   :  { %4030 = vmatpush.xpose.msk.msrb.mxu0 %vm148_vm5, %v5138_v43 }
0x10ba   :  { %v2917_v14 = vmul.f32 %v4344_v35, %v2916_v20 }
0x10bb   :  { %v2879_v63 = vpop.xlane.xlu0 %2878 }
0x10bc   :  { %4345 = vrcp.f32 %v2879_v63  ;;  %v2918_v10 = vadd.f32 %v4344_v35, %v2917_v14  ;;  %v2911_v9 = vand.u32 2147483648, %v2879_v63  ;;  %vm2905_vm3 = vweird.f32 %v2879_v63 }
0x10bd   :  { %v2909_v33 = vand.u32 2147483647, %v2879_v63 }
0x10be   :  { %v2922_v34 = vsel %vm2921_vm12, %v4344_v35, %v2918_v10  ;;  %v2912_v35 = vor.u32 1.1754944e-38, %v2911_v9 }
0x10bf   :  { %v2927_v30 = vsel %vm2924_vm13, %v2926_v25, %v2922_v34  ;;  %vm2910_vm7 = vcmp.eq.f32.partialorder %v2909_v33, 8.507059e+37 }
0x10c0   :  { %4031 = vmatmul.msk.f32.vlgmr.msrb.gmra.mxu0 %vm148_vm5, %v3062_v49  ;;  %v2944_v38 = vmul.f32 %v5385_v60, %v2927_v30  ;;  %v3064_v60 = vmul.f32 %v4841_v0, %v5078_v3 }
0x10c2   :  { %v4346_v45 = vpop.eup %4345 }
0x10c3   :  { %v2901_v43 = vmul.f32 %v4346_v45, %v2879_v63  ;;  %vm2906_vm15 = vweird.f32 %v4346_v45 }
0x10c4   :  { %vm2907_vm6 = vmor %vm2905_vm3, %vm2906_vm15 }
0x10c5   :  { %v2902_v32 = vsub.f32 1.0, %v2901_v43 }
0x10c6   :  { %v2885_v54 = vpop.xlane.xlu1 %2884 }
0x10c7   :  { %4347 = vrcp.f32 %v2885_v54  ;;  %v2903_v4 = vmul.f32 %v4346_v45, %v2902_v32  ;;  %v2939_v36 = vand.u32 2147483648, %v2885_v54  ;;  %v2937_v58 = vand.u32 2147483647, %v2885_v54 }
0x10c8   :  { %vm2933_vm1 = vweird.f32 %v2885_v54 }
0x10c9   :  { %v2904_v16 = vadd.f32 %v4346_v45, %v2903_v4  ;;  %v2940_v39 = vor.u32 1.1754944e-38, %v2939_v36  ;;  %vm2938_vm4 = vcmp.eq.f32.partialorder %v2937_v58, 8.507059e+37 }
0x10cb   :  { %v2908_v18 = vsel %vm2907_vm6, %v4346_v45, %v2904_v16 }
0x10cc   :  { %v2913_v3 = vsel %vm2910_vm7, %v2912_v35, %v2908_v18  ;;  %v3262_v18 = vmul.f32 %v5060_v22, %v4899_v55 }
0x10cd   :  { %v4348_v50 = vpop.eup %4347  ;;  %v2943_v40 = vmul.f32 %v5389_v41, %v2913_v3  ;;  %v3378_v3 = vld [vmem:[#allocation2 + $0x60] sm:$0xff] }
0x10ce   :  { %v2929_v29 = vmul.f32 %v4348_v50, %v2885_v54  ;;  %v3006_v59 = vpop.permute.xlu0 %3005  ;;  %vm2934_vm14 = vweird.f32 %v4348_v50 }
0x10cf   :  { %3026 = vmatpush.msrb.mxu2 %v3006_v59  ;;  %vm2935_vm2 = vmor %vm2933_vm1, %vm2934_vm14 }
0x10d0   :  { %v2930_v61 = vsub.f32 1.0, %v2929_v29  ;;  %4028 = vmatmul.msk.f32.vlgmr.msrb.gmra.mxu2 %vm449_vm9, %v2944_v38 }
0x10d1   :  { %4034 = vmatpush.xpose.msk.msra.mxu2 %vm148_vm5, %v5150_v6 }
0x10d2   :  { %v2931_v42 = vmul.f32 %v4348_v50, %v2930_v61 }
0x10d4   :  { %v2932_v21 = vadd.f32 %v4348_v50, %v2931_v42 }
0x10d6   :  { %v2936_v51 = vsel %vm2935_vm2, %v4348_v50, %v2932_v21  ;;  %v3033_v37 = vpop.permute.xlu0 %3032 }
0x10d7   :  { %v2941_v6 = vsel %vm2938_vm4, %v2940_v39, %v2936_v51  ;;  %3053 = vmatpush.msrb.mxu3 %v3033_v37 }
0x10d8   :  { %4035 = vmatmul.msk.f32.vlgmr.msra.gmra.mxu2 %vm148_vm5, %v3064_v60  ;;  %v2945_v12 = vmul.f32 %v5393_v27, %v2941_v6  ;;  %v3265_v6 = vmul.f32 %v5102_v28, %v4899_v55 }
0x10d9   :  { %4036 = vmatpush.xpose.msk.msra.mxu3 %vm148_vm5, %v5159_v47  ;;  %v3063_v47 = vmul.f32 %v4841_v0, %v5064_v48 }
0x10da   :  { %4029 = vmatmul.msk.f32.vlgmr.msrb.gmra.mxu3 %vm449_vm9, %v2945_v12 }
0x10de   :  { %v2979_v56 = vpop.permute.xlu1 %2978 }
0x10df   :  { %2999 = vmatpush.msra.mxu1 %v2979_v56  ;;  %v3379_v56 = vld [vmem:[#allocation2 + $0x68] sm:$0xff] }
0x10e0   :  { %4027 = vmatmul.msk.f32.vlgmr.msra.gmra.mxu1 %vm449_vm9, %v2943_v40  ;;  %v5482_v53 = vpack.i.bf16 %v3378_v3, %v3379_v56 }
0x10e1   :  { %4032 = vmatpush.xpose.msk.msrb.mxu1 %vm148_vm5, %v5126_v2 }
0x10e2   :  { %4037 = vmatmul.msk.f32.vlgmr.msra.gmra.mxu3 %vm148_vm5, %v3065_v23 }
0x10e8   :  { %4033 = vmatmul.msk.f32.vlgmr.msrb.gmra.mxu1 %vm148_vm5, %v3063_v47 }
0x1135   :  { %v2974_v27 = vpop.f32.mrf.mxu0 }
0x1136   :  { %v5437_v20 = vadd.f32 %v2974_v27, %v5368_v24 }
0x113d   :  { %v3086_v41 = vpop.f32.mrf.mxu0 }
0x113e   :  { %v3158_v63 = vmul.f32 0.35355338, %v3086_v41 }
0x1140   :  { %v3162_v49 = vadd.f32 %v3158_v63, %v4607_v44 }
0x1142   :  { %v3166_v14 = vsel %vm449_vm9, %v3162_v49, -inf }
0x1143   :  { %3167 = vmax.xlane.f32.xlu2 %v3166_v14 }
0x1153   :  { %v3028_v10 = vpop.f32.mrf.mxu2 }
0x1154   :  { %v5442_v2 = vadd.f32 %v3028_v10, %v5371_v1 }
0x115b   :  { %v3132_v45 = vpop.f32.mrf.mxu2 }
0x115c   :  { %v3160_v26 = vmul.f32 0.35355338, %v3132_v45 }
0x115d   :  { %v3001_v0 = vpop.f32.mrf.mxu1  ;;  %v3055_v48 = vpop.f32.mrf.mxu3 }
0x115e   :  { %v5445_v31 = vadd.f32 %v3001_v0, %v5376_v46  ;;  %v5448_v24 = vadd.f32 %v3055_v48, %v5379_v11  ;;  %v3164_v54 = vadd.f32 %v3160_v26, %v4613_v8 }
0x1160   :  { %v3172_v44 = vsel %vm449_vm9, %v3164_v54, -inf }
0x1161   :  { %3173 = vmax.xlane.f32.xlu1 %v3172_v44 }
0x1165   :  { %v3109_v34 = vpop.f32.mrf.mxu1  ;;  %v3155_v43 = vpop.f32.mrf.mxu3 }
0x1166   :  { %v3159_v25 = vmul.f32 0.35355338, %v3109_v34  ;;  %v3161_v1 = vmul.f32 0.35355338, %v3155_v43 }
0x1168   :  { %v3163_v30 = vadd.f32 %v3159_v25, %v4615_v57  ;;  %v3165_v32 = vadd.f32 %v3161_v1, %v4629_v19 }
0x116a   :  { %v3169_v50 = vsel %vm449_vm9, %v3163_v30, -inf  ;;  %v3175_v46 = vsel %vm449_vm9, %v3165_v32, -inf }
0x116b   :  { %3170 = vmax.xlane.f32.xlu0 %v3169_v50  ;;  %3176 = vmax.xlane.f32.xlu2 %v3175_v46 }
0x11b6   :  { %v3168_v11 = vpop.xlane.xlu2 %3167 }
0x11b7   :  { %v3178_v29 = vsub.f32 %v3162_v49, %v3168_v11 }
0x11b9   :  { %v3182_v8 = vmul.f32 1.442695, %v3178_v29 }
0x11bb   :  { %4349 = vpow2.f32 %v3182_v8 }
0x11c1   :  { %v5456_v59 = vpop.eup %4349 }
0x11c2   :  { %v3190_v38 = vsel %vm449_vm9, %v5456_v59, 0.0 }
0x11c3   :  { %3191 = vadd.xlane.f32.xlu0 %v3190_v38 }
0x11d4   :  { %v3174_v4 = vpop.xlane.xlu1 %3173 }
0x11d5   :  { %v3180_v57 = vsub.f32 %v3164_v54, %v3174_v4 }
0x11d7   :  { %v3186_v61 = vmul.f32 1.442695, %v3180_v57 }
0x11d9   :  { %4351 = vpow2.f32 %v3186_v61 }
0x11de   :  { %v3171_v19 = vpop.xlane.xlu0 %3170  ;;  %v3177_v36 = vpop.xlane.xlu2 %3176 }
0x11df   :  { %v4352_v42 = vpop.eup %4351  ;;  %v3179_v58 = vsub.f32 %v3163_v30, %v3171_v19  ;;  %v3181_v16 = vsub.f32 %v3165_v32, %v3177_v36 }
0x11e0   :  { %v3196_v21 = vsel %vm449_vm9, %v4352_v42, 0.0 }
0x11e1   :  { %v3184_v9 = vmul.f32 1.442695, %v3179_v58  ;;  %v3188_v39 = vmul.f32 1.442695, %v3181_v16  ;;  %3197 = vadd.xlane.f32.xlu2 %v3196_v21 }
0x11e3   :  { %4353 = vpow2.f32 %v3184_v9 }
0x11e4   :  { %4355 = vpow2.f32 %v3188_v39 }
0x11e9   :  { %v5461_v60 = vpop.eup %4353 }
0x11ea   :  { %v5463_v33 = vpop.eup %4355  ;;  %v3193_v51 = vsel %vm449_vm9, %v5461_v60, 0.0 }
0x11eb   :  { %3194 = vadd.xlane.f32.xlu1 %v3193_v51  ;;  %v3199_v37 = vsel %vm449_vm9, %v5463_v33, 0.0 }
0x11ec   :  { %3200 = vadd.xlane.f32.xlu0 %v3199_v37 }
0x11f9   :  { %4139 = vrot.lane.b32.xlu2 %v4138_v15, %s4424_s24  ;;  %v3381_v15 = vld [vmem:[#allocation2 + $0x78] sm:$0xff] }
0x11fa   :  { %v5484_v28 = vpack.i.bf16 %v3380_v7, %v3381_v15 }
0x1200   :  { %3348 = vrot.lane.b32.xlu0 %v3265_v6, %s4424_s24 }
0x1201   :  { %4144 = vrot.lane.b32.xlu2 %v5484_v28, %s4424_s24 }
0x1204   :  { %3267 = vrot.lane.b32.xlu1 %v3262_v18, %s4424_s24 }
0x120c   :  { %4149 = vrot.lane.b32.xlu1 %v5482_v53, %s4424_s24 }
0x1236   :  { %v5479_v12 = vpop.xlane.xlu0 %3191 }
0x1237   :  { %vm3207_vm14 = vweird.f32 %v5479_v12  ;;  %v3211_v21 = vand.u32 2147483647, %v5479_v12 }
0x1254   :  { %v3198_v35 = vpop.xlane.xlu2 %3197 }
0x1255   :  { %4357 = vrcp.f32 %v3198_v35  ;;  %v3241_v14 = vand.u32 2147483648, %v3198_v35  ;;  %v3239_v26 = vand.u32 2147483647, %v3198_v35  ;;  %vm3235_vm10 = vweird.f32 %v3198_v35 }
0x1256   :  { %4359 = vrcp.f32 %v5479_v12 }
0x1257   :  { %v3242_v48 = vor.u32 1.1754944e-38, %v3241_v14  ;;  %vm3240_vm12 = vcmp.eq.f32.partialorder %v3239_v26, 8.507059e+37  ;;  %v4195_v26 = vld [vmem:[#allocation2 + $0xcd] ss:$0 sm:$0xff] }
0x125b   :  { %v4358_v40 = vpop.eup %4357 }
0x125c   :  { %v5488_v55 = vpop.eup %4359  ;;  %v3231_v22 = vmul.f32 %v4358_v40, %v3198_v35  ;;  %v4140_v23 = vpop.permute.xlu2 %4139  ;;  %vm3236_vm8 = vweird.f32 %v4358_v40 }
0x125d   :  { %v4142_v47 = vunpack.i.h.bf16 %v4140_v23  ;;  %v4141_v27 = vunpack.i.l.bf16 %v4140_v23  ;;  %v3203_v49 = vmul.f32 %v5488_v55, %v5479_v12  ;;  %vm3237_vm11 = vmor %vm3235_vm10, %vm3236_vm8  ;;  %vm3208_vm1 = vweird.f32 %v5488_v55 }
0x125e   :  { %v3232_v41 = vsub.f32 1.0, %v3231_v22  ;;  %v3195_v63 = vpop.xlane.xlu1 %3194  ;;  %vm3209_vm8 = vmor %vm3207_vm14, %vm3208_vm1 }
0x125f   :  { %4361 = vrcp.f32 %v3195_v63  ;;  %v3201_v10 = vpop.xlane.xlu0 %3200  ;;  %3315 = vmatpush.msra.mxu1 %v4141_v27  ;;  %3342 = vmatpush.msrb.mxu2 %v4142_v47  ;;  %v3204_v54 = vsub.f32 1.0, %v3203_v49  ;;  %v3227_v11 = vand.u32 2147483648, %v3195_v63  ;;  %v3225_v38 = vand.u32 2147483647, %v3195_v63 }
0x1260   :  { %v3233_v45 = vmul.f32 %v4358_v40, %v3232_v41  ;;  %4363 = vrcp.f32 %v3201_v10  ;;  %v3255_v4 = vand.u32 2147483648, %v3201_v10  ;;  %v3253_v61 = vand.u32 2147483647, %v3201_v10 }
0x1261   :  { %v3205_v50 = vmul.f32 %v5488_v55, %v3204_v54  ;;  %vm3221_vm2 = vweird.f32 %v3195_v63  ;;  %v3228_v58 = vor.u32 1.1754944e-38, %v3227_v11  ;;  %vm3249_vm4 = vweird.f32 %v3201_v10 }
0x1262   :  { %v3234_v0 = vadd.f32 %v4358_v40, %v3233_v45  ;;  %vm3226_vm6 = vcmp.eq.f32.partialorder %v3225_v38, 8.507059e+37  ;;  %v3256_v39 = vor.u32 1.1754944e-38, %v3255_v4  ;;  %vm3254_vm10 = vcmp.eq.f32.partialorder %v3253_v61, 8.507059e+37 }
0x1263   :  { %v3206_v19 = vadd.f32 %v5488_v55, %v3205_v50 }
0x1264   :  { %v3238_v44 = vsel %vm3237_vm11, %v4358_v40, %v3234_v0  ;;  %vm3212_vm11 = vcmp.eq.f32.partialorder %v3211_v21, 8.507059e+37 }
0x1265   :  { %v4362_v34 = vpop.eup %4361  ;;  %v3243_v43 = vsel %vm3240_vm12, %v3242_v48, %v3238_v44  ;;  %v3210_v6 = vsel %vm3209_vm8, %v5488_v55, %v3206_v19  ;;  %v4145_v55 = vpop.permute.xlu2 %4144 }
0x1266   :  { %v4364_v25 = vpop.eup %4363  ;;  %v3217_v1 = vmul.f32 %v4362_v34, %v3195_v63  ;;  %v3260_v30 = vmul.f32 %v4352_v42, %v3243_v43  ;;  %vm3222_vm13 = vweird.f32 %v4362_v34  ;;  %v3213_v42 = vand.u32 2147483648, %v5479_v12 }
0x1267   :  { %v3245_v32 = vmul.f32 %v4364_v25, %v3201_v10  ;;  %vm3250_vm15 = vweird.f32 %v4364_v25  ;;  %vm3223_vm3 = vmor %vm3221_vm2, %vm3222_vm13  ;;  %v4147_v22 = vunpack.i.h.bf16 %v4145_v55 }
0x1268   :  { %v3218_v46 = vsub.f32 1.0, %v3217_v1  ;;  %4040 = vmatmul.msk.f32.vlgmr.msrb.gmra.mxu2 %vm449_vm9, %v3260_v30  ;;  %vm3251_vm7 = vmor %vm3249_vm4, %vm3250_vm15  ;;  %v3214_v3 = vor.u32 1.1754944e-38, %v3213_v42 }
0x1269   :  { %v3246_v29 = vsub.f32 1.0, %v3245_v32 }
0x126a   :  { %v3219_v8 = vmul.f32 %v4362_v34, %v3218_v46  ;;  %v3215_v15 = vsel %vm3212_vm11, %v3214_v3, %v3210_v6  ;;  %v3547_v6 = vld [vmem:[#allocation2 + $0xb0] sm:$0xff] }
0x126b   :  { %v3247_v57 = vmul.f32 %v4364_v25, %v3246_v29  ;;  %v3258_v40 = vmul.f32 %v5456_v59, %v3215_v15 }
0x126c   :  { %v3220_v36 = vadd.f32 %v4362_v34, %v3219_v8 }
0x126d   :  { %v3248_v16 = vadd.f32 %v4364_v25, %v3247_v57 }
0x126e   :  { %v3224_v9 = vsel %vm3223_vm3, %v4362_v34, %v3220_v36 }
0x126f   :  { %v3229_v51 = vsel %vm3226_vm6, %v3228_v58, %v3224_v9  ;;  %v3252_v37 = vsel %vm3251_vm7, %v4364_v25, %v3248_v16 }
0x1270   :  { %v3257_v18 = vsel %vm3254_vm10, %v3256_v39, %v3252_v37  ;;  %v3259_v35 = vmul.f32 %v5461_v60, %v3229_v51  ;;  %v4146_v60 = vunpack.i.l.bf16 %v4145_v55  ;;  %v3548_v37 = vld [vmem:[#allocation2 + $0xb8] sm:$0xff] }
0x1271   :  { %v3261_v56 = vmul.f32 %v5463_v33, %v3257_v18  ;;  %3575 = vmatpush.msrb.mxu1 %v3548_v37  ;;  %v3546_v18 = vld [vmem:[#allocation2 + $0xa8] sm:$0xff] }
0x1272   :  { %v3349_v7 = vpop.permute.xlu0 %3348  ;;  %4039 = vmatmul.msk.f32.vlgmr.msra.gmra.mxu1 %vm449_vm9, %v3259_v35  ;;  %v3545_v35 = vld [vmem:[#allocation2 + $0xa0] sm:$0xff] }
0x1273   :  { %3369 = vmatpush.msrb.mxu3 %v3349_v7  ;;  %3576 = vmatpush.msrb.mxu1 %v3547_v6 }
0x1274   :  { %4041 = vmatmul.msk.f32.vlgmr.msrb.gmra.mxu3 %vm449_vm9, %v3261_v56 }
0x1275   :  { %3577 = vmatpush.msrb.mxu1 %v3546_v18 }
0x1276   :  { %v3268_v12 = vpop.permute.xlu1 %3267 }
0x1277   :  { %3288 = vmatpush.msra.mxu0 %v3268_v12  ;;  %3578 = vmatpush.msrb.mxu1 %v3545_v35 }
0x1278   :  { %4038 = vmatmul.msk.f32.vlgmr.msra.gmra.mxu0 %vm449_vm9, %v3258_v40 }
0x1279   :  { %3424 = vmatpush.msrb.mxu0 %v4146_v60  ;;  %v3634_v60 = vld [vmem:[#allocation2 + $0x30] sm:$0xff] }
0x127b   :  { %3425 = vmatpush.msrb.mxu0 %v4147_v22 }
0x127e   :  { %v4150_v23 = vpop.permute.xlu1 %4149 }
0x127f   :  { %v4152_v33 = vunpack.i.h.bf16 %v4150_v23  ;;  %v4151_v47 = vunpack.i.l.bf16 %v4150_v23  ;;  %v3635_v23 = vld [vmem:[#allocation2 + $0x38] sm:$0xff] }
0x1281   :  { %3426 = vmatpush.msrb.mxu0 %v4151_v47  ;;  %v4153_v47 = vpack.i.bf16 %v3634_v60, %v3635_v23 }
0x1283   :  { %3427 = vmatpush.msrb.mxu0 %v4152_v33 }
0x12eb   :  { %v3344_v49 = vpop.f32.mrf.mxu2 }
0x12ec   :  { %v3376_v14 = vadd.f32 %v3344_v49, %v5442_v2 }
0x12ef   :  { %v3317_v63 = vpop.f32.mrf.mxu1 }
0x12f0   :  { %v3375_v59 = vadd.f32 %v3317_v63, %v5445_v31 }
0x12f5   :  { %v3290_v27 = vpop.f32.mrf.mxu0 }
0x12f6   :  { %v3374_v41 = vadd.f32 %v3290_v27, %v5437_v20  ;;  %v3632_v27 = vld [vmem:[#allocation2 + $0x20] sm:$0xff] }
0x12f7   :  { %v3371_v10 = vpop.f32.mrf.mxu3 }
0x12f8   :  { %4042 = vmatmul.msk.f32.vlgmr.msrb.gmra.mxu0 %vm148_vm5, %v3374_v41  ;;  %v3377_v45 = vadd.f32 %v3371_v10, %v5448_v24  ;;  %v3633_v41 = vld [vmem:[#allocation2 + $0x28] sm:$0xff] }
0x12f9   :  { %v4158_v49 = vpack.i.bf16 %v3632_v27, %v3633_v41 }
0x1300   :  { %4043 = vmatmul.msk.f32.gmra.mxu0 %vm148_vm5, %v3375_v59 }
0x1308   :  { %4044 = vmatmul.msk.f32.gmra.mxu0 %vm148_vm5, %v3376_v14 }
0x1310   :  { %4045 = vmatmul.msk.f32.gmra.mxu0 %vm148_vm5, %v3377_v45 }
0x1375   :  { %v3429_v0 = vpop.f32.mrf.mxu0 }
0x1376   :  { %v3430_v20 = vadd.f32 %v4195_v26, %v3429_v0  ;;  %v4196_v0 = vld [vmem:[#allocation2 + $0xce] ss:$0 sm:$0xff] }
0x1378   :  { %v3441_v48 = vadd.f32 %v3430_v20, %v5041_v5 }
0x137a   :  { %v3447_v54 = vsel %vm148_vm5, %v3441_v48, 0.0 }
0x137b   :  { %3448 = vadd.xlane.f32.xlu0 %v3447_v54  ;;  %v3628_v54 = vld [vmem:[#allocation2] sm:$0xff] }
0x137d   :  { %v3432_v31 = vpop.f32.mrf.mxu0 }
0x137e   :  { %v3433_v44 = vadd.f32 %v4195_v26, %v3432_v31  ;;  %v3629_v31 = vld [vmem:[#allocation2 + $0x8] sm:$0xff] }
0x1380   :  { %v3442_v34 = vadd.f32 %v3433_v44, %v5046_v62 }
0x1382   :  { %v3450_v2 = vsel %vm148_vm5, %v3442_v34, 0.0 }
0x1383   :  { %3451 = vadd.xlane.f32.xlu2 %v3450_v2  ;;  %v4168_v2 = vpack.i.bf16 %v3628_v54, %v3629_v31 }
0x1385   :  { %v3435_v43 = vpop.f32.mrf.mxu0 }
0x1386   :  { %v3436_v25 = vadd.f32 %v4195_v26, %v3435_v43  ;;  %v3630_v43 = vld [vmem:[#allocation2 + $0x10] sm:$0xff] }
0x1388   :  { %v3443_v24 = vadd.f32 %v3436_v25, %v5051_v13  ;;  %v3631_v25 = vld [vmem:[#allocation2 + $0x18] sm:$0xff] }
0x138a   :  { %v3453_v1 = vsel %vm148_vm5, %v3443_v24, 0.0 }
0x138b   :  { %3454 = vadd.xlane.f32.xlu1 %v3453_v1  ;;  %v4197_v1 = vld [vmem:[#allocation2 + $0xcf] ss:$0 sm:$0xff] }
0x138d   :  { %v3438_v30 = vpop.f32.mrf.mxu0 }
0x138e   :  { %v3439_v32 = vadd.f32 %v4195_v26, %v3438_v30  ;;  %v4163_v30 = vpack.i.bf16 %v3630_v43, %v3631_v25 }
0x1390   :  { %v3444_v5 = vadd.f32 %v3439_v32, %v5056_v17 }
0x1392   :  { %v3456_v50 = vsel %vm148_vm5, %v3444_v5, 0.0 }
0x1393   :  { %3457 = vadd.xlane.f32.xlu0 %v3456_v50 }
0x13ee   :  { %v3449_v46 = vpop.xlane.xlu0 %3448 }
0x13ef   :  { %v3459_v62 = vmul.f32 %v3449_v46, %v4486_v52 }
0x13f1   :  { %v5527_v11 = vsub.f32 %v3441_v48, %v3459_v62 }
0x13f3   :  { %v3467_v29 = vmul.f32 %v5527_v11, %v5527_v11 }
0x13f5   :  { %v3471_v13 = vsel %vm148_vm5, %v3467_v29, 0.0 }
0x13f6   :  { %v3452_v8 = vpop.xlane.xlu2 %3451  ;;  %3472 = vadd.xlane.f32.xlu2 %v3471_v13 }
0x13f7   :  { %v3460_v38 = vmul.f32 %v3452_v8, %v4486_v52 }
0x13f9   :  { %v5533_v4 = vsub.f32 %v3442_v34, %v3460_v38 }
0x13fb   :  { %v3468_v17 = vmul.f32 %v5533_v4, %v5533_v4 }
0x13fd   :  { %v3474_v57 = vsel %vm148_vm5, %v3468_v17, 0.0 }
0x13fe   :  { %v3455_v61 = vpop.xlane.xlu1 %3454  ;;  %3475 = vadd.xlane.f32.xlu1 %v3474_v57 }
0x13ff   :  { %v3461_v19 = vmul.f32 %v3455_v61, %v4486_v52 }
0x1401   :  { %v5539_v36 = vsub.f32 %v3443_v24, %v3461_v19 }
0x1403   :  { %v3469_v42 = vmul.f32 %v5539_v36, %v5539_v36 }
0x1405   :  { %v3477_v58 = vsel %vm148_vm5, %v3469_v42, 0.0 }
0x1406   :  { %3478 = vadd.xlane.f32.xlu0 %v3477_v58  ;;  %v3458_v16 = vpop.xlane.xlu0 %3457 }
0x1407   :  { %v3462_v21 = vmul.f32 %v3458_v16, %v4486_v52 }
0x1409   :  { %v5545_v9 = vsub.f32 %v3444_v5, %v3462_v21 }
0x140b   :  { %v3470_v39 = vmul.f32 %v5545_v9, %v5545_v9 }
0x140d   :  { %v3480_v51 = vsel %vm148_vm5, %v3470_v39, 0.0 }
0x140e   :  { %3481 = vadd.xlane.f32.xlu2 %v3480_v51 }
0x1417   :  { %4154 = vrot.lane.b32.xlu1 %v4153_v47, %s4424_s24 }
0x141a   :  { %4159 = vrot.lane.b32.xlu0 %v4158_v49, %s4424_s24 }
0x1422   :  { %4169 = vrot.lane.b32.xlu0 %v4168_v2, %s4424_s24 }
0x1426   :  { %4164 = vrot.lane.b32.xlu2 %v4163_v30, %s4424_s24 }
0x1469   :  { %v3473_v3 = vpop.xlane.xlu2 %3472 }
0x146a   :  { %v3483_v56 = vmul.f32 %v3473_v3, %v4486_v52 }
0x146c   :  { %v3487_v7 = vadd.f32 1e-12, %v3483_v56 }
0x146e   :  { %4365 = vrsqrt.f32 %v3487_v7  ;;  %vm3497_vm12 = vweird.f32 %v3487_v7 }
0x1471   :  { %v3476_v15 = vpop.xlane.xlu1 %3475 }
0x1472   :  { %v3484_v12 = vmul.f32 %v3476_v15, %v4486_v52 }
0x1474   :  { %v4366_v40 = vpop.eup %4365  ;;  %v3488_v55 = vadd.f32 1e-12, %v3484_v12 }
0x1475   :  { %v3492_v22 = vmul.f32 %v4366_v40, %v3487_v7  ;;  %vm3498_vm9 = vweird.f32 %v4366_v40 }
0x1476   :  { %4367 = vrsqrt.f32 %v3488_v55  ;;  %vm3499_vm13 = vmor %vm3497_vm12, %vm3498_vm9  ;;  %vm3507_vm15 = vweird.f32 %v3488_v55 }
0x1477   :  { %v3493_v33 = vmul.f32 %v4366_v40, %v3492_v22 }
0x1479   :  { %v3494_v63 = vmul.f32 0.5, %v3493_v33  ;;  %v3479_v59 = vpop.xlane.xlu0 %3478 }
0x147a   :  { %v3485_v14 = vmul.f32 %v3479_v59, %v4486_v52 }
0x147b   :  { %v3495_v10 = vsub.f32 1.5, %v3494_v63 }
0x147c   :  { %v4368_v45 = vpop.eup %4367  ;;  %v3489_v26 = vadd.f32 1e-12, %v3485_v14  ;;  %v4198_v14 = vld [vmem:[#allocation2 + $0xd0] ss:$0 sm:$0xff] }
0x147d   :  { %v3496_v20 = vmul.f32 %v4366_v40, %v3495_v10  ;;  %v3502_v48 = vmul.f32 %v4368_v45, %v3488_v55  ;;  %vm3508_vm14 = vweird.f32 %v4368_v45 }
0x147e   :  { %4369 = vrsqrt.f32 %v3489_v26  ;;  %vm3509_vm1 = vmor %vm3507_vm15, %vm3508_vm14  ;;  %vm3517_vm3 = vweird.f32 %v3489_v26 }
0x147f   :  { %v3500_v44 = vsel %vm3499_vm13, %v4366_v40, %v3496_v20  ;;  %v3503_v34 = vmul.f32 %v4368_v45, %v3502_v48 }
0x1480   :  { %v3531_v24 = vmul.f32 %v3500_v44, %v5527_v11 }
0x1481   :  { %v3504_v32 = vmul.f32 0.5, %v3503_v34  ;;  %v3482_v5 = vpop.xlane.xlu2 %3481 }
0x1482   :  { %v3536_v50 = vmul.f32 %v4196_v0, %v3531_v24  ;;  %v3486_v46 = vmul.f32 %v3482_v5, %v4486_v52 }
0x1483   :  { %v3505_v62 = vsub.f32 1.5, %v3504_v32 }
0x1484   :  { %v4370_v29 = vpop.eup %4369  ;;  %v3490_v13 = vadd.f32 1e-12, %v3486_v46  ;;  %v5559_v8 = vadd.f32 %v4197_v1, %v3536_v50 }
0x1485   :  { %v3506_v38 = vmul.f32 %v4368_v45, %v3505_v62  ;;  %v3512_v11 = vmul.f32 %v4370_v29, %v3489_v26  ;;  %vm3518_vm2 = vweird.f32 %v4370_v29 }
0x1486   :  { %4371 = vrsqrt.f32 %v3490_v13  ;;  %4046 = vmatmul.msk.f32.vlgmr.msrb.gmra.mxu1 %vm148_vm5, %v5559_v8  ;;  %vm3519_vm4 = vmor %vm3517_vm3, %vm3518_vm2  ;;  %vm3527_vm7 = vweird.f32 %v3490_v13 }
0x1487   :  { %v3510_v17 = vsel %vm3509_vm1, %v4368_v45, %v3506_v38  ;;  %v3513_v57 = vmul.f32 %v4370_v29, %v3512_v11 }
0x1488   :  { %v3532_v61 = vmul.f32 %v3510_v17, %v5533_v4 }
0x1489   :  { %v3514_v19 = vmul.f32 0.5, %v3513_v57  ;;  %v4165_v27 = vpop.permute.xlu2 %4164 }
0x148a   :  { %v3537_v42 = vmul.f32 %v4196_v0, %v3532_v61  ;;  %v4166_v41 = vunpack.i.l.bf16 %v4165_v27  ;;  %v4167_v63 = vunpack.i.h.bf16 %v4165_v27 }
0x148b   :  { %v3515_v58 = vsub.f32 1.5, %v3514_v19 }
0x148c   :  { %v4372_v16 = vpop.eup %4371  ;;  %v5564_v21 = vadd.f32 %v4197_v1, %v3537_v42  ;;  %v4160_v23 = vpop.permute.xlu0 %4159 }
0x148d   :  { %v3516_v39 = vmul.f32 %v4370_v29, %v3515_v58  ;;  %v3522_v51 = vmul.f32 %v4372_v16, %v3490_v13  ;;  %vm3528_vm6 = vweird.f32 %v4372_v16  ;;  %v4161_v33 = vunpack.i.l.bf16 %v4160_v23 }
0x148e   :  { %4047 = vmatmul.msk.f32.gmra.mxu1 %vm148_vm5, %v5564_v21  ;;  %vm3529_vm8 = vmor %vm3527_vm7, %vm3528_vm6  ;;  %v4162_v47 = vunpack.i.h.bf16 %v4160_v23  ;;  %vm3822_vm6 = vcmask 1041409   ;;  %vm3825_vm7 = vcmask 1042434  }
0x148f   :  { %v3520_v37 = vsel %vm3519_vm4, %v4370_v29, %v3516_v39  ;;  %v3523_v6 = vmul.f32 %v4372_v16, %v3522_v51 }
0x1490   :  { %v3533_v18 = vmul.f32 %v3520_v37, %v5539_v36  ;;  %v4155_v36 = vpop.permute.xlu1 %4154 }
0x1491   :  { %v3524_v35 = vmul.f32 0.5, %v3523_v6  ;;  %v4156_v22 = vunpack.i.l.bf16 %v4155_v36  ;;  %v4157_v60 = vunpack.i.h.bf16 %v4155_v36  ;;  %v4199_v36 = vld [vmem:[#allocation2 + $0xd1] ss:$0 sm:$0xff] }
0x1492   :  { %v3538_v4 = vmul.f32 %v4196_v0, %v3533_v18 }
0x1493   :  { %v3525_v3 = vsub.f32 1.5, %v3524_v35  ;;  %3690 = vmatpush.msra.mxu2 %v4156_v22 }
0x1494   :  { %v5569_v56 = vadd.f32 %v4197_v1, %v3538_v4 }
0x1495   :  { %v3526_v7 = vmul.f32 %v4372_v16, %v3525_v3  ;;  %3691 = vmatpush.msra.mxu2 %v4157_v60 }
0x1496   :  { %4048 = vmatmul.msk.f32.gmra.mxu1 %vm148_vm5, %v5569_v56 }
0x1497   :  { %v3530_v15 = vsel %vm3529_vm8, %v4372_v16, %v3526_v7  ;;  %3692 = vmatpush.msra.mxu2 %v4161_v33  ;;  %vm3828_vm8 = vcmask 1043459  }
0x1498   :  { %v3534_v12 = vmul.f32 %v3530_v15, %v5545_v9  ;;  %v4170_v9 = vpop.permute.xlu0 %4169 }
0x1499   :  { %3693 = vmatpush.msra.mxu2 %v4162_v47  ;;  %v4171_v59 = vunpack.i.l.bf16 %v4170_v9  ;;  %v4172_v49 = vunpack.i.h.bf16 %v4170_v9 }
0x149a   :  { %v3539_v40 = vmul.f32 %v4196_v0, %v3534_v12 }
0x149b   :  { %3694 = vmatpush.msra.mxu2 %v4166_v41 }
0x149c   :  { %v5574_v55 = vadd.f32 %v4197_v1, %v3539_v40 }
0x149d   :  { %3695 = vmatpush.msra.mxu2 %v4167_v63 }
0x149e   :  { %4049 = vmatmul.msk.f32.gmra.mxu1 %vm148_vm5, %v5574_v55 }
0x149f   :  { %3696 = vmatpush.msra.mxu2 %v4171_v59 }
0x14a1   :  { %3697 = vmatpush.msra.mxu2 %v4172_v49 }
0x1503   :  { %v3580_v10 = vpop.f32.mrf.mxu1 }
0x1504   :  { %v3581_v45 = vadd.f32 %v4198_v14, %v3580_v10 }
0x1506   :  { %v3592_v26 = vmul.f32 %v3581_v45, %v3581_v45 }
0x1508   :  { %v3596_v0 = vmul.f32 %v3592_v26, %v3581_v45 }
0x150a   :  { %v3600_v20 = vmul.f32 0.044715, %v3596_v0 }
0x150b   :  { %v3583_v48 = vpop.f32.mrf.mxu1 }
0x150c   :  { %v3604_v54 = vadd.f32 %v3600_v20, %v3581_v45  ;;  %v3584_v31 = vadd.f32 %v4198_v14, %v3583_v48 }
0x150e   :  { %v3608_v44 = vmul.f32 0.7978846, %v3604_v54  ;;  %v3593_v34 = vmul.f32 %v3584_v31, %v3584_v31 }
0x1510   :  { %4373 = vtanh.f32 %v3608_v44  ;;  %v3597_v2 = vmul.f32 %v3593_v34, %v3584_v31 }
0x1512   :  { %v3601_v43 = vmul.f32 0.044715, %v3597_v2 }
0x1513   :  { %v3586_v25 = vpop.f32.mrf.mxu1 }
0x1514   :  { %v3605_v24 = vadd.f32 %v3601_v43, %v3584_v31  ;;  %v3587_v1 = vadd.f32 %v4198_v14, %v3586_v25 }
0x1516   :  { %v4374_v30 = vpop.eup %4373  ;;  %v3594_v32 = vmul.f32 %v3587_v1, %v3587_v1  ;;  %v3609_v5 = vmul.f32 0.7978846, %v3605_v24 }
0x1517   :  { %v3616_v50 = vadd.f32 1.0, %v4374_v30 }
0x1518   :  { %v3598_v46 = vmul.f32 %v3594_v32, %v3587_v1  ;;  %4375 = vtanh.f32 %v3609_v5 }
0x1519   :  { %v3620_v62 = vmul.f32 0.5, %v3616_v50 }
0x151a   :  { %v3602_v29 = vmul.f32 0.044715, %v3598_v46 }
0x151b   :  { %v3624_v13 = vmul.f32 %v3620_v62, %v3581_v45  ;;  %v3589_v38 = vpop.f32.mrf.mxu1 }
0x151c   :  { %v3606_v11 = vadd.f32 %v3602_v29, %v3587_v1  ;;  %v3590_v17 = vadd.f32 %v4198_v14, %v3589_v38 }
0x151d   :  { %4050 = vmatmul.msk.f32.vlgmr.msra.gmra.mxu2 %vm90_vm0, %v3624_v13 }
0x151e   :  { %v4376_v57 = vpop.eup %4375  ;;  %v3595_v61 = vmul.f32 %v3590_v17, %v3590_v17  ;;  %v3610_v19 = vmul.f32 0.7978846, %v3606_v11 }
0x151f   :  { %v3617_v42 = vadd.f32 1.0, %v4376_v57 }
0x1520   :  { %v3599_v58 = vmul.f32 %v3595_v61, %v3590_v17  ;;  %4377 = vtanh.f32 %v3610_v19 }
0x1521   :  { %v3621_v16 = vmul.f32 0.5, %v3617_v42 }
0x1522   :  { %v3603_v39 = vmul.f32 0.044715, %v3599_v58 }
0x1523   :  { %v3625_v51 = vmul.f32 %v3621_v16, %v3584_v31 }
0x1524   :  { %v3607_v37 = vadd.f32 %v3603_v39, %v3590_v17 }
0x1525   :  { %4051 = vmatmul.msk.f32.gmra.mxu2 %vm90_vm0, %v3625_v51 }
0x1526   :  { %v4378_v6 = vpop.eup %4377  ;;  %v3611_v18 = vmul.f32 0.7978846, %v3607_v37 }
0x1527   :  { %v3618_v35 = vadd.f32 1.0, %v4378_v6 }
0x1528   :  { %4379 = vtanh.f32 %v3611_v18 }
0x1529   :  { %v3622_v4 = vmul.f32 0.5, %v3618_v35 }
0x152b   :  { %v3626_v3 = vmul.f32 %v3622_v4, %v3587_v1 }
0x152d   :  { %4052 = vmatmul.msk.f32.gmra.mxu2 %vm90_vm0, %v3626_v3 }
0x152e   :  { %v4380_v7 = vpop.eup %4379 }
0x152f   :  { %v3619_v15 = vadd.f32 1.0, %v4380_v7 }
0x1531   :  { %v3623_v12 = vmul.f32 0.5, %v3619_v15 }
0x1533   :  { %v3627_v40 = vmul.f32 %v3623_v12, %v3590_v17 }
0x1535   :  { %4053 = vmatmul.msk.f32.gmra.mxu2 %vm90_vm0, %v3627_v40 }
0x15a0   :  { %v3699_v22 = vpop.f32.mrf.mxu2 }
0x15a1   :  { %v3700_v60 = vadd.f32 %v4199_v36, %v3699_v22 }
0x15a3   :  { %v3711_v23 = vadd.f32 %v3700_v60, %v5559_v8 }
0x15a5   :  { %v3717_v33 = vsel %vm148_vm5, %v3711_v23, 0.0 }
0x15a6   :  { %3718 = vadd.xlane.f32.xlu2 %v3717_v33 }
0x15a8   :  { %v3702_v47 = vpop.f32.mrf.mxu2 }
0x15a9   :  { %v3703_v27 = vadd.f32 %v4199_v36, %v3702_v47 }
0x15ab   :  { %v3712_v41 = vadd.f32 %v3703_v27, %v5564_v21 }
0x15ad   :  { %v3720_v63 = vsel %vm148_vm5, %v3712_v41, 0.0 }
0x15ae   :  { %3721 = vadd.xlane.f32.xlu1 %v3720_v63 }
0x15b0   :  { %v3705_v9 = vpop.f32.mrf.mxu2 }
0x15b1   :  { %v3706_v59 = vadd.f32 %v4199_v36, %v3705_v9 }
0x15b3   :  { %v3713_v49 = vadd.f32 %v3706_v59, %v5569_v56 }
0x15b5   :  { %v3723_v14 = vsel %vm148_vm5, %v3713_v49, 0.0 }
0x15b6   :  { %3724 = vadd.xlane.f32.xlu0 %v3723_v14 }
0x15b8   :  { %v3708_v10 = vpop.f32.mrf.mxu2 }
0x15b9   :  { %v3709_v45 = vadd.f32 %v4199_v36, %v3708_v10 }
0x15bb   :  { %v3714_v8 = vadd.f32 %v3709_v45, %v5574_v55 }
0x15bd   :  { %v3726_v26 = vsel %vm148_vm5, %v3714_v8, 0.0 }
0x15be   :  { %3727 = vadd.xlane.f32.xlu1 %v3726_v26 }
0x1619   :  { %v3719_v0 = vpop.xlane.xlu2 %3718 }
0x161a   :  { %v3729_v21 = vmul.f32 %v3719_v0, %v4486_v52 }
0x161c   :  { %v5591_v20 = vsub.f32 %v3711_v23, %v3729_v21 }
0x161e   :  { %v3737_v48 = vmul.f32 %v5591_v20, %v5591_v20 }
0x1620   :  { %v3741_v56 = vsel %vm148_vm5, %v3737_v48, 0.0 }
0x1621   :  { %v3722_v54 = vpop.xlane.xlu1 %3721  ;;  %3742 = vadd.xlane.f32.xlu1 %v3741_v56 }
0x1622   :  { %v3730_v31 = vmul.f32 %v3722_v54, %v4486_v52 }
0x1624   :  { %v5597_v44 = vsub.f32 %v3712_v41, %v3730_v31  ;;  %v4201_v31 = vld [vmem:[#allocation2 + $0xd3] ss:$0 sm:$0xff] }
0x1626   :  { %v3738_v55 = vmul.f32 %v5597_v44, %v5597_v44 }
0x1628   :  { %v3744_v34 = vsel %vm148_vm5, %v3738_v55, 0.0 }
0x1629   :  { %v3725_v2 = vpop.xlane.xlu0 %3724  ;;  %3745 = vadd.xlane.f32.xlu0 %v3744_v34 }
0x162a   :  { %v3731_v43 = vmul.f32 %v3725_v2, %v4486_v52 }
0x162c   :  { %v5603_v25 = vsub.f32 %v3713_v49, %v3731_v43 }
0x162e   :  { %v3739_v24 = vmul.f32 %v5603_v25, %v5603_v25 }
0x1630   :  { %v3747_v1 = vsel %vm148_vm5, %v3739_v24, 0.0 }
0x1631   :  { %v3728_v30 = vpop.xlane.xlu1 %3727  ;;  %3748 = vadd.xlane.f32.xlu2 %v3747_v1 }
0x1632   :  { %v3732_v32 = vmul.f32 %v3728_v30, %v4486_v52 }
0x1634   :  { %v5609_v5 = vsub.f32 %v3714_v8, %v3732_v32  ;;  %v4200_v8 = vld [vmem:[#allocation2 + $0xd2] ss:$0 sm:$0xff] }
0x1636   :  { %v3740_v50 = vmul.f32 %v5609_v5, %v5609_v5 }
0x1638   :  { %v3750_v46 = vsel %vm148_vm5, %v3740_v50, 0.0 }
0x1639   :  { %3751 = vadd.xlane.f32.xlu0 %v3750_v46 }
0x163a   :  { %4179 = vrot.lane.b32.xlu1 %v5482_v53, %s4420_s0 }
0x1649   :  { %4174 = vrot.lane.b32.xlu2 %v5484_v28, %s4420_s0 }
0x1694   :  { %v3743_v62 = vpop.xlane.xlu1 %3742 }
0x1695   :  { %v3753_v29 = vmul.f32 %v3743_v62, %v4486_v52 }
0x1697   :  { %v3757_v13 = vadd.f32 1e-12, %v3753_v29 }
0x1699   :  { %4381 = vrsqrt.f32 %v3757_v13  ;;  %vm3767_vm15 = vweird.f32 %v3757_v13 }
0x169c   :  { %v3746_v38 = vpop.xlane.xlu0 %3745 }
0x169d   :  { %v3754_v11 = vmul.f32 %v3746_v38, %v4486_v52  ;;  %v4202_v38 = vld [vmem:[#allocation2 + $0xc3] ss:$0 sm:$0xff] }
0x169f   :  { %v3758_v17 = vadd.f32 1e-12, %v3754_v11  ;;  %v4382_v61 = vpop.eup %4381 }
0x16a0   :  { %v3762_v53 = vmul.f32 %v4382_v61, %v3757_v13  ;;  %vm3768_vm12 = vweird.f32 %v4382_v61 }
0x16a1   :  { %4383 = vrsqrt.f32 %v3758_v17  ;;  %vm3777_vm10 = vweird.f32 %v3758_v17  ;;  %vm3769_vm1 = vmor %vm3767_vm15, %vm3768_vm12 }
0x16a2   :  { %v3763_v39 = vmul.f32 %v4382_v61, %v3762_v53 }
0x16a4   :  { %v3749_v57 = vpop.xlane.xlu2 %3748  ;;  %v3764_v36 = vmul.f32 0.5, %v3763_v39 }
0x16a5   :  { %v3755_v19 = vmul.f32 %v3749_v57, %v4486_v52 }
0x16a6   :  { %v3765_v47 = vsub.f32 1.5, %v3764_v36 }
0x16a7   :  { %v4384_v42 = vpop.eup %4383  ;;  %v3759_v58 = vadd.f32 1e-12, %v3755_v19 }
0x16a8   :  { %v3772_v16 = vmul.f32 %v4384_v42, %v3758_v17  ;;  %vm3778_vm0 = vweird.f32 %v4384_v42  ;;  %v3766_v9 = vmul.f32 %v4382_v61, %v3765_v47 }
0x16a9   :  { %4385 = vrsqrt.f32 %v3759_v58  ;;  %vm3779_vm11 = vmor %vm3777_vm10, %vm3778_vm0  ;;  %vm3787_vm13 = vweird.f32 %v3759_v58  ;;  %vm3872_vm0 = vcmask 254976   ;;  %vm3879_vm10 = vcmask 256001  }
0x16aa   :  { %v3773_v28 = vmul.f32 %v4384_v42, %v3772_v16  ;;  %v3770_v0 = vsel %vm3769_vm1, %v4382_v61, %v3766_v9 }
0x16ab   :  { %v3801_v55 = vmul.f32 %v3770_v0, %v5591_v20 }
0x16ac   :  { %v3774_v51 = vmul.f32 0.5, %v3773_v28  ;;  %v3752_v37 = vpop.xlane.xlu0 %3751  ;;  %v4175_v6 = vpop.permute.xlu2 %4174 }
0x16ad   :  { %v3756_v18 = vmul.f32 %v3752_v37, %v4486_v52  ;;  %v4177_v35 = vunpack.i.h.bf16 %v4175_v6  ;;  %v4176_v4 = vunpack.i.l.bf16 %v4175_v6  ;;  %v4180_v3 = vpop.permute.xlu1 %4179  ;;  %v3806_v24 = vmul.f32 %v4200_v8, %v3801_v55 }
0x16ae   :  { %v3775_v7 = vsub.f32 1.5, %v3774_v51  ;;  %v4181_v40 = vunpack.i.l.bf16 %v4180_v3  ;;  %v4182_v60 = vunpack.i.h.bf16 %v4180_v3 }
0x16af   :  { %v4386_v15 = vpop.eup %4385  ;;  %v3760_v12 = vadd.f32 1e-12, %v3756_v18  ;;  %3856 = vmatpush.msra.mxu3 %v4176_v4  ;;  %v3811_v50 = vadd.f32 %v4201_v31, %v3806_v24 }
0x16b0   :  { %v3782_v22 = vmul.f32 %v4386_v15, %v3759_v58  ;;  %v3776_v23 = vmul.f32 %v4384_v42, %v3775_v7  ;;  %vm3788_vm9 = vweird.f32 %v4386_v15 }
0x16b1   :  { %4387 = vrsqrt.f32 %v3760_v12  ;;  %3857 = vmatpush.msra.mxu3 %v4177_v35  ;;  %vm3789_vm14 = vmor %vm3787_vm13, %vm3788_vm9  ;;  %vm3797_vm3 = vweird.f32 %v3760_v12 }
0x16b2   :  { %v3783_v33 = vmul.f32 %v4386_v15, %v3782_v22  ;;  %v3780_v27 = vsel %vm3779_vm11, %v4384_v42, %v3776_v23 }
0x16b3   :  { %3858 = vmatpush.msra.mxu3 %v4181_v40  ;;  %v3802_v14 = vmul.f32 %v3780_v27, %v5597_v44 }
0x16b4   :  { %v3784_v52 = vmul.f32 0.5, %v3783_v33 }
0x16b5   :  { %3859 = vmatpush.msra.mxu3 %v4182_v60  ;;  %v3807_v48 = vmul.f32 %v4200_v8, %v3802_v14 }
0x16b6   :  { %v3785_v41 = vsub.f32 1.5, %v3784_v52 }
0x16b7   :  { %v4388_v63 = vpop.eup %4387  ;;  %v3812_v44 = vadd.f32 %v4201_v31, %v3807_v48 }
0x16b8   :  { %v3786_v59 = vmul.f32 %v4386_v15, %v3785_v41  ;;  %v3792_v49 = vmul.f32 %v4388_v63, %v3760_v12  ;;  %vm3798_vm2 = vweird.f32 %v4388_v63 }
0x16b9   :  { %vm3799_vm4 = vmor %vm3797_vm3, %vm3798_vm2  ;;  %v3821_v30 = vrot.slane %v3812_v44, 7 }
0x16ba   :  { %v3790_v10 = vsel %vm3789_vm14, %v4386_v15, %v3786_v59  ;;  %v3793_v45 = vmul.f32 %v4388_v63, %v3792_v49 }
0x16bb   :  { %v3803_v26 = vmul.f32 %v3790_v10, %v5603_v25  ;;  %v3823_v62 = vsel %vm3822_vm6, %v3821_v30, %v3811_v50 }
0x16bc   :  { %v3794_v21 = vmul.f32 0.5, %v3793_v45 }
0x16bd   :  { %v3808_v56 = vmul.f32 %v4200_v8, %v3803_v26 }
0x16be   :  { %v3795_v54 = vsub.f32 1.5, %v3794_v21 }
0x16bf   :  { %v3813_v2 = vadd.f32 %v4201_v31, %v3808_v56 }
0x16c0   :  { %v3796_v34 = vmul.f32 %v4388_v63, %v3795_v54 }
0x16c1   :  { %v3824_v32 = vrot.slane %v3813_v2, 6 }
0x16c2   :  { %v3800_v43 = vsel %vm3799_vm4, %v4388_v63, %v3796_v34 }
0x16c3   :  { %v3804_v1 = vmul.f32 %v3800_v43, %v5609_v5  ;;  %v3826_v29 = vsel %vm3825_vm7, %v3824_v32, %v3823_v62 }
0x16c5   :  { %v3809_v25 = vmul.f32 %v4200_v8, %v3804_v1 }
0x16c7   :  { %v3814_v46 = vadd.f32 %v4201_v31, %v3809_v25 }
0x16c9   :  { %v3827_v20 = vrot.slane %v3814_v46, 5 }
0x16cb   :  { %v3829_v13 = vsel %vm3828_vm8, %v3827_v20, %v3826_v29 }
0x16cc   :  { %4054 = vmatmul.msk.f32.vlgmr.msra.gmra.mxu3 %vm148_vm5, %v3829_v13 }
0x174f   :  { %v3861_v11 = vpop.f32.mrf.mxu3 }
0x1750   :  { %v3862_v17 = vadd.f32 %v4202_v38, %v3861_v11 }
0x1752   :  { %4389 = vtanh.f32 %v3862_v17 }
0x1758   :  { %v4390_v5 = vpop.eup %4389 }
0x1759   :  { %v3866_v57 = vrot.slane %v4390_v5, 2  ;;  %v3881_v61 = vrot.slane %v4390_v5, 7  ;;  %v3868_v19 = vperm.slane %v4390_v5, 0  ;;  %v3874_v42 = vperm.slane %v4390_v5, 1 }
0x175b   :  { %v3869_v58 = vperm.slane %v3866_v57, 0  ;;  %v3875_v53 = vperm.slane %v3866_v57, 1  ;;  %v3882_v16 = vrot.slane %v3881_v61, 2  ;;  %v3883_v28 = vrot.slane %v3866_v57, 7 }
0x175d   :  { %v3870_v39 = vsel %vm3822_vm6, %v3869_v58, %v3868_v19  ;;  %v3876_v51 = vsel %vm3825_vm7, %v3875_v53, %v3874_v42  ;;  %v3884_v37 = vrot.slane %v3883_v28, 2  ;;  %v3887_v6 = vsub.f32 %v4390_v5, %v3882_v16 }
0x175e   :  { %3873 = vst.msk [vmem:[%s5650_s2] sm:$0x3] %vm3872_vm0, %v3870_v39  ;;  %v3899_v18 = vmul.f32 %v4390_v5, %v3882_v16 }
0x175f   :  { %4055 = vst.msk [vmem:[%s5650_s2 + $0x1] sm:$0x6] %vm3879_vm10, %v3876_v51  ;;  %v3888_v35 = vsub.f32 %v3866_v57, %v3884_v37  ;;  %v3889_v4 = vand.u32 2147483647, %v3887_v6  ;;  %v3900_v3 = vmul.f32 %v3884_v37, %v3866_v57 }
0x1760   :  { %v3903_v15 = vperm.slane %v3899_v18, 0 }
0x1761   :  { %v3890_v7 = vand.u32 2147483647, %v3888_v35  ;;  %v3904_v12 = vperm.slane %v3900_v3, 0  ;;  %v3893_v40 = vperm.slane %v3889_v4, 0 }
0x1763   :  { %v3894_v36 = vperm.slane %v3890_v7, 0  ;;  %v3905_v22 = vsel %vm3822_vm6, %v3904_v12, %v3903_v15 }
0x1764   :  { %4057 = vst.msk [vmem:[%s5650_s2 + $0x6] sm:$0x3] %vm3872_vm0, %v3905_v22 }
0x1765   :  { %v3895_v60 = vsel %vm3822_vm6, %v3894_v36, %v3893_v40 }
0x1766   :  { %4056 = vst.msk [vmem:[%s5650_s2 + $0x4] sm:$0x3] %vm3872_vm0, %v3895_v60 }
0x1767   :  { %3913 = vsyncpa [#allocation3], 1 }

</bundles_post_ra>
